<compile_context>
chip_gen: v6e
topology: v6e:2x2x1
jax: 0.10.0
libtpu: 0.0.40
codegen_flags: <defaults>
</compile_context>

<pallas_src>
import numpy as np
import jax
import jax.numpy as jnp
from jax import lax
from jax.experimental import pallas as pl
from jax.experimental.pallas import tpu as pltpu

_LANES = 128  # lane width of every channel-on-lanes slab


def _interp_matrix(n_in, n_out):
    """1-D linear interpolation matrix, PyTorch align_corners=True semantics."""
    out_idx = np.arange(n_out)
    if n_out == 1:
        src = np.zeros((n_out,), np.float64)
    else:
        src = out_idx * (n_in - 1) / (n_out - 1)
    i0 = np.clip(np.floor(src).astype(np.int64), 0, n_in - 1)
    i1 = np.minimum(i0 + 1, n_in - 1)
    frac = src - i0
    M = np.zeros((n_out, n_in), np.float32)
    M[out_idx, i0] += (1.0 - frac)
    M[out_idx, i1] += frac
    return jnp.asarray(M, jnp.float32)


def _interp_taps(n_in, n_out):
    """Static 2-tap (index, weight) decomposition of the same interpolation."""
    out_idx = np.arange(n_out)
    if n_out == 1:
        src = np.zeros((n_out,), np.float64)
    else:
        src = out_idx * (n_in - 1) / (n_out - 1)
    i0 = np.clip(np.floor(src).astype(np.int64), 0, n_in - 1)
    i1 = np.minimum(i0 + 1, n_in - 1)
    frac = src - i0
    return ([int(v) for v in i0], [int(v) for v in i1],
            [float(v) for v in (1.0 - frac)], [float(v) for v in frac])


def _make_up_kernel(H, W, h, w, PAD, ROWS, RC, NCH, Cin, K, packed,
                    row_lo, row_hi, row_w0, row_w1):
    HW = H * W
    TAPS = [(dy, dx) for dy in range(3) for dx in range(3)]

    def kernel(x1_ref, x2_ref, cm_ref, w1_ref, b1_ref, w2_ref, b2_ref,
               o_ref, p1_ref, p2_ref, s_ref):
        zpad = jnp.zeros((PAD, _LANES), jnp.bfloat16)
        zrow = jnp.zeros((1, _LANES), jnp.float32)
        # Chunk starts are multiples of RC and RC % W == 0, so a local row index
        # modulo W is the pixel's x coordinate (hoisted, reused by both convs).
        col = lax.broadcasted_iota(jnp.int32, (RC, 1), 0) % W
        not_first = col != 0          # x > 0    : left neighbour exists
        not_last = col != (W - 1)     # x < W-1  : right neighbour exists

        # ---- zero only the pad borders (interior is always fully overwritten).
        # Re-done every grid step so the kernel stays correct when the parallel
        # batch axis is split across TensorCores.
        p1_ref[0:PAD, :] = zpad
        p1_ref[PAD + HW:ROWS, :] = zpad
        p2_ref[0:PAD, :] = zpad
        p2_ref[PAD + HW:ROWS, :] = zpad

        # ---- bilinear 2x upsample of x2 (align_corners=True): column axis ----
        cm = cm_ref[...]                                            # (W, w) bf16
        for y in range(h):
            s_ref[y * W:(y + 1) * W, :] = jnp.dot(
                cm, x2_ref[0, y * w:(y + 1) * w, :],
                preferred_element_type=jnp.float32)

        # Pack the two horizontal (dx) neighbours of a block into lane groups
        # [C:2C] (left, x-1) and [2C:3C] (right, x+1); input f32, output bf16.
        def pack_dx(blk, C, mask_first=None, mask_last=None):
            left = jnp.concatenate([zrow, blk[:-1]], axis=0)        # value at x-1
            right = jnp.concatenate([blk[1:], zrow], axis=0)        # value at x+1
            if mask_first is not None:                              # zero at row wraps
                left = jnp.where(mask_first, left, 0.0)
                right = jnp.where(mask_last, right, 0.0)
            out = (blk + pltpu.roll(left, C, axis=1)
                   + pltpu.roll(right, 2 * C, axis=1))
            return out.astype(jnp.bfloat16)

        # ---- row-axis interp + channel concat -> packed conv1 source slab ----
        for Y in range(H):
            blk = s_ref[row_lo[Y] * W:(row_lo[Y] + 1) * W, :]
            if row_w0[Y] != 1.0:
                blk = row_w0[Y] * blk
            if row_w1[Y] != 0.0:
                blk = blk + row_w1[Y] * s_ref[row_hi[Y] * W:(row_hi[Y] + 1) * W, :]
            # x1 occupies lanes [0:C1], upsampled x2 lanes [C1:Cin] -> add == concat
            blk = blk + x1_ref[0, Y * W:(Y + 1) * W, :].astype(jnp.float32)
            if packed:
                # single image row: only its own first/last position wraps, and
                # those are exactly the zero rows inserted by the shift itself.
                blk_b = pack_dx(blk, Cin)
            else:
                blk_b = blk.astype(jnp.bfloat16)
            p1_ref[PAD + Y * W:PAD + (Y + 1) * W, :] = blk_b

        # ---- 3x3 convs ----
        def conv_packed(src_ref, w_ref, bias, base):     # 3 aligned matmuls (per dy)
            acc = jnp.dot(src_ref[base - W:base - W + RC, :], w_ref[0],
                          preferred_element_type=jnp.float32)
            acc = acc + jnp.dot(src_ref[base:base + RC, :], w_ref[1],
                                preferred_element_type=jnp.float32)
            acc = acc + jnp.dot(src_ref[base + W:base + W + RC, :], w_ref[2],
                                preferred_element_type=jnp.float32)
            return jnp.maximum(acc + bias, 0.0)

        def conv_taps(src_ref, w_ref, bias, base):       # fallback: 9 masked taps
            acc = jnp.zeros((RC, _LANES), jnp.float32)
            for t, (dy, dx) in enumerate(TAPS):
                start = base + (dy - 1) * W + (dx - 1)
                sl = src_ref[start:start + RC, :]
                if dx == 0:
                    sl = jnp.where(not_first, sl, 0)
                elif dx == 2:
                    sl = jnp.where(not_last, sl, 0)
                acc = acc + jnp.dot(sl, w_ref[t],
                                    preferred_element_type=jnp.float32)
            return jnp.maximum(acc + bias, 0.0)

        conv = conv_packed if packed else conv_taps

        b1 = b1_ref[...]
        for c in range(NCH):                     # conv1 + folded-BN + ReLU
            y1 = conv(p1_ref, w1_ref, b1, PAD + c * RC)
            if packed:
                y1_b = pack_dx(y1, K, not_first, not_last)
            else:
                y1_b = y1.astype(jnp.bfloat16)
            p2_ref[PAD + c * RC:PAD + (c + 1) * RC, :] = y1_b

        b2 = b2_ref[...]
        for c in range(NCH):                     # conv2 + folded-BN + ReLU
            y2 = conv(p2_ref, w2_ref, b2, PAD + c * RC)
            o_ref[0, c * RC:(c + 1) * RC, :] = y2.astype(jnp.bfloat16)

    return kernel


def up_forward(x1_nchw, x2_nchw, params):
    """Forward pass of `up` (bilinear=True). Inputs/outputs are NCHW float32."""
    B, C1, H, W = x1_nchw.shape
    B2, C2, h, w = x2_nchw.shape
    assert B == B2 and H == 2 * h and W == 2 * w
    w1f, b1f, w2f, b2f = params['w1f'], params['b1f'], params['w2f'], params['b2f']
    K = w1f.shape[0]
    Cin = C1 + C2
    assert w1f.shape == (K, Cin, 3, 3) and w2f.shape == (K, K, 3, 3)
    assert Cin <= _LANES and K <= _LANES, "channel counts must fit one 128-lane slab"
    packed = (3 * Cin <= _LANES) and (3 * K <= _LANES)   # dx taps fit in the lanes

    HW, hw = H * W, h * w
    # rows-per-chunk: keeps the f32 accumulator to a few vregs while M >= 128
    RH = max(1, min(H, 128 // W)) if W <= 128 else 1
    while H % RH:
        RH -= 1
    RC = RH * W
    NCH = H // RH
    # zero rows above/below the image: >= W+1 and 16-aligned so bf16 slab
    # slices/stores sit on (16,128) tile boundaries.
    PAD = -(-(W + 1) // 16) * 16
    ROWS = PAD + HW + PAD

    # ---- glue: NCHW -> (B, spatial, 128) channel-on-lanes bf16 slabs ----------
    x1_l = jnp.transpose(x1_nchw, (0, 2, 3, 1)).astype(jnp.float32).reshape(B, HW, C1)
    x1_l = jnp.pad(x1_l, ((0, 0), (0, 0), (0, _LANES - C1))).astype(jnp.bfloat16)
    x2_l = jnp.transpose(x2_nchw, (0, 2, 3, 1)).astype(jnp.float32).reshape(B, hw, C2)
    x2_l = jnp.pad(x2_l, ((0, 0), (0, 0), (C1, _LANES - C1 - C2))).astype(jnp.bfloat16)

    # ---- glue: interpolation constants (align_corners=True) -------------------
    Cm = _interp_matrix(w, W).astype(jnp.bfloat16)                  # (W, w)
    row_lo, row_hi, row_w0, row_w1 = _interp_taps(h, H)             # static taps

    # ---- glue: conv weights (bf16) + folded-BN bias ----------------------------
    w1_t = jnp.transpose(w1f, (2, 3, 1, 0))          # (dy, dx, cin, k)
    w2_t = jnp.transpose(w2f, (2, 3, 1, 0))          # (dy, dx, k,   k)
    if packed:
        # one (128,128) matrix per dy; dx taps packed along the reduction lanes
        # in the same group order as the packed activation slab (center,left,right).
        def pack_w(wt, C):
            Wp = jnp.zeros((3, _LANES, _LANES), jnp.float32)
            for gi, dx in enumerate((1, 0, 2)):
                Wp = Wp.at[:, gi * C:(gi + 1) * C, :K].set(wt[:, dx])
            return Wp.astype(jnp.bfloat16)
        W1, W2, NT = pack_w(w1_t, Cin), pack_w(w2_t, K), 3
    else:
        W1 = jnp.zeros((9, _LANES, _LANES), jnp.float32).at[:, :Cin, :K].set(
            w1_t.reshape(9, Cin, K)).astype(jnp.bfloat16)
        W2 = jnp.zeros((9, _LANES, _LANES), jnp.float32).at[:, :K, :K].set(
            w2_t.reshape(9, K, K)).astype(jnp.bfloat16)
        NT = 9
    b1p = jnp.zeros((1, _LANES), jnp.float32).at[0, :K].set(b1f)
    b2p = jnp.zeros((1, _LANES), jnp.float32).at[0, :K].set(b2f)

    kernel = _make_up_kernel(H, W, h, w, PAD, ROWS, RC, NCH, Cin, K, packed,
                             row_lo, row_hi, row_w0, row_w1)

    # generation-aware VMEM budget: real per-step footprint (I/O double-buffered
    # by the pipeline), floored at 32 MiB, capped at 48 MiB (safe on v7x 64 MiB/TC).
    vmem_need = (2 * (HW + hw + HW) * _LANES * 2            # x1 / x2 / out blocks
                 + 2 * 2 * NT * _LANES * _LANES * 2          # two weight tensors
                 + 2 * ROWS * _LANES * 2                     # packed source slabs
                 + h * W * _LANES * 4 + 64 * 1024)           # s_ref + misc
    vmem_limit = int(min(max(2 * vmem_need, 32 * 2 ** 20), 48 * 2 ** 20))

    out_flat = pl.pallas_call(
        kernel,
        out_shape=jax.ShapeDtypeStruct((B, HW, _LANES), jnp.bfloat16),
        grid=(B,),
        in_specs=[
            pl.BlockSpec((1, HW, _LANES), lambda b: (b, 0, 0)),       # x1 slab (bf16)
            pl.BlockSpec((1, hw, _LANES), lambda b: (b, 0, 0)),       # x2 slab (bf16)
            pl.BlockSpec((W, w), lambda b: (0, 0)),                   # column interp matrix
            pl.BlockSpec((NT, _LANES, _LANES), lambda b: (0, 0, 0)),  # conv1 weights
            pl.BlockSpec((1, _LANES), lambda b: (0, 0)),              # conv1 bias
            pl.BlockSpec((NT, _LANES, _LANES), lambda b: (0, 0, 0)),  # conv2 weights
            pl.BlockSpec((1, _LANES), lambda b: (0, 0)),              # conv2 bias
        ],
        out_specs=pl.BlockSpec((1, HW, _LANES), lambda b: (b, 0, 0)),
        scratch_shapes=[
            pltpu.VMEM((ROWS, _LANES), jnp.bfloat16),    # packed conv1 source slab
            pltpu.VMEM((ROWS, _LANES), jnp.bfloat16),    # packed conv2 source slab
            pltpu.VMEM((h * W, _LANES), jnp.float32),    # column-interpolated x2
        ],
        compiler_params=pltpu.CompilerParams(
            dimension_semantics=("parallel",),
            vmem_limit_bytes=vmem_limit),
    )(x1_l, x2_l, Cm, W1, b1p, W2, b2p)

    # Glue: (B, H*W, 128) bf16 -> NCHW f32 (keep only the K real output channels)
    return (out_flat[:, :, :K].astype(jnp.float32)
            .reshape(B, H, W, K).transpose(0, 3, 1, 2))


def make_params(key, in_planes, kernels):
    """Deterministic synthetic parameters; BN folded into conv (inference mode)."""
    C1, C2, K = in_planes, in_planes // 2, kernels
    Cin = C1 + C2
    ks = jax.random.split(key, 12)
    eps = 1e-5

    def fold(wc, bc, gamma, beta, rmean, rvar):
        scale = gamma / jnp.sqrt(rvar + eps)
        return wc * scale[:, None, None, None], (bc - rmean) * scale + beta

    w1 = 0.1 * jax.random.normal(ks[0], (K, Cin, 3, 3), jnp.float32)
    b1 = 0.1 * jax.random.normal(ks[1], (K,), jnp.float32)
    g1 = 1.0 + 0.1 * jax.random.normal(ks[2], (K,), jnp.float32)
    be1 = 0.1 * jax.random.normal(ks[3], (K,), jnp.float32)
    rm1 = 0.1 * jax.random.normal(ks[4], (K,), jnp.float32)
    rv1 = 0.5 + jax.random.uniform(ks[5], (K,), jnp.float32)

    w2 = 0.1 * jax.random.normal(ks[6], (K, K, 3, 3), jnp.float32)
    b2 = 0.1 * jax.random.normal(ks[7], (K,), jnp.float32)
    g2 = 1.0 + 0.1 * jax.random.normal(ks[8], (K,), jnp.float32)
    be2 = 0.1 * jax.random.normal(ks[9], (K,), jnp.float32)
    rm2 = 0.1 * jax.random.normal(ks[10], (K,), jnp.float32)
    rv2 = 0.5 + jax.random.uniform(ks[11], (K,), jnp.float32)

    w1f, b1f = fold(w1, b1, g1, be1, rm1, rv1)
    w2f, b2f = fold(w2, b2, g2, be2, rm2, rv2)
    # TODO(synk): BatchNorm2d is reproduced in inference mode (running stats folded
    # into conv scale/bias); training-mode batch statistics are not implemented.
    return {'w1f': w1f, 'b1f': b1f, 'w2f': w2f, 'b2f': b2f}


def reference_forward(x1, x2, params):
    """Pure-JAX reference of the same forward pass (for verification)."""
    _, _, h, w = x2.shape
    H, W = 2 * h, 2 * w
    R = _interp_matrix(h, H)
    Cm = _interp_matrix(w, W)
    x2u = jnp.einsum('Ih,bchw,Jw->bcIJ', R, x2, Cm,
                     precision=jax.lax.Precision.HIGHEST)
    xc = jnp.concatenate([x1, x2u], axis=1)

    def conv_bn_relu(x, wf, bf):
        y = jax.lax.conv_general_dilated(
            x, wf, window_strides=(1, 1), padding=((1, 1), (1, 1)),
            dimension_numbers=('NCHW', 'OIHW', 'NCHW'),
            precision=jax.lax.Precision.HIGHEST)
        return jnp.maximum(y + bf[None, :, None, None], 0.0)

    y = conv_bn_relu(xc, params['w1f'], params['b1f'])
    y = conv_bn_relu(y, params['w2f'], params['b2f'])
    return y


if __name__ == "__main__":
    key = jax.random.PRNGKey(0)
    k1, k2, kp = jax.random.split(key, 3)

    B, in_planes, kernels = 2, 4, 8
    H = W = 16
    # x1: skip connection (full res, in_planes channels);
    # x2: deeper feature map (half res, in_planes//2 channels).
    x1 = jax.random.normal(k1, (B, in_planes, H, W), jnp.float32)
    x2 = jax.random.normal(k2, (B, in_planes // 2, H // 2, W // 2), jnp.float32)
    params = make_params(kp, in_planes, kernels)

    out = up_forward(x1, x2, params)
    out = jax.block_until_ready(out)

    assert out.shape == (B, kernels, H, W), out.shape
    ref = reference_forward(x1, x2, params)
    # bf16 end-to-end (inputs, conv operands, slabs, output) vs f32-HIGHEST ref.
    np.testing.assert_allclose(np.asarray(out), np.asarray(ref), rtol=3e-2, atol=3e-2)

    print("KERNEL_OK")
</pallas_src>

<mosaic_0001>
module attributes {stable_mosaic.version = 11 : i64} {
  func.func @kernel(%arg0: i32, %arg1: memref<1x256x128xbf16, #tpu.memory_space<vmem>>, %arg2: memref<1x64x128xbf16, #tpu.memory_space<vmem>>, %arg3: memref<16x8xbf16, #tpu.memory_space<vmem>>, %arg4: memref<3x128x128xbf16, #tpu.memory_space<vmem>>, %arg5: memref<1x128xf32, #tpu.memory_space<vmem>>, %arg6: memref<3x128x128xbf16, #tpu.memory_space<vmem>>, %arg7: memref<1x128xf32, #tpu.memory_space<vmem>>, %arg8: memref<1x256x128xbf16, #tpu.memory_space<vmem>>, %arg9: memref<320x128xbf16, #tpu.memory_space<vmem>>, %arg10: memref<320x128xbf16, #tpu.memory_space<vmem>>, %arg11: memref<128x128xf32, #tpu.memory_space<vmem>>) attributes {dimension_semantics = [#tpu.dimension_semantics<parallel>], iteration_bounds = array<i64: 2>, scalar_prefetch = 0 : i64, scratch_operands = 3 : i64, tpu.core_type = #tpu.core_type<tc>, window_params = [{transform_indices = @transform_0, window_bounds = array<i64: 1, 256, 128>}, {transform_indices = @transform_1, window_bounds = array<i64: 1, 64, 128>}, {pipeline_mode = #tpu.pipeline_mode<synchronous>, transform_indices = @transform_2, window_bounds = array<i64: 16, 8>}, {pipeline_mode = #tpu.pipeline_mode<synchronous>, transform_indices = @transform_3, window_bounds = array<i64: 3, 128, 128>}, {pipeline_mode = #tpu.pipeline_mode<synchronous>, transform_indices = @transform_4, window_bounds = array<i64: 1, 128>}, {pipeline_mode = #tpu.pipeline_mode<synchronous>, transform_indices = @transform_5, window_bounds = array<i64: 3, 128, 128>}, {pipeline_mode = #tpu.pipeline_mode<synchronous>, transform_indices = @transform_6, window_bounds = array<i64: 1, 128>}, {transform_indices = @transform_7, window_bounds = array<i64: 1, 256, 128>}]} {
    %cst = arith.constant 0.000000e+00 : bf16
    %0 = vector.broadcast %cst : bf16 to vector<32x128xbf16>
    %cst_0 = arith.constant 0.000000e+00 : f32
    %1 = vector.broadcast %cst_0 : f32 to vector<1x128xf32>
    %2 = tpu.iota {dimensions = array<i32: 0>} : vector<128x1xi32>
    %c16_i32 = arith.constant 16 : i32
    %c0_i32 = arith.constant 0 : i32
    %3 = arith.cmpi eq, %c16_i32, %c0_i32 : i32
    %c1_i32 = arith.constant 1 : i32
    %4 = arith.select %3, %c1_i32, %c16_i32 : i32
    %5 = vector.broadcast %4 : i32 to vector<128x1xi32>
    %6 = arith.remsi %2, %5 : vector<128x1xi32>
    %c0_i32_1 = arith.constant 0 : i32
    %7 = vector.broadcast %c0_i32_1 : i32 to vector<128x1xi32>
    %8 = arith.cmpi ne, %6, %7 : vector<128x1xi32>
    %c0_i32_2 = arith.constant 0 : i32
    %9 = vector.broadcast %c0_i32_2 : i32 to vector<128x1xi32>
    %10 = arith.cmpi slt, %6, %9 : vector<128x1xi32>
    %c0_i32_3 = arith.constant 0 : i32
    %11 = arith.cmpi slt, %4, %c0_i32_3 : i32
    %12 = vector.broadcast %11 : i1 to vector<128x1xi1>
    %13 = vector.broadcast %12 : vector<128x1xi1> to vector<128x1xi1>
    %14 = arith.xori %10, %13 : vector<128x1xi1>
    %15 = arith.andi %14, %8 : vector<128x1xi1>
    %16 = vector.broadcast %4 : i32 to vector<128x1xi32>
    %17 = arith.addi %6, %16 : vector<128x1xi32>
    %18 = arith.select %15, %17, %6 : vector<128x1xi1>, vector<128x1xi32>
    %c0_i32_4 = arith.constant 0 : i32
    %19 = vector.broadcast %c0_i32_4 : i32 to vector<128x1xi32>
    %20 = arith.cmpi ne, %18, %19 : vector<128x1xi32>
    %c15_i32 = arith.constant 15 : i32
    %21 = vector.broadcast %c15_i32 : i32 to vector<128x1xi32>
    %22 = arith.cmpi ne, %18, %21 : vector<128x1xi32>
    %c0 = arith.constant 0 : index
    %c0_5 = arith.constant 0 : index
    %23 = vector.load %arg9[%c0, %c0_5] : memref<320x128xbf16, #tpu.memory_space<vmem>>, vector<32x128xbf16>
    tpu.vector_store %arg9[%c0, %c0_5], %0 {strides = array<i32>} : memref<320x128xbf16, #tpu.memory_space<vmem>>, vector<32x128xbf16>,
    %c288 = arith.constant 288 : index
    %c0_6 = arith.constant 0 : index
    %24 = vector.load %arg9[%c288, %c0_6] : memref<320x128xbf16, #tpu.memory_space<vmem>>, vector<32x128xbf16>
    tpu.vector_store %arg9[%c288, %c0_6], %0 {strides = array<i32>} : memref<320x128xbf16, #tpu.memory_space<vmem>>, vector<32x128xbf16>,
    %c0_7 = arith.constant 0 : index
    %c0_8 = arith.constant 0 : index
    %25 = vector.load %arg10[%c0_7, %c0_8] : memref<320x128xbf16, #tpu.memory_space<vmem>>, vector<32x128xbf16>
    tpu.vector_store %arg10[%c0_7, %c0_8], %0 {strides = array<i32>} : memref<320x128xbf16, #tpu.memory_space<vmem>>, vector<32x128xbf16>,
    %c288_9 = arith.constant 288 : index
    %c0_10 = arith.constant 0 : index
    %26 = vector.load %arg10[%c288_9, %c0_10] : memref<320x128xbf16, #tpu.memory_space<vmem>>, vector<32x128xbf16>
    tpu.vector_store %arg10[%c288_9, %c0_10], %0 {strides = array<i32>} : memref<320x128xbf16, #tpu.memory_space<vmem>>, vector<32x128xbf16>,
    %c0_11 = arith.constant 0 : index
    %c0_12 = arith.constant 0 : index
    %27 = vector.load %arg3[%c0_11, %c0_12] : memref<16x8xbf16, #tpu.memory_space<vmem>>, vector<16x8xbf16>
    %c0_13 = arith.constant 0 : index
    %c0_14 = arith.constant 0 : index
    %c0_15 = arith.constant 0 : index
    %28 = vector.load %arg2[%c0_13, %c0_14, %c0_15] : memref<1x64x128xbf16, #tpu.memory_space<vmem>>, vector<1x8x128xbf16>
    %29 = vector.shape_cast %28 : vector<1x8x128xbf16> to vector<8x128xbf16>
    %cst_16 = arith.constant dense<0.000000e+00> : vector<16x128xf32>
    %30 = tpu.matmul %27, %29, %cst_16 {dimension_numbers = #tpu.dot_dimension_numbers<[1], [0], [0], [1], [0, 0, 1, 1], [], []>} : vector<16x8xbf16>, vector<8x128xbf16>, vector<16x128xf32> -> vector<16x128xf32>
    %c0_17 = arith.constant 0 : index
    %c0_18 = arith.constant 0 : index
    %31 = vector.load %arg11[%c0_17, %c0_18] : memref<128x128xf32, #tpu.memory_space<vmem>>, vector<16x128xf32>
    tpu.vector_store %arg11[%c0_17, %c0_18], %30 {strides = array<i32>} : memref<128x128xf32, #tpu.memory_space<vmem>>, vector<16x128xf32>,
    %c0_19 = arith.constant 0 : index
    %c8 = arith.constant 8 : index
    %c0_20 = arith.constant 0 : index
    %32 = vector.load %arg2[%c0_19, %c8, %c0_20] : memref<1x64x128xbf16, #tpu.memory_space<vmem>>, vector<1x8x128xbf16>
    %33 = vector.shape_cast %32 : vector<1x8x128xbf16> to vector<8x128xbf16>
    %cst_21 = arith.constant dense<0.000000e+00> : vector<16x128xf32>
    %34 = tpu.matmul %27, %33, %cst_21 {dimension_numbers = #tpu.dot_dimension_numbers<[1], [0], [0], [1], [0, 0, 1, 1], [], []>} : vector<16x8xbf16>, vector<8x128xbf16>, vector<16x128xf32> -> vector<16x128xf32>
    %c16 = arith.constant 16 : index
    %c0_22 = arith.constant 0 : index
    %35 = vector.load %arg11[%c16, %c0_22] : memref<128x128xf32, #tpu.memory_space<vmem>>, vector<16x128xf32>
    tpu.vector_store %arg11[%c16, %c0_22], %34 {strides = array<i32>} : memref<128x128xf32, #tpu.memory_space<vmem>>, vector<16x128xf32>,
    %c0_23 = arith.constant 0 : index
    %c16_24 = arith.constant 16 : index
    %c0_25 = arith.constant 0 : index
    %36 = vector.load %arg2[%c0_23, %c16_24, %c0_25] : memref<1x64x128xbf16, #tpu.memory_space<vmem>>, vector<1x8x128xbf16>
    %37 = vector.shape_cast %36 : vector<1x8x128xbf16> to vector<8x128xbf16>
    %cst_26 = arith.constant dense<0.000000e+00> : vector<16x128xf32>
    %38 = tpu.matmul %27, %37, %cst_26 {dimension_numbers = #tpu.dot_dimension_numbers<[1], [0], [0], [1], [0, 0, 1, 1], [], []>} : vector<16x8xbf16>, vector<8x128xbf16>, vector<16x128xf32> -> vector<16x128xf32>
    %c32 = arith.constant 32 : index
    %c0_27 = arith.constant 0 : index
    %39 = vector.load %arg11[%c32, %c0_27] : memref<128x128xf32, #tpu.memory_space<vmem>>, vector<16x128xf32>
    tpu.vector_store %arg11[%c32, %c0_27], %38 {strides = array<i32>} : memref<128x128xf32, #tpu.memory_space<vmem>>, vector<16x128xf32>,
    %c0_28 = arith.constant 0 : index
    %c24 = arith.constant 24 : index
    %c0_29 = arith.constant 0 : index
    %40 = vector.load %arg2[%c0_28, %c24, %c0_29] : memref<1x64x128xbf16, #tpu.memory_space<vmem>>, vector<1x8x128xbf16>
    %41 = vector.shape_cast %40 : vector<1x8x128xbf16> to vector<8x128xbf16>
    %cst_30 = arith.constant dense<0.000000e+00> : vector<16x128xf32>
    %42 = tpu.matmul %27, %41, %cst_30 {dimension_numbers = #tpu.dot_dimension_numbers<[1], [0], [0], [1], [0, 0, 1, 1], [], []>} : vector<16x8xbf16>, vector<8x128xbf16>, vector<16x128xf32> -> vector<16x128xf32>
    %c48 = arith.constant 48 : index
    %c0_31 = arith.constant 0 : index
    %43 = vector.load %arg11[%c48, %c0_31] : memref<128x128xf32, #tpu.memory_space<vmem>>, vector<16x128xf32>
    tpu.vector_store %arg11[%c48, %c0_31], %42 {strides = array<i32>} : memref<128x128xf32, #tpu.memory_space<vmem>>, vector<16x128xf32>,
    %c0_32 = arith.constant 0 : index
    %c32_33 = arith.constant 32 : index
    %c0_34 = arith.constant 0 : index
    %44 = vector.load %arg2[%c0_32, %c32_33, %c0_34] : memref<1x64x128xbf16, #tpu.memory_space<vmem>>, vector<1x8x128xbf16>
    %45 = vector.shape_cast %44 : vector<1x8x128xbf16> to vector<8x128xbf16>
    %cst_35 = arith.constant dense<0.000000e+00> : vector<16x128xf32>
    %46 = tpu.matmul %27, %45, %cst_35 {dimension_numbers = #tpu.dot_dimension_numbers<[1], [0], [0], [1], [0, 0, 1, 1], [], []>} : vector<16x8xbf16>, vector<8x128xbf16>, vector<16x128xf32> -> vector<16x128xf32>
    %c64 = arith.constant 64 : index
    %c0_36 = arith.constant 0 : index
    %47 = vector.load %arg11[%c64, %c0_36] : memref<128x128xf32, #tpu.memory_space<vmem>>, vector<16x128xf32>
    tpu.vector_store %arg11[%c64, %c0_36], %46 {strides = array<i32>} : memref<128x128xf32, #tpu.memory_space<vmem>>, vector<16x128xf32>,
    %c0_37 = arith.constant 0 : index
    %c40 = arith.constant 40 : index
    %c0_38 = arith.constant 0 : index
    %48 = vector.load %arg2[%c0_37, %c40, %c0_38] : memref<1x64x128xbf16, #tpu.memory_space<vmem>>, vector<1x8x128xbf16>
    %49 = vector.shape_cast %48 : vector<1x8x128xbf16> to vector<8x128xbf16>
    %cst_39 = arith.constant dense<0.000000e+00> : vector<16x128xf32>
    %50 = tpu.matmul %27, %49, %cst_39 {dimension_numbers = #tpu.dot_dimension_numbers<[1], [0], [0], [1], [0, 0, 1, 1], [], []>} : vector<16x8xbf16>, vector<8x128xbf16>, vector<16x128xf32> -> vector<16x128xf32>
    %c80 = arith.constant 80 : index
    %c0_40 = arith.constant 0 : index
    %51 = vector.load %arg11[%c80, %c0_40] : memref<128x128xf32, #tpu.memory_space<vmem>>, vector<16x128xf32>
    tpu.vector_store %arg11[%c80, %c0_40], %50 {strides = array<i32>} : memref<128x128xf32, #tpu.memory_space<vmem>>, vector<16x128xf32>,
    %c0_41 = arith.constant 0 : index
    %c48_42 = arith.constant 48 : index
    %c0_43 = arith.constant 0 : index
    %52 = vector.load %arg2[%c0_41, %c48_42, %c0_43] : memref<1x64x128xbf16, #tpu.memory_space<vmem>>, vector<1x8x128xbf16>
    %53 = vector.shape_cast %52 : vector<1x8x128xbf16> to vector<8x128xbf16>
    %cst_44 = arith.constant dense<0.000000e+00> : vector<16x128xf32>
    %54 = tpu.matmul %27, %53, %cst_44 {dimension_numbers = #tpu.dot_dimension_numbers<[1], [0], [0], [1], [0, 0, 1, 1], [], []>} : vector<16x8xbf16>, vector<8x128xbf16>, vector<16x128xf32> -> vector<16x128xf32>
    %c96 = arith.constant 96 : index
    %c0_45 = arith.constant 0 : index
    %55 = vector.load %arg11[%c96, %c0_45] : memref<128x128xf32, #tpu.memory_space<vmem>>, vector<16x128xf32>
    tpu.vector_store %arg11[%c96, %c0_45], %54 {strides = array<i32>} : memref<128x128xf32, #tpu.memory_space<vmem>>, vector<16x128xf32>,
    %c0_46 = arith.constant 0 : index
    %c56 = arith.constant 56 : index
    %c0_47 = arith.constant 0 : index
    %56 = vector.load %arg2[%c0_46, %c56, %c0_47] : memref<1x64x128xbf16, #tpu.memory_space<vmem>>, vector<1x8x128xbf16>
    %57 = vector.shape_cast %56 : vector<1x8x128xbf16> to vector<8x128xbf16>
    %cst_48 = arith.constant dense<0.000000e+00> : vector<16x128xf32>
    %58 = tpu.matmul %27, %57, %cst_48 {dimension_numbers = #tpu.dot_dimension_numbers<[1], [0], [0], [1], [0, 0, 1, 1], [], []>} : vector<16x8xbf16>, vector<8x128xbf16>, vector<16x128xf32> -> vector<16x128xf32>
    %c112 = arith.constant 112 : index
    %c0_49 = arith.constant 0 : index
    %59 = vector.load %arg11[%c112, %c0_49] : memref<128x128xf32, #tpu.memory_space<vmem>>, vector<16x128xf32>
    tpu.vector_store %arg11[%c112, %c0_49], %58 {strides = array<i32>} : memref<128x128xf32, #tpu.memory_space<vmem>>, vector<16x128xf32>,
    %c0_50 = arith.constant 0 : index
    %c0_51 = arith.constant 0 : index
    %60 = vector.load %arg11[%c0_50, %c0_51] : memref<128x128xf32, #tpu.memory_space<vmem>>, vector<16x128xf32>
    %c0_52 = arith.constant 0 : index
    %c0_53 = arith.constant 0 : index
    %c0_54 = arith.constant 0 : index
    %61 = vector.load %arg1[%c0_52, %c0_53, %c0_54] : memref<1x256x128xbf16, #tpu.memory_space<vmem>>, vector<1x16x128xbf16>
    %62 = vector.shape_cast %61 : vector<1x16x128xbf16> to vector<16x128xbf16>
    %63 = arith.extf %62 : vector<16x128xbf16> to vector<16x128xf32>
    %64 = arith.addf %60, %63 : vector<16x128xf32>
    %65 = vector.extract_strided_slice %64 {offsets = [0, 0], sizes = [15, 128], strides = [1, 1]} : vector<16x128xf32> to vector<15x128xf32>
    %66 = tpu.concatenate %1, %65 in 0 : vector<1x128xf32>, vector<15x128xf32> -> vector<16x128xf32>
    %67 = vector.extract_strided_slice %64 {offsets = [1, 0], sizes = [15, 128], strides = [1, 1]} : vector<16x128xf32> to vector<15x128xf32>
    %68 = tpu.concatenate %67, %1 in 0 : vector<15x128xf32>, vector<1x128xf32> -> vector<16x128xf32>
    %c6_i32 = arith.constant 6 : i32
    %69 = tpu.dynamic_rotate %66 by %c6_i32 dim 1 : vector<16x128xf32>, i32 -> vector<16x128xf32>
    %70 = arith.addf %64, %69 : vector<16x128xf32>
    %c12_i32 = arith.constant 12 : i32
    %71 = tpu.dynamic_rotate %68 by %c12_i32 dim 1 : vector<16x128xf32>, i32 -> vector<16x128xf32>
    %72 = arith.addf %70, %71 : vector<16x128xf32>
    %73 = arith.truncf %72 : vector<16x128xf32> to vector<16x128xbf16>
    %c32_55 = arith.constant 32 : index
    %c0_56 = arith.constant 0 : index
    %74 = vector.load %arg9[%c32_55, %c0_56] : memref<320x128xbf16, #tpu.memory_space<vmem>>, vector<16x128xbf16>
    tpu.vector_store %arg9[%c32_55, %c0_56], %73 {strides = array<i32>} : memref<320x128xbf16, #tpu.memory_space<vmem>>, vector<16x128xbf16>,
    %c0_57 = arith.constant 0 : index
    %c0_58 = arith.constant 0 : index
    %75 = vector.load %arg11[%c0_57, %c0_58] : memref<128x128xf32, #tpu.memory_space<vmem>>, vector<16x128xf32>
    %cst_59 = arith.constant 0.533333361 : f32
    %76 = vector.broadcast %cst_59 : f32 to vector<16x128xf32>
    %77 = arith.mulf %76, %75 : vector<16x128xf32>
    %c16_60 = arith.constant 16 : index
    %c0_61 = arith.constant 0 : index
    %78 = vector.load %arg11[%c16_60, %c0_61] : memref<128x128xf32, #tpu.memory_space<vmem>>, vector<16x128xf32>
    %cst_62 = arith.constant 0.466666669 : f32
    %79 = vector.broadcast %cst_62 : f32 to vector<16x128xf32>
    %80 = arith.mulf %79, %78 : vector<16x128xf32>
    %81 = arith.addf %77, %80 : vector<16x128xf32>
    %c0_63 = arith.constant 0 : index
    %c16_64 = arith.constant 16 : index
    %c0_65 = arith.constant 0 : index
    %82 = vector.load %arg1[%c0_63, %c16_64, %c0_65] : memref<1x256x128xbf16, #tpu.memory_space<vmem>>, vector<1x16x128xbf16>
    %83 = vector.shape_cast %82 : vector<1x16x128xbf16> to vector<16x128xbf16>
    %84 = arith.extf %83 : vector<16x128xbf16> to vector<16x128xf32>
    %85 = arith.addf %81, %84 : vector<16x128xf32>
    %86 = vector.extract_strided_slice %85 {offsets = [0, 0], sizes = [15, 128], strides = [1, 1]} : vector<16x128xf32> to vector<15x128xf32>
    %87 = tpu.concatenate %1, %86 in 0 : vector<1x128xf32>, vector<15x128xf32> -> vector<16x128xf32>
    %88 = vector.extract_strided_slice %85 {offsets = [1, 0], sizes = [15, 128], strides = [1, 1]} : vector<16x128xf32> to vector<15x128xf32>
    %89 = tpu.concatenate %88, %1 in 0 : vector<15x128xf32>, vector<1x128xf32> -> vector<16x128xf32>
    %c6_i32_66 = arith.constant 6 : i32
    %90 = tpu.dynamic_rotate %87 by %c6_i32_66 dim 1 : vector<16x128xf32>, i32 -> vector<16x128xf32>
    %91 = arith.addf %85, %90 : vector<16x128xf32>
    %c12_i32_67 = arith.constant 12 : i32
    %92 = tpu.dynamic_rotate %89 by %c12_i32_67 dim 1 : vector<16x128xf32>, i32 -> vector<16x128xf32>
    %93 = arith.addf %91, %92 : vector<16x128xf32>
    %94 = arith.truncf %93 : vector<16x128xf32> to vector<16x128xbf16>
    %c48_68 = arith.constant 48 : index
    %c0_69 = arith.constant 0 : index
    %95 = vector.load %arg9[%c48_68, %c0_69] : memref<320x128xbf16, #tpu.memory_space<vmem>>, vector<16x128xbf16>
    tpu.vector_store %arg9[%c48_68, %c0_69], %94 {strides = array<i32>} : memref<320x128xbf16, #tpu.memory_space<vmem>>, vector<16x128xbf16>,
    %c0_70 = arith.constant 0 : index
    %c0_71 = arith.constant 0 : index
    %96 = vector.load %arg11[%c0_70, %c0_71] : memref<128x128xf32, #tpu.memory_space<vmem>>, vector<16x128xf32>
    %cst_72 = arith.constant 0.0666666701 : f32
    %97 = vector.broadcast %cst_72 : f32 to vector<16x128xf32>
    %98 = arith.mulf %97, %96 : vector<16x128xf32>
    %c16_73 = arith.constant 16 : index
    %c0_74 = arith.constant 0 : index
    %99 = vector.load %arg11[%c16_73, %c0_74] : memref<128x128xf32, #tpu.memory_space<vmem>>, vector<16x128xf32>
    %cst_75 = arith.constant 0.933333337 : f32
    %100 = vector.broadcast %cst_75 : f32 to vector<16x128xf32>
    %101 = arith.mulf %100, %99 : vector<16x128xf32>
    %102 = arith.addf %98, %101 : vector<16x128xf32>
    %c0_76 = arith.constant 0 : index
    %c32_77 = arith.constant 32 : index
    %c0_78 = arith.constant 0 : index
    %103 = vector.load %arg1[%c0_76, %c32_77, %c0_78] : memref<1x256x128xbf16, #tpu.memory_space<vmem>>, vector<1x16x128xbf16>
    %104 = vector.shape_cast %103 : vector<1x16x128xbf16> to vector<16x128xbf16>
    %105 = arith.extf %104 : vector<16x128xbf16> to vector<16x128xf32>
    %106 = arith.addf %102, %105 : vector<16x128xf32>
    %107 = vector.extract_strided_slice %106 {offsets = [0, 0], sizes = [15, 128], strides = [1, 1]} : vector<16x128xf32> to vector<15x128xf32>
    %108 = tpu.concatenate %1, %107 in 0 : vector<1x128xf32>, vector<15x128xf32> -> vector<16x128xf32>
    %109 = vector.extract_strided_slice %106 {offsets = [1, 0], sizes = [15, 128], strides = [1, 1]} : vector<16x128xf32> to vector<15x128xf32>
    %110 = tpu.concatenate %109, %1 in 0 : vector<15x128xf32>, vector<1x128xf32> -> vector<16x128xf32>
    %c6_i32_79 = arith.constant 6 : i32
    %111 = tpu.dynamic_rotate %108 by %c6_i32_79 dim 1 : vector<16x128xf32>, i32 -> vector<16x128xf32>
    %112 = arith.addf %106, %111 : vector<16x128xf32>
    %c12_i32_80 = arith.constant 12 : i32
    %113 = tpu.dynamic_rotate %110 by %c12_i32_80 dim 1 : vector<16x128xf32>, i32 -> vector<16x128xf32>
    %114 = arith.addf %112, %113 : vector<16x128xf32>
    %115 = arith.truncf %114 : vector<16x128xf32> to vector<16x128xbf16>
    %c64_81 = arith.constant 64 : index
    %c0_82 = arith.constant 0 : index
    %116 = vector.load %arg9[%c64_81, %c0_82] : memref<320x128xbf16, #tpu.memory_space<vmem>>, vector<16x128xbf16>
    tpu.vector_store %arg9[%c64_81, %c0_82], %115 {strides = array<i32>} : memref<320x128xbf16, #tpu.memory_space<vmem>>, vector<16x128xbf16>,
    %c16_83 = arith.constant 16 : index
    %c0_84 = arith.constant 0 : index
    %117 = vector.load %arg11[%c16_83, %c0_84] : memref<128x128xf32, #tpu.memory_space<vmem>>, vector<16x128xf32>
    %cst_85 = arith.constant 6.000000e-01 : f32
    %118 = vector.broadcast %cst_85 : f32 to vector<16x128xf32>
    %119 = arith.mulf %118, %117 : vector<16x128xf32>
    %c32_86 = arith.constant 32 : index
    %c0_87 = arith.constant 0 : index
    %120 = vector.load %arg11[%c32_86, %c0_87] : memref<128x128xf32, #tpu.memory_space<vmem>>, vector<16x128xf32>
    %cst_88 = arith.constant 4.000000e-01 : f32
    %121 = vector.broadcast %cst_88 : f32 to vector<16x128xf32>
    %122 = arith.mulf %121, %120 : vector<16x128xf32>
    %123 = arith.addf %119, %122 : vector<16x128xf32>
    %c0_89 = arith.constant 0 : index
    %c48_90 = arith.constant 48 : index
    %c0_91 = arith.constant 0 : index
    %124 = vector.load %arg1[%c0_89, %c48_90, %c0_91] : memref<1x256x128xbf16, #tpu.memory_space<vmem>>, vector<1x16x128xbf16>
    %125 = vector.shape_cast %124 : vector<1x16x128xbf16> to vector<16x128xbf16>
    %126 = arith.extf %125 : vector<16x128xbf16> to vector<16x128xf32>
    %127 = arith.addf %123, %126 : vector<16x128xf32>
    %128 = vector.extract_strided_slice %127 {offsets = [0, 0], sizes = [15, 128], strides = [1, 1]} : vector<16x128xf32> to vector<15x128xf32>
    %129 = tpu.concatenate %1, %128 in 0 : vector<1x128xf32>, vector<15x128xf32> -> vector<16x128xf32>
    %130 = vector.extract_strided_slice %127 {offsets = [1, 0], sizes = [15, 128], strides = [1, 1]} : vector<16x128xf32> to vector<15x128xf32>
    %131 = tpu.concatenate %130, %1 in 0 : vector<15x128xf32>, vector<1x128xf32> -> vector<16x128xf32>
    %c6_i32_92 = arith.constant 6 : i32
    %132 = tpu.dynamic_rotate %129 by %c6_i32_92 dim 1 : vector<16x128xf32>, i32 -> vector<16x128xf32>
    %133 = arith.addf %127, %132 : vector<16x128xf32>
    %c12_i32_93 = arith.constant 12 : i32
    %134 = tpu.dynamic_rotate %131 by %c12_i32_93 dim 1 : vector<16x128xf32>, i32 -> vector<16x128xf32>
    %135 = arith.addf %133, %134 : vector<16x128xf32>
    %136 = arith.truncf %135 : vector<16x128xf32> to vector<16x128xbf16>
    %c80_94 = arith.constant 80 : index
    %c0_95 = arith.constant 0 : index
    %137 = vector.load %arg9[%c80_94, %c0_95] : memref<320x128xbf16, #tpu.memory_space<vmem>>, vector<16x128xbf16>
    tpu.vector_store %arg9[%c80_94, %c0_95], %136 {strides = array<i32>} : memref<320x128xbf16, #tpu.memory_space<vmem>>, vector<16x128xbf16>,
    %c16_96 = arith.constant 16 : index
    %c0_97 = arith.constant 0 : index
    %138 = vector.load %arg11[%c16_96, %c0_97] : memref<128x128xf32, #tpu.memory_space<vmem>>, vector<16x128xf32>
    %cst_98 = arith.constant 0.13333334 : f32
    %139 = vector.broadcast %cst_98 : f32 to vector<16x128xf32>
    %140 = arith.mulf %139, %138 : vector<16x128xf32>
    %c32_99 = arith.constant 32 : index
    %c0_100 = arith.constant 0 : index
    %141 = vector.load %arg11[%c32_99, %c0_100] : memref<128x128xf32, #tpu.memory_space<vmem>>, vector<16x128xf32>
    %cst_101 = arith.constant 0.866666674 : f32
    %142 = vector.broadcast %cst_101 : f32 to vector<16x128xf32>
    %143 = arith.mulf %142, %141 : vector<16x128xf32>
    %144 = arith.addf %140, %143 : vector<16x128xf32>
    %c0_102 = arith.constant 0 : index
    %c64_103 = arith.constant 64 : index
    %c0_104 = arith.constant 0 : index
    %145 = vector.load %arg1[%c0_102, %c64_103, %c0_104] : memref<1x256x128xbf16, #tpu.memory_space<vmem>>, vector<1x16x128xbf16>
    %146 = vector.shape_cast %145 : vector<1x16x128xbf16> to vector<16x128xbf16>
    %147 = arith.extf %146 : vector<16x128xbf16> to vector<16x128xf32>
    %148 = arith.addf %144, %147 : vector<16x128xf32>
    %149 = vector.extract_strided_slice %148 {offsets = [0, 0], sizes = [15, 128], strides = [1, 1]} : vector<16x128xf32> to vector<15x128xf32>
    %150 = tpu.concatenate %1, %149 in 0 : vector<1x128xf32>, vector<15x128xf32> -> vector<16x128xf32>
    %151 = vector.extract_strided_slice %148 {offsets = [1, 0], sizes = [15, 128], strides = [1, 1]} : vector<16x128xf32> to vector<15x128xf32>
    %152 = tpu.concatenate %151, %1 in 0 : vector<15x128xf32>, vector<1x128xf32> -> vector<16x128xf32>
    %c6_i32_105 = arith.constant 6 : i32
    %153 = tpu.dynamic_rotate %150 by %c6_i32_105 dim 1 : vector<16x128xf32>, i32 -> vector<16x128xf32>
    %154 = arith.addf %148, %153 : vector<16x128xf32>
    %c12_i32_106 = arith.constant 12 : i32
    %155 = tpu.dynamic_rotate %152 by %c12_i32_106 dim 1 : vector<16x128xf32>, i32 -> vector<16x128xf32>
    %156 = arith.addf %154, %155 : vector<16x128xf32>
    %157 = arith.truncf %156 : vector<16x128xf32> to vector<16x128xbf16>
    %c96_107 = arith.constant 96 : index
    %c0_108 = arith.constant 0 : index
    %158 = vector.load %arg9[%c96_107, %c0_108] : memref<320x128xbf16, #tpu.memory_space<vmem>>, vector<16x128xbf16>
    tpu.vector_store %arg9[%c96_107, %c0_108], %157 {strides = array<i32>} : memref<320x128xbf16, #tpu.memory_space<vmem>>, vector<16x128xbf16>,
    %c32_109 = arith.constant 32 : index
    %c0_110 = arith.constant 0 : index
    %159 = vector.load %arg11[%c32_109, %c0_110] : memref<128x128xf32, #tpu.memory_space<vmem>>, vector<16x128xf32>
    %cst_111 = arith.constant 0.666666686 : f32
    %160 = vector.broadcast %cst_111 : f32 to vector<16x128xf32>
    %161 = arith.mulf %160, %159 : vector<16x128xf32>
    %c48_112 = arith.constant 48 : index
    %c0_113 = arith.constant 0 : index
    %162 = vector.load %arg11[%c48_112, %c0_113] : memref<128x128xf32, #tpu.memory_space<vmem>>, vector<16x128xf32>
    %cst_114 = arith.constant 0.333333343 : f32
    %163 = vector.broadcast %cst_114 : f32 to vector<16x128xf32>
    %164 = arith.mulf %163, %162 : vector<16x128xf32>
    %165 = arith.addf %161, %164 : vector<16x128xf32>
    %c0_115 = arith.constant 0 : index
    %c80_116 = arith.constant 80 : index
    %c0_117 = arith.constant 0 : index
    %166 = vector.load %arg1[%c0_115, %c80_116, %c0_117] : memref<1x256x128xbf16, #tpu.memory_space<vmem>>, vector<1x16x128xbf16>
    %167 = vector.shape_cast %166 : vector<1x16x128xbf16> to vector<16x128xbf16>
    %168 = arith.extf %167 : vector<16x128xbf16> to vector<16x128xf32>
    %169 = arith.addf %165, %168 : vector<16x128xf32>
    %170 = vector.extract_strided_slice %169 {offsets = [0, 0], sizes = [15, 128], strides = [1, 1]} : vector<16x128xf32> to vector<15x128xf32>
    %171 = tpu.concatenate %1, %170 in 0 : vector<1x128xf32>, vector<15x128xf32> -> vector<16x128xf32>
    %172 = vector.extract_strided_slice %169 {offsets = [1, 0], sizes = [15, 128], strides = [1, 1]} : vector<16x128xf32> to vector<15x128xf32>
    %173 = tpu.concatenate %172, %1 in 0 : vector<15x128xf32>, vector<1x128xf32> -> vector<16x128xf32>
    %c6_i32_118 = arith.constant 6 : i32
    %174 = tpu.dynamic_rotate %171 by %c6_i32_118 dim 1 : vector<16x128xf32>, i32 -> vector<16x128xf32>
    %175 = arith.addf %169, %174 : vector<16x128xf32>
    %c12_i32_119 = arith.constant 12 : i32
    %176 = tpu.dynamic_rotate %173 by %c12_i32_119 dim 1 : vector<16x128xf32>, i32 -> vector<16x128xf32>
    %177 = arith.addf %175, %176 : vector<16x128xf32>
    %178 = arith.truncf %177 : vector<16x128xf32> to vector<16x128xbf16>
    %c112_120 = arith.constant 112 : index
    %c0_121 = arith.constant 0 : index
    %179 = vector.load %arg9[%c112_120, %c0_121] : memref<320x128xbf16, #tpu.memory_space<vmem>>, vector<16x128xbf16>
    tpu.vector_store %arg9[%c112_120, %c0_121], %178 {strides = array<i32>} : memref<320x128xbf16, #tpu.memory_space<vmem>>, vector<16x128xbf16>,
    %c32_122 = arith.constant 32 : index
    %c0_123 = arith.constant 0 : index
    %180 = vector.load %arg11[%c32_122, %c0_123] : memref<128x128xf32, #tpu.memory_space<vmem>>, vector<16x128xf32>
    %cst_124 = arith.constant 2.000000e-01 : f32
    %181 = vector.broadcast %cst_124 : f32 to vector<16x128xf32>
    %182 = arith.mulf %181, %180 : vector<16x128xf32>
    %c48_125 = arith.constant 48 : index
    %c0_126 = arith.constant 0 : index
    %183 = vector.load %arg11[%c48_125, %c0_126] : memref<128x128xf32, #tpu.memory_space<vmem>>, vector<16x128xf32>
    %cst_127 = arith.constant 8.000000e-01 : f32
    %184 = vector.broadcast %cst_127 : f32 to vector<16x128xf32>
    %185 = arith.mulf %184, %183 : vector<16x128xf32>
    %186 = arith.addf %182, %185 : vector<16x128xf32>
    %c0_128 = arith.constant 0 : index
    %c96_129 = arith.constant 96 : index
    %c0_130 = arith.constant 0 : index
    %187 = vector.load %arg1[%c0_128, %c96_129, %c0_130] : memref<1x256x128xbf16, #tpu.memory_space<vmem>>, vector<1x16x128xbf16>
    %188 = vector.shape_cast %187 : vector<1x16x128xbf16> to vector<16x128xbf16>
    %189 = arith.extf %188 : vector<16x128xbf16> to vector<16x128xf32>
    %190 = arith.addf %186, %189 : vector<16x128xf32>
    %191 = vector.extract_strided_slice %190 {offsets = [0, 0], sizes = [15, 128], strides = [1, 1]} : vector<16x128xf32> to vector<15x128xf32>
    %192 = tpu.concatenate %1, %191 in 0 : vector<1x128xf32>, vector<15x128xf32> -> vector<16x128xf32>
    %193 = vector.extract_strided_slice %190 {offsets = [1, 0], sizes = [15, 128], strides = [1, 1]} : vector<16x128xf32> to vector<15x128xf32>
    %194 = tpu.concatenate %193, %1 in 0 : vector<15x128xf32>, vector<1x128xf32> -> vector<16x128xf32>
    %c6_i32_131 = arith.constant 6 : i32
    %195 = tpu.dynamic_rotate %192 by %c6_i32_131 dim 1 : vector<16x128xf32>, i32 -> vector<16x128xf32>
    %196 = arith.addf %190, %195 : vector<16x128xf32>
    %c12_i32_132 = arith.constant 12 : i32
    %197 = tpu.dynamic_rotate %194 by %c12_i32_132 dim 1 : vector<16x128xf32>, i32 -> vector<16x128xf32>
    %198 = arith.addf %196, %197 : vector<16x128xf32>
    %199 = arith.truncf %198 : vector<16x128xf32> to vector<16x128xbf16>
    %c128 = arith.constant 128 : index
    %c0_133 = arith.constant 0 : index
    %200 = vector.load %arg9[%c128, %c0_133] : memref<320x128xbf16, #tpu.memory_space<vmem>>, vector<16x128xbf16>
    tpu.vector_store %arg9[%c128, %c0_133], %199 {strides = array<i32>} : memref<320x128xbf16, #tpu.memory_space<vmem>>, vector<16x128xbf16>,
    %c48_134 = arith.constant 48 : index
    %c0_135 = arith.constant 0 : index
    %201 = vector.load %arg11[%c48_134, %c0_135] : memref<128x128xf32, #tpu.memory_space<vmem>>, vector<16x128xf32>
    %cst_136 = arith.constant 0.733333349 : f32
    %202 = vector.broadcast %cst_136 : f32 to vector<16x128xf32>
    %203 = arith.mulf %202, %201 : vector<16x128xf32>
    %c64_137 = arith.constant 64 : index
    %c0_138 = arith.constant 0 : index
    %204 = vector.load %arg11[%c64_137, %c0_138] : memref<128x128xf32, #tpu.memory_space<vmem>>, vector<16x128xf32>
    %cst_139 = arith.constant 0.266666681 : f32
    %205 = vector.broadcast %cst_139 : f32 to vector<16x128xf32>
    %206 = arith.mulf %205, %204 : vector<16x128xf32>
    %207 = arith.addf %203, %206 : vector<16x128xf32>
    %c0_140 = arith.constant 0 : index
    %c112_141 = arith.constant 112 : index
    %c0_142 = arith.constant 0 : index
    %208 = vector.load %arg1[%c0_140, %c112_141, %c0_142] : memref<1x256x128xbf16, #tpu.memory_space<vmem>>, vector<1x16x128xbf16>
    %209 = vector.shape_cast %208 : vector<1x16x128xbf16> to vector<16x128xbf16>
    %210 = arith.extf %209 : vector<16x128xbf16> to vector<16x128xf32>
    %211 = arith.addf %207, %210 : vector<16x128xf32>
    %212 = vector.extract_strided_slice %211 {offsets = [0, 0], sizes = [15, 128], strides = [1, 1]} : vector<16x128xf32> to vector<15x128xf32>
    %213 = tpu.concatenate %1, %212 in 0 : vector<1x128xf32>, vector<15x128xf32> -> vector<16x128xf32>
    %214 = vector.extract_strided_slice %211 {offsets = [1, 0], sizes = [15, 128], strides = [1, 1]} : vector<16x128xf32> to vector<15x128xf32>
    %215 = tpu.concatenate %214, %1 in 0 : vector<15x128xf32>, vector<1x128xf32> -> vector<16x128xf32>
    %c6_i32_143 = arith.constant 6 : i32
    %216 = tpu.dynamic_rotate %213 by %c6_i32_143 dim 1 : vector<16x128xf32>, i32 -> vector<16x128xf32>
    %217 = arith.addf %211, %216 : vector<16x128xf32>
    %c12_i32_144 = arith.constant 12 : i32
    %218 = tpu.dynamic_rotate %215 by %c12_i32_144 dim 1 : vector<16x128xf32>, i32 -> vector<16x128xf32>
    %219 = arith.addf %217, %218 : vector<16x128xf32>
    %220 = arith.truncf %219 : vector<16x128xf32> to vector<16x128xbf16>
    %c144 = arith.constant 144 : index
    %c0_145 = arith.constant 0 : index
    %221 = vector.load %arg9[%c144, %c0_145] : memref<320x128xbf16, #tpu.memory_space<vmem>>, vector<16x128xbf16>
    tpu.vector_store %arg9[%c144, %c0_145], %220 {strides = array<i32>} : memref<320x128xbf16, #tpu.memory_space<vmem>>, vector<16x128xbf16>,
    %c48_146 = arith.constant 48 : index
    %c0_147 = arith.constant 0 : index
    %222 = vector.load %arg11[%c48_146, %c0_147] : memref<128x128xf32, #tpu.memory_space<vmem>>, vector<16x128xf32>
    %cst_148 = arith.constant 0.266666681 : f32
    %223 = vector.broadcast %cst_148 : f32 to vector<16x128xf32>
    %224 = arith.mulf %223, %222 : vector<16x128xf32>
    %c64_149 = arith.constant 64 : index
    %c0_150 = arith.constant 0 : index
    %225 = vector.load %arg11[%c64_149, %c0_150] : memref<128x128xf32, #tpu.memory_space<vmem>>, vector<16x128xf32>
    %cst_151 = arith.constant 0.733333349 : f32
    %226 = vector.broadcast %cst_151 : f32 to vector<16x128xf32>
    %227 = arith.mulf %226, %225 : vector<16x128xf32>
    %228 = arith.addf %224, %227 : vector<16x128xf32>
    %c0_152 = arith.constant 0 : index
    %c128_153 = arith.constant 128 : index
    %c0_154 = arith.constant 0 : index
    %229 = vector.load %arg1[%c0_152, %c128_153, %c0_154] : memref<1x256x128xbf16, #tpu.memory_space<vmem>>, vector<1x16x128xbf16>
    %230 = vector.shape_cast %229 : vector<1x16x128xbf16> to vector<16x128xbf16>
    %231 = arith.extf %230 : vector<16x128xbf16> to vector<16x128xf32>
    %232 = arith.addf %228, %231 : vector<16x128xf32>
    %233 = vector.extract_strided_slice %232 {offsets = [0, 0], sizes = [15, 128], strides = [1, 1]} : vector<16x128xf32> to vector<15x128xf32>
    %234 = tpu.concatenate %1, %233 in 0 : vector<1x128xf32>, vector<15x128xf32> -> vector<16x128xf32>
    %235 = vector.extract_strided_slice %232 {offsets = [1, 0], sizes = [15, 128], strides = [1, 1]} : vector<16x128xf32> to vector<15x128xf32>
    %236 = tpu.concatenate %235, %1 in 0 : vector<15x128xf32>, vector<1x128xf32> -> vector<16x128xf32>
    %c6_i32_155 = arith.constant 6 : i32
    %237 = tpu.dynamic_rotate %234 by %c6_i32_155 dim 1 : vector<16x128xf32>, i32 -> vector<16x128xf32>
    %238 = arith.addf %232, %237 : vector<16x128xf32>
    %c12_i32_156 = arith.constant 12 : i32
    %239 = tpu.dynamic_rotate %236 by %c12_i32_156 dim 1 : vector<16x128xf32>, i32 -> vector<16x128xf32>
    %240 = arith.addf %238, %239 : vector<16x128xf32>
    %241 = arith.truncf %240 : vector<16x128xf32> to vector<16x128xbf16>
    %c160 = arith.constant 160 : index
    %c0_157 = arith.constant 0 : index
    %242 = vector.load %arg9[%c160, %c0_157] : memref<320x128xbf16, #tpu.memory_space<vmem>>, vector<16x128xbf16>
    tpu.vector_store %arg9[%c160, %c0_157], %241 {strides = array<i32>} : memref<320x128xbf16, #tpu.memory_space<vmem>>, vector<16x128xbf16>,
    %c64_158 = arith.constant 64 : index
    %c0_159 = arith.constant 0 : index
    %243 = vector.load %arg11[%c64_158, %c0_159] : memref<128x128xf32, #tpu.memory_space<vmem>>, vector<16x128xf32>
    %cst_160 = arith.constant 8.000000e-01 : f32
    %244 = vector.broadcast %cst_160 : f32 to vector<16x128xf32>
    %245 = arith.mulf %244, %243 : vector<16x128xf32>
    %c80_161 = arith.constant 80 : index
    %c0_162 = arith.constant 0 : index
    %246 = vector.load %arg11[%c80_161, %c0_162] : memref<128x128xf32, #tpu.memory_space<vmem>>, vector<16x128xf32>
    %cst_163 = arith.constant 2.000000e-01 : f32
    %247 = vector.broadcast %cst_163 : f32 to vector<16x128xf32>
    %248 = arith.mulf %247, %246 : vector<16x128xf32>
    %249 = arith.addf %245, %248 : vector<16x128xf32>
    %c0_164 = arith.constant 0 : index
    %c144_165 = arith.constant 144 : index
    %c0_166 = arith.constant 0 : index
    %250 = vector.load %arg1[%c0_164, %c144_165, %c0_166] : memref<1x256x128xbf16, #tpu.memory_space<vmem>>, vector<1x16x128xbf16>
    %251 = vector.shape_cast %250 : vector<1x16x128xbf16> to vector<16x128xbf16>
    %252 = arith.extf %251 : vector<16x128xbf16> to vector<16x128xf32>
    %253 = arith.addf %249, %252 : vector<16x128xf32>
    %254 = vector.extract_strided_slice %253 {offsets = [0, 0], sizes = [15, 128], strides = [1, 1]} : vector<16x128xf32> to vector<15x128xf32>
    %255 = tpu.concatenate %1, %254 in 0 : vector<1x128xf32>, vector<15x128xf32> -> vector<16x128xf32>
    %256 = vector.extract_strided_slice %253 {offsets = [1, 0], sizes = [15, 128], strides = [1, 1]} : vector<16x128xf32> to vector<15x128xf32>
    %257 = tpu.concatenate %256, %1 in 0 : vector<15x128xf32>, vector<1x128xf32> -> vector<16x128xf32>
    %c6_i32_167 = arith.constant 6 : i32
    %258 = tpu.dynamic_rotate %255 by %c6_i32_167 dim 1 : vector<16x128xf32>, i32 -> vector<16x128xf32>
    %259 = arith.addf %253, %258 : vector<16x128xf32>
    %c12_i32_168 = arith.constant 12 : i32
    %260 = tpu.dynamic_rotate %257 by %c12_i32_168 dim 1 : vector<16x128xf32>, i32 -> vector<16x128xf32>
    %261 = arith.addf %259, %260 : vector<16x128xf32>
    %262 = arith.truncf %261 : vector<16x128xf32> to vector<16x128xbf16>
    %c176 = arith.constant 176 : index
    %c0_169 = arith.constant 0 : index
    %263 = vector.load %arg9[%c176, %c0_169] : memref<320x128xbf16, #tpu.memory_space<vmem>>, vector<16x128xbf16>
    tpu.vector_store %arg9[%c176, %c0_169], %262 {strides = array<i32>} : memref<320x128xbf16, #tpu.memory_space<vmem>>, vector<16x128xbf16>,
    %c64_170 = arith.constant 64 : index
    %c0_171 = arith.constant 0 : index
    %264 = vector.load %arg11[%c64_170, %c0_171] : memref<128x128xf32, #tpu.memory_space<vmem>>, vector<16x128xf32>
    %cst_172 = arith.constant 0.333333343 : f32
    %265 = vector.broadcast %cst_172 : f32 to vector<16x128xf32>
    %266 = arith.mulf %265, %264 : vector<16x128xf32>
    %c80_173 = arith.constant 80 : index
    %c0_174 = arith.constant 0 : index
    %267 = vector.load %arg11[%c80_173, %c0_174] : memref<128x128xf32, #tpu.memory_space<vmem>>, vector<16x128xf32>
    %cst_175 = arith.constant 0.666666686 : f32
    %268 = vector.broadcast %cst_175 : f32 to vector<16x128xf32>
    %269 = arith.mulf %268, %267 : vector<16x128xf32>
    %270 = arith.addf %266, %269 : vector<16x128xf32>
    %c0_176 = arith.constant 0 : index
    %c160_177 = arith.constant 160 : index
    %c0_178 = arith.constant 0 : index
    %271 = vector.load %arg1[%c0_176, %c160_177, %c0_178] : memref<1x256x128xbf16, #tpu.memory_space<vmem>>, vector<1x16x128xbf16>
    %272 = vector.shape_cast %271 : vector<1x16x128xbf16> to vector<16x128xbf16>
    %273 = arith.extf %272 : vector<16x128xbf16> to vector<16x128xf32>
    %274 = arith.addf %270, %273 : vector<16x128xf32>
    %275 = vector.extract_strided_slice %274 {offsets = [0, 0], sizes = [15, 128], strides = [1, 1]} : vector<16x128xf32> to vector<15x128xf32>
    %276 = tpu.concatenate %1, %275 in 0 : vector<1x128xf32>, vector<15x128xf32> -> vector<16x128xf32>
    %277 = vector.extract_strided_slice %274 {offsets = [1, 0], sizes = [15, 128], strides = [1, 1]} : vector<16x128xf32> to vector<15x128xf32>
    %278 = tpu.concatenate %277, %1 in 0 : vector<15x128xf32>, vector<1x128xf32> -> vector<16x128xf32>
    %c6_i32_179 = arith.constant 6 : i32
    %279 = tpu.dynamic_rotate %276 by %c6_i32_179 dim 1 : vector<16x128xf32>, i32 -> vector<16x128xf32>
    %280 = arith.addf %274, %279 : vector<16x128xf32>
    %c12_i32_180 = arith.constant 12 : i32
    %281 = tpu.dynamic_rotate %278 by %c12_i32_180 dim 1 : vector<16x128xf32>, i32 -> vector<16x128xf32>
    %282 = arith.addf %280, %281 : vector<16x128xf32>
    %283 = arith.truncf %282 : vector<16x128xf32> to vector<16x128xbf16>
    %c192 = arith.constant 192 : index
    %c0_181 = arith.constant 0 : index
    %284 = vector.load %arg9[%c192, %c0_181] : memref<320x128xbf16, #tpu.memory_space<vmem>>, vector<16x128xbf16>
    tpu.vector_store %arg9[%c192, %c0_181], %283 {strides = array<i32>} : memref<320x128xbf16, #tpu.memory_space<vmem>>, vector<16x128xbf16>,
    %c80_182 = arith.constant 80 : index
    %c0_183 = arith.constant 0 : index
    %285 = vector.load %arg11[%c80_182, %c0_183] : memref<128x128xf32, #tpu.memory_space<vmem>>, vector<16x128xf32>
    %cst_184 = arith.constant 0.866666674 : f32
    %286 = vector.broadcast %cst_184 : f32 to vector<16x128xf32>
    %287 = arith.mulf %286, %285 : vector<16x128xf32>
    %c96_185 = arith.constant 96 : index
    %c0_186 = arith.constant 0 : index
    %288 = vector.load %arg11[%c96_185, %c0_186] : memref<128x128xf32, #tpu.memory_space<vmem>>, vector<16x128xf32>
    %cst_187 = arith.constant 0.13333334 : f32
    %289 = vector.broadcast %cst_187 : f32 to vector<16x128xf32>
    %290 = arith.mulf %289, %288 : vector<16x128xf32>
    %291 = arith.addf %287, %290 : vector<16x128xf32>
    %c0_188 = arith.constant 0 : index
    %c176_189 = arith.constant 176 : index
    %c0_190 = arith.constant 0 : index
    %292 = vector.load %arg1[%c0_188, %c176_189, %c0_190] : memref<1x256x128xbf16, #tpu.memory_space<vmem>>, vector<1x16x128xbf16>
    %293 = vector.shape_cast %292 : vector<1x16x128xbf16> to vector<16x128xbf16>
    %294 = arith.extf %293 : vector<16x128xbf16> to vector<16x128xf32>
    %295 = arith.addf %291, %294 : vector<16x128xf32>
    %296 = vector.extract_strided_slice %295 {offsets = [0, 0], sizes = [15, 128], strides = [1, 1]} : vector<16x128xf32> to vector<15x128xf32>
    %297 = tpu.concatenate %1, %296 in 0 : vector<1x128xf32>, vector<15x128xf32> -> vector<16x128xf32>
    %298 = vector.extract_strided_slice %295 {offsets = [1, 0], sizes = [15, 128], strides = [1, 1]} : vector<16x128xf32> to vector<15x128xf32>
    %299 = tpu.concatenate %298, %1 in 0 : vector<15x128xf32>, vector<1x128xf32> -> vector<16x128xf32>
    %c6_i32_191 = arith.constant 6 : i32
    %300 = tpu.dynamic_rotate %297 by %c6_i32_191 dim 1 : vector<16x128xf32>, i32 -> vector<16x128xf32>
    %301 = arith.addf %295, %300 : vector<16x128xf32>
    %c12_i32_192 = arith.constant 12 : i32
    %302 = tpu.dynamic_rotate %299 by %c12_i32_192 dim 1 : vector<16x128xf32>, i32 -> vector<16x128xf32>
    %303 = arith.addf %301, %302 : vector<16x128xf32>
    %304 = arith.truncf %303 : vector<16x128xf32> to vector<16x128xbf16>
    %c208 = arith.constant 208 : index
    %c0_193 = arith.constant 0 : index
    %305 = vector.load %arg9[%c208, %c0_193] : memref<320x128xbf16, #tpu.memory_space<vmem>>, vector<16x128xbf16>
    tpu.vector_store %arg9[%c208, %c0_193], %304 {strides = array<i32>} : memref<320x128xbf16, #tpu.memory_space<vmem>>, vector<16x128xbf16>,
    %c80_194 = arith.constant 80 : index
    %c0_195 = arith.constant 0 : index
    %306 = vector.load %arg11[%c80_194, %c0_195] : memref<128x128xf32, #tpu.memory_space<vmem>>, vector<16x128xf32>
    %cst_196 = arith.constant 4.000000e-01 : f32
    %307 = vector.broadcast %cst_196 : f32 to vector<16x128xf32>
    %308 = arith.mulf %307, %306 : vector<16x128xf32>
    %c96_197 = arith.constant 96 : index
    %c0_198 = arith.constant 0 : index
    %309 = vector.load %arg11[%c96_197, %c0_198] : memref<128x128xf32, #tpu.memory_space<vmem>>, vector<16x128xf32>
    %cst_199 = arith.constant 6.000000e-01 : f32
    %310 = vector.broadcast %cst_199 : f32 to vector<16x128xf32>
    %311 = arith.mulf %310, %309 : vector<16x128xf32>
    %312 = arith.addf %308, %311 : vector<16x128xf32>
    %c0_200 = arith.constant 0 : index
    %c192_201 = arith.constant 192 : index
    %c0_202 = arith.constant 0 : index
    %313 = vector.load %arg1[%c0_200, %c192_201, %c0_202] : memref<1x256x128xbf16, #tpu.memory_space<vmem>>, vector<1x16x128xbf16>
    %314 = vector.shape_cast %313 : vector<1x16x128xbf16> to vector<16x128xbf16>
    %315 = arith.extf %314 : vector<16x128xbf16> to vector<16x128xf32>
    %316 = arith.addf %312, %315 : vector<16x128xf32>
    %317 = vector.extract_strided_slice %316 {offsets = [0, 0], sizes = [15, 128], strides = [1, 1]} : vector<16x128xf32> to vector<15x128xf32>
    %318 = tpu.concatenate %1, %317 in 0 : vector<1x128xf32>, vector<15x128xf32> -> vector<16x128xf32>
    %319 = vector.extract_strided_slice %316 {offsets = [1, 0], sizes = [15, 128], strides = [1, 1]} : vector<16x128xf32> to vector<15x128xf32>
    %320 = tpu.concatenate %319, %1 in 0 : vector<15x128xf32>, vector<1x128xf32> -> vector<16x128xf32>
    %c6_i32_203 = arith.constant 6 : i32
    %321 = tpu.dynamic_rotate %318 by %c6_i32_203 dim 1 : vector<16x128xf32>, i32 -> vector<16x128xf32>
    %322 = arith.addf %316, %321 : vector<16x128xf32>
    %c12_i32_204 = arith.constant 12 : i32
    %323 = tpu.dynamic_rotate %320 by %c12_i32_204 dim 1 : vector<16x128xf32>, i32 -> vector<16x128xf32>
    %324 = arith.addf %322, %323 : vector<16x128xf32>
    %325 = arith.truncf %324 : vector<16x128xf32> to vector<16x128xbf16>
    %c224 = arith.constant 224 : index
    %c0_205 = arith.constant 0 : index
    %326 = vector.load %arg9[%c224, %c0_205] : memref<320x128xbf16, #tpu.memory_space<vmem>>, vector<16x128xbf16>
    tpu.vector_store %arg9[%c224, %c0_205], %325 {strides = array<i32>} : memref<320x128xbf16, #tpu.memory_space<vmem>>, vector<16x128xbf16>,
    %c96_206 = arith.constant 96 : index
    %c0_207 = arith.constant 0 : index
    %327 = vector.load %arg11[%c96_206, %c0_207] : memref<128x128xf32, #tpu.memory_space<vmem>>, vector<16x128xf32>
    %cst_208 = arith.constant 0.933333337 : f32
    %328 = vector.broadcast %cst_208 : f32 to vector<16x128xf32>
    %329 = arith.mulf %328, %327 : vector<16x128xf32>
    %c112_209 = arith.constant 112 : index
    %c0_210 = arith.constant 0 : index
    %330 = vector.load %arg11[%c112_209, %c0_210] : memref<128x128xf32, #tpu.memory_space<vmem>>, vector<16x128xf32>
    %cst_211 = arith.constant 0.0666666701 : f32
    %331 = vector.broadcast %cst_211 : f32 to vector<16x128xf32>
    %332 = arith.mulf %331, %330 : vector<16x128xf32>
    %333 = arith.addf %329, %332 : vector<16x128xf32>
    %c0_212 = arith.constant 0 : index
    %c208_213 = arith.constant 208 : index
    %c0_214 = arith.constant 0 : index
    %334 = vector.load %arg1[%c0_212, %c208_213, %c0_214] : memref<1x256x128xbf16, #tpu.memory_space<vmem>>, vector<1x16x128xbf16>
    %335 = vector.shape_cast %334 : vector<1x16x128xbf16> to vector<16x128xbf16>
    %336 = arith.extf %335 : vector<16x128xbf16> to vector<16x128xf32>
    %337 = arith.addf %333, %336 : vector<16x128xf32>
    %338 = vector.extract_strided_slice %337 {offsets = [0, 0], sizes = [15, 128], strides = [1, 1]} : vector<16x128xf32> to vector<15x128xf32>
    %339 = tpu.concatenate %1, %338 in 0 : vector<1x128xf32>, vector<15x128xf32> -> vector<16x128xf32>
    %340 = vector.extract_strided_slice %337 {offsets = [1, 0], sizes = [15, 128], strides = [1, 1]} : vector<16x128xf32> to vector<15x128xf32>
    %341 = tpu.concatenate %340, %1 in 0 : vector<15x128xf32>, vector<1x128xf32> -> vector<16x128xf32>
    %c6_i32_215 = arith.constant 6 : i32
    %342 = tpu.dynamic_rotate %339 by %c6_i32_215 dim 1 : vector<16x128xf32>, i32 -> vector<16x128xf32>
    %343 = arith.addf %337, %342 : vector<16x128xf32>
    %c12_i32_216 = arith.constant 12 : i32
    %344 = tpu.dynamic_rotate %341 by %c12_i32_216 dim 1 : vector<16x128xf32>, i32 -> vector<16x128xf32>
    %345 = arith.addf %343, %344 : vector<16x128xf32>
    %346 = arith.truncf %345 : vector<16x128xf32> to vector<16x128xbf16>
    %c240 = arith.constant 240 : index
    %c0_217 = arith.constant 0 : index
    %347 = vector.load %arg9[%c240, %c0_217] : memref<320x128xbf16, #tpu.memory_space<vmem>>, vector<16x128xbf16>
    tpu.vector_store %arg9[%c240, %c0_217], %346 {strides = array<i32>} : memref<320x128xbf16, #tpu.memory_space<vmem>>, vector<16x128xbf16>,
    %c96_218 = arith.constant 96 : index
    %c0_219 = arith.constant 0 : index
    %348 = vector.load %arg11[%c96_218, %c0_219] : memref<128x128xf32, #tpu.memory_space<vmem>>, vector<16x128xf32>
    %cst_220 = arith.constant 0.466666669 : f32
    %349 = vector.broadcast %cst_220 : f32 to vector<16x128xf32>
    %350 = arith.mulf %349, %348 : vector<16x128xf32>
    %c112_221 = arith.constant 112 : index
    %c0_222 = arith.constant 0 : index
    %351 = vector.load %arg11[%c112_221, %c0_222] : memref<128x128xf32, #tpu.memory_space<vmem>>, vector<16x128xf32>
    %cst_223 = arith.constant 0.533333361 : f32
    %352 = vector.broadcast %cst_223 : f32 to vector<16x128xf32>
    %353 = arith.mulf %352, %351 : vector<16x128xf32>
    %354 = arith.addf %350, %353 : vector<16x128xf32>
    %c0_224 = arith.constant 0 : index
    %c224_225 = arith.constant 224 : index
    %c0_226 = arith.constant 0 : index
    %355 = vector.load %arg1[%c0_224, %c224_225, %c0_226] : memref<1x256x128xbf16, #tpu.memory_space<vmem>>, vector<1x16x128xbf16>
    %356 = vector.shape_cast %355 : vector<1x16x128xbf16> to vector<16x128xbf16>
    %357 = arith.extf %356 : vector<16x128xbf16> to vector<16x128xf32>
    %358 = arith.addf %354, %357 : vector<16x128xf32>
    %359 = vector.extract_strided_slice %358 {offsets = [0, 0], sizes = [15, 128], strides = [1, 1]} : vector<16x128xf32> to vector<15x128xf32>
    %360 = tpu.concatenate %1, %359 in 0 : vector<1x128xf32>, vector<15x128xf32> -> vector<16x128xf32>
    %361 = vector.extract_strided_slice %358 {offsets = [1, 0], sizes = [15, 128], strides = [1, 1]} : vector<16x128xf32> to vector<15x128xf32>
    %362 = tpu.concatenate %361, %1 in 0 : vector<15x128xf32>, vector<1x128xf32> -> vector<16x128xf32>
    %c6_i32_227 = arith.constant 6 : i32
    %363 = tpu.dynamic_rotate %360 by %c6_i32_227 dim 1 : vector<16x128xf32>, i32 -> vector<16x128xf32>
    %364 = arith.addf %358, %363 : vector<16x128xf32>
    %c12_i32_228 = arith.constant 12 : i32
    %365 = tpu.dynamic_rotate %362 by %c12_i32_228 dim 1 : vector<16x128xf32>, i32 -> vector<16x128xf32>
    %366 = arith.addf %364, %365 : vector<16x128xf32>
    %367 = arith.truncf %366 : vector<16x128xf32> to vector<16x128xbf16>
    %c256 = arith.constant 256 : index
    %c0_229 = arith.constant 0 : index
    %368 = vector.load %arg9[%c256, %c0_229] : memref<320x128xbf16, #tpu.memory_space<vmem>>, vector<16x128xbf16>
    tpu.vector_store %arg9[%c256, %c0_229], %367 {strides = array<i32>} : memref<320x128xbf16, #tpu.memory_space<vmem>>, vector<16x128xbf16>,
    %c112_230 = arith.constant 112 : index
    %c0_231 = arith.constant 0 : index
    %369 = vector.load %arg11[%c112_230, %c0_231] : memref<128x128xf32, #tpu.memory_space<vmem>>, vector<16x128xf32>
    %c0_232 = arith.constant 0 : index
    %c240_233 = arith.constant 240 : index
    %c0_234 = arith.constant 0 : index
    %370 = vector.load %arg1[%c0_232, %c240_233, %c0_234] : memref<1x256x128xbf16, #tpu.memory_space<vmem>>, vector<1x16x128xbf16>
    %371 = vector.shape_cast %370 : vector<1x16x128xbf16> to vector<16x128xbf16>
    %372 = arith.extf %371 : vector<16x128xbf16> to vector<16x128xf32>
    %373 = arith.addf %369, %372 : vector<16x128xf32>
    %374 = vector.extract_strided_slice %373 {offsets = [0, 0], sizes = [15, 128], strides = [1, 1]} : vector<16x128xf32> to vector<15x128xf32>
    %375 = tpu.concatenate %1, %374 in 0 : vector<1x128xf32>, vector<15x128xf32> -> vector<16x128xf32>
    %376 = vector.extract_strided_slice %373 {offsets = [1, 0], sizes = [15, 128], strides = [1, 1]} : vector<16x128xf32> to vector<15x128xf32>
    %377 = tpu.concatenate %376, %1 in 0 : vector<15x128xf32>, vector<1x128xf32> -> vector<16x128xf32>
    %c6_i32_235 = arith.constant 6 : i32
    %378 = tpu.dynamic_rotate %375 by %c6_i32_235 dim 1 : vector<16x128xf32>, i32 -> vector<16x128xf32>
    %379 = arith.addf %373, %378 : vector<16x128xf32>
    %c12_i32_236 = arith.constant 12 : i32
    %380 = tpu.dynamic_rotate %377 by %c12_i32_236 dim 1 : vector<16x128xf32>, i32 -> vector<16x128xf32>
    %381 = arith.addf %379, %380 : vector<16x128xf32>
    %382 = arith.truncf %381 : vector<16x128xf32> to vector<16x128xbf16>
    %c272 = arith.constant 272 : index
    %c0_237 = arith.constant 0 : index
    %383 = vector.load %arg9[%c272, %c0_237] : memref<320x128xbf16, #tpu.memory_space<vmem>>, vector<16x128xbf16>
    tpu.vector_store %arg9[%c272, %c0_237], %382 {strides = array<i32>} : memref<320x128xbf16, #tpu.memory_space<vmem>>, vector<16x128xbf16>,
    %c0_238 = arith.constant 0 : index
    %c0_239 = arith.constant 0 : index
    %384 = vector.load %arg5[%c0_238, %c0_239] : memref<1x128xf32, #tpu.memory_space<vmem>>, vector<1x128xf32>
    %c16_240 = arith.constant 16 : index
    %c0_241 = arith.constant 0 : index
    %385 = vector.load %arg9[%c16_240, %c0_241] : memref<320x128xbf16, #tpu.memory_space<vmem>>, vector<128x128xbf16>
    %c0_242 = arith.constant 0 : index
    %c0_243 = arith.constant 0 : index
    %c0_244 = arith.constant 0 : index
    %386 = vector.load %arg4[%c0_242, %c0_243, %c0_244] : memref<3x128x128xbf16, #tpu.memory_space<vmem>>, vector<1x128x128xbf16>
    %387 = vector.shape_cast %386 : vector<1x128x128xbf16> to vector<128x128xbf16>
    %cst_245 = arith.constant dense<0.000000e+00> : vector<128x128xf32>
    %388 = tpu.matmul %385, %387, %cst_245 {dimension_numbers = #tpu.dot_dimension_numbers<[1], [0], [0], [1], [0, 0, 1, 1], [], []>} : vector<128x128xbf16>, vector<128x128xbf16>, vector<128x128xf32> -> vector<128x128xf32>
    %c32_246 = arith.constant 32 : index
    %c0_247 = arith.constant 0 : index
    %389 = vector.load %arg9[%c32_246, %c0_247] : memref<320x128xbf16, #tpu.memory_space<vmem>>, vector<128x128xbf16>
    %c1 = arith.constant 1 : index
    %c0_248 = arith.constant 0 : index
    %c0_249 = arith.constant 0 : index
    %390 = vector.load %arg4[%c1, %c0_248, %c0_249] : memref<3x128x128xbf16, #tpu.memory_space<vmem>>, vector<1x128x128xbf16>
    %391 = vector.shape_cast %390 : vector<1x128x128xbf16> to vector<128x128xbf16>
    %cst_250 = arith.constant dense<0.000000e+00> : vector<128x128xf32>
    %392 = tpu.matmul %389, %391, %cst_250 {dimension_numbers = #tpu.dot_dimension_numbers<[1], [0], [0], [1], [0, 0, 1, 1], [], []>} : vector<128x128xbf16>, vector<128x128xbf16>, vector<128x128xf32> -> vector<128x128xf32>
    %393 = arith.addf %388, %392 : vector<128x128xf32>
    %c48_251 = arith.constant 48 : index
    %c0_252 = arith.constant 0 : index
    %394 = vector.load %arg9[%c48_251, %c0_252] : memref<320x128xbf16, #tpu.memory_space<vmem>>, vector<128x128xbf16>
    %c2 = arith.constant 2 : index
    %c0_253 = arith.constant 0 : index
    %c0_254 = arith.constant 0 : index
    %395 = vector.load %arg4[%c2, %c0_253, %c0_254] : memref<3x128x128xbf16, #tpu.memory_space<vmem>>, vector<1x128x128xbf16>
    %396 = vector.shape_cast %395 : vector<1x128x128xbf16> to vector<128x128xbf16>
    %cst_255 = arith.constant dense<0.000000e+00> : vector<128x128xf32>
    %397 = tpu.matmul %394, %396, %cst_255 {dimension_numbers = #tpu.dot_dimension_numbers<[1], [0], [0], [1], [0, 0, 1, 1], [], []>} : vector<128x128xbf16>, vector<128x128xbf16>, vector<128x128xf32> -> vector<128x128xf32>
    %398 = arith.addf %393, %397 : vector<128x128xf32>
    %399 = vector.broadcast %384 : vector<1x128xf32> to vector<128x128xf32>
    %400 = arith.addf %398, %399 : vector<128x128xf32>
    %cst_256 = arith.constant 0.000000e+00 : f32
    %401 = vector.broadcast %cst_256 : f32 to vector<128x128xf32>
    %402 = arith.maximumf %400, %401 : vector<128x128xf32>
    %403 = vector.extract_strided_slice %402 {offsets = [0, 0], sizes = [127, 128], strides = [1, 1]} : vector<128x128xf32> to vector<127x128xf32>
    %404 = tpu.concatenate %1, %403 in 0 : vector<1x128xf32>, vector<127x128xf32> -> vector<128x128xf32>
    %405 = vector.extract_strided_slice %402 {offsets = [1, 0], sizes = [127, 128], strides = [1, 1]} : vector<128x128xf32> to vector<127x128xf32>
    %406 = tpu.concatenate %405, %1 in 0 : vector<127x128xf32>, vector<1x128xf32> -> vector<128x128xf32>
    %cst_257 = arith.constant 0.000000e+00 : f32
    %407 = vector.shape_cast %20 : vector<128x1xi1> to vector<128x1xi1>
    %408 = vector.broadcast %407 : vector<128x1xi1> to vector<128x128xi1>
    %409 = vector.broadcast %cst_257 : f32 to vector<128x128xf32>
    %410 = arith.select %408, %404, %409 : vector<128x128xi1>, vector<128x128xf32>
    %cst_258 = arith.constant 0.000000e+00 : f32
    %411 = vector.shape_cast %22 : vector<128x1xi1> to vector<128x1xi1>
    %412 = vector.broadcast %411 : vector<128x1xi1> to vector<128x128xi1>
    %413 = vector.broadcast %cst_258 : f32 to vector<128x128xf32>
    %414 = arith.select %412, %406, %413 : vector<128x128xi1>, vector<128x128xf32>
    %c8_i32 = arith.constant 8 : i32
    %415 = tpu.dynamic_rotate %410 by %c8_i32 dim 1 : vector<128x128xf32>, i32 -> vector<128x128xf32>
    %416 = arith.addf %402, %415 : vector<128x128xf32>
    %c16_i32_259 = arith.constant 16 : i32
    %417 = tpu.dynamic_rotate %414 by %c16_i32_259 dim 1 : vector<128x128xf32>, i32 -> vector<128x128xf32>
    %418 = arith.addf %416, %417 : vector<128x128xf32>
    %419 = arith.truncf %418 : vector<128x128xf32> to vector<128x128xbf16>
    %c32_260 = arith.constant 32 : index
    %c0_261 = arith.constant 0 : index
    %420 = vector.load %arg10[%c32_260, %c0_261] : memref<320x128xbf16, #tpu.memory_space<vmem>>, vector<128x128xbf16>
    tpu.vector_store %arg10[%c32_260, %c0_261], %419 {strides = array<i32>} : memref<320x128xbf16, #tpu.memory_space<vmem>>, vector<128x128xbf16>,
    %c144_262 = arith.constant 144 : index
    %c0_263 = arith.constant 0 : index
    %421 = vector.load %arg9[%c144_262, %c0_263] : memref<320x128xbf16, #tpu.memory_space<vmem>>, vector<128x128xbf16>
    %c0_264 = arith.constant 0 : index
    %c0_265 = arith.constant 0 : index
    %c0_266 = arith.constant 0 : index
    %422 = vector.load %arg4[%c0_264, %c0_265, %c0_266] : memref<3x128x128xbf16, #tpu.memory_space<vmem>>, vector<1x128x128xbf16>
    %423 = vector.shape_cast %422 : vector<1x128x128xbf16> to vector<128x128xbf16>
    %cst_267 = arith.constant dense<0.000000e+00> : vector<128x128xf32>
    %424 = tpu.matmul %421, %423, %cst_267 {dimension_numbers = #tpu.dot_dimension_numbers<[1], [0], [0], [1], [0, 0, 1, 1], [], []>} : vector<128x128xbf16>, vector<128x128xbf16>, vector<128x128xf32> -> vector<128x128xf32>
    %c160_268 = arith.constant 160 : index
    %c0_269 = arith.constant 0 : index
    %425 = vector.load %arg9[%c160_268, %c0_269] : memref<320x128xbf16, #tpu.memory_space<vmem>>, vector<128x128xbf16>
    %c1_270 = arith.constant 1 : index
    %c0_271 = arith.constant 0 : index
    %c0_272 = arith.constant 0 : index
    %426 = vector.load %arg4[%c1_270, %c0_271, %c0_272] : memref<3x128x128xbf16, #tpu.memory_space<vmem>>, vector<1x128x128xbf16>
    %427 = vector.shape_cast %426 : vector<1x128x128xbf16> to vector<128x128xbf16>
    %cst_273 = arith.constant dense<0.000000e+00> : vector<128x128xf32>
    %428 = tpu.matmul %425, %427, %cst_273 {dimension_numbers = #tpu.dot_dimension_numbers<[1], [0], [0], [1], [0, 0, 1, 1], [], []>} : vector<128x128xbf16>, vector<128x128xbf16>, vector<128x128xf32> -> vector<128x128xf32>
    %429 = arith.addf %424, %428 : vector<128x128xf32>
    %c176_274 = arith.constant 176 : index
    %c0_275 = arith.constant 0 : index
    %430 = vector.load %arg9[%c176_274, %c0_275] : memref<320x128xbf16, #tpu.memory_space<vmem>>, vector<128x128xbf16>
    %c2_276 = arith.constant 2 : index
    %c0_277 = arith.constant 0 : index
    %c0_278 = arith.constant 0 : index
    %431 = vector.load %arg4[%c2_276, %c0_277, %c0_278] : memref<3x128x128xbf16, #tpu.memory_space<vmem>>, vector<1x128x128xbf16>
    %432 = vector.shape_cast %431 : vector<1x128x128xbf16> to vector<128x128xbf16>
    %cst_279 = arith.constant dense<0.000000e+00> : vector<128x128xf32>
    %433 = tpu.matmul %430, %432, %cst_279 {dimension_numbers = #tpu.dot_dimension_numbers<[1], [0], [0], [1], [0, 0, 1, 1], [], []>} : vector<128x128xbf16>, vector<128x128xbf16>, vector<128x128xf32> -> vector<128x128xf32>
    %434 = arith.addf %429, %433 : vector<128x128xf32>
    %435 = vector.broadcast %384 : vector<1x128xf32> to vector<128x128xf32>
    %436 = arith.addf %434, %435 : vector<128x128xf32>
    %cst_280 = arith.constant 0.000000e+00 : f32
    %437 = vector.broadcast %cst_280 : f32 to vector<128x128xf32>
    %438 = arith.maximumf %436, %437 : vector<128x128xf32>
    %439 = vector.extract_strided_slice %438 {offsets = [0, 0], sizes = [127, 128], strides = [1, 1]} : vector<128x128xf32> to vector<127x128xf32>
    %440 = tpu.concatenate %1, %439 in 0 : vector<1x128xf32>, vector<127x128xf32> -> vector<128x128xf32>
    %441 = vector.extract_strided_slice %438 {offsets = [1, 0], sizes = [127, 128], strides = [1, 1]} : vector<128x128xf32> to vector<127x128xf32>
    %442 = tpu.concatenate %441, %1 in 0 : vector<127x128xf32>, vector<1x128xf32> -> vector<128x128xf32>
    %cst_281 = arith.constant 0.000000e+00 : f32
    %443 = vector.shape_cast %20 : vector<128x1xi1> to vector<128x1xi1>
    %444 = vector.broadcast %443 : vector<128x1xi1> to vector<128x128xi1>
    %445 = vector.broadcast %cst_281 : f32 to vector<128x128xf32>
    %446 = arith.select %444, %440, %445 : vector<128x128xi1>, vector<128x128xf32>
    %cst_282 = arith.constant 0.000000e+00 : f32
    %447 = vector.shape_cast %22 : vector<128x1xi1> to vector<128x1xi1>
    %448 = vector.broadcast %447 : vector<128x1xi1> to vector<128x128xi1>
    %449 = vector.broadcast %cst_282 : f32 to vector<128x128xf32>
    %450 = arith.select %448, %442, %449 : vector<128x128xi1>, vector<128x128xf32>
    %c8_i32_283 = arith.constant 8 : i32
    %451 = tpu.dynamic_rotate %446 by %c8_i32_283 dim 1 : vector<128x128xf32>, i32 -> vector<128x128xf32>
    %452 = arith.addf %438, %451 : vector<128x128xf32>
    %c16_i32_284 = arith.constant 16 : i32
    %453 = tpu.dynamic_rotate %450 by %c16_i32_284 dim 1 : vector<128x128xf32>, i32 -> vector<128x128xf32>
    %454 = arith.addf %452, %453 : vector<128x128xf32>
    %455 = arith.truncf %454 : vector<128x128xf32> to vector<128x128xbf16>
    %c160_285 = arith.constant 160 : index
    %c0_286 = arith.constant 0 : index
    %456 = vector.load %arg10[%c160_285, %c0_286] : memref<320x128xbf16, #tpu.memory_space<vmem>>, vector<128x128xbf16>
    tpu.vector_store %arg10[%c160_285, %c0_286], %455 {strides = array<i32>} : memref<320x128xbf16, #tpu.memory_space<vmem>>, vector<128x128xbf16>,
    %c0_287 = arith.constant 0 : index
    %c0_288 = arith.constant 0 : index
    %457 = vector.load %arg7[%c0_287, %c0_288] : memref<1x128xf32, #tpu.memory_space<vmem>>, vector<1x128xf32>
    %c16_289 = arith.constant 16 : index
    %c0_290 = arith.constant 0 : index
    %458 = vector.load %arg10[%c16_289, %c0_290] : memref<320x128xbf16, #tpu.memory_space<vmem>>, vector<128x128xbf16>
    %c0_291 = arith.constant 0 : index
    %c0_292 = arith.constant 0 : index
    %c0_293 = arith.constant 0 : index
    %459 = vector.load %arg6[%c0_291, %c0_292, %c0_293] : memref<3x128x128xbf16, #tpu.memory_space<vmem>>, vector<1x128x128xbf16>
    %460 = vector.shape_cast %459 : vector<1x128x128xbf16> to vector<128x128xbf16>
    %cst_294 = arith.constant dense<0.000000e+00> : vector<128x128xf32>
    %461 = tpu.matmul %458, %460, %cst_294 {dimension_numbers = #tpu.dot_dimension_numbers<[1], [0], [0], [1], [0, 0, 1, 1], [], []>} : vector<128x128xbf16>, vector<128x128xbf16>, vector<128x128xf32> -> vector<128x128xf32>
    %c32_295 = arith.constant 32 : index
    %c0_296 = arith.constant 0 : index
    %462 = vector.load %arg10[%c32_295, %c0_296] : memref<320x128xbf16, #tpu.memory_space<vmem>>, vector<128x128xbf16>
    %c1_297 = arith.constant 1 : index
    %c0_298 = arith.constant 0 : index
    %c0_299 = arith.constant 0 : index
    %463 = vector.load %arg6[%c1_297, %c0_298, %c0_299] : memref<3x128x128xbf16, #tpu.memory_space<vmem>>, vector<1x128x128xbf16>
    %464 = vector.shape_cast %463 : vector<1x128x128xbf16> to vector<128x128xbf16>
    %cst_300 = arith.constant dense<0.000000e+00> : vector<128x128xf32>
    %465 = tpu.matmul %462, %464, %cst_300 {dimension_numbers = #tpu.dot_dimension_numbers<[1], [0], [0], [1], [0, 0, 1, 1], [], []>} : vector<128x128xbf16>, vector<128x128xbf16>, vector<128x128xf32> -> vector<128x128xf32>
    %466 = arith.addf %461, %465 : vector<128x128xf32>
    %c48_301 = arith.constant 48 : index
    %c0_302 = arith.constant 0 : index
    %467 = vector.load %arg10[%c48_301, %c0_302] : memref<320x128xbf16, #tpu.memory_space<vmem>>, vector<128x128xbf16>
    %c2_303 = arith.constant 2 : index
    %c0_304 = arith.constant 0 : index
    %c0_305 = arith.constant 0 : index
    %468 = vector.load %arg6[%c2_303, %c0_304, %c0_305] : memref<3x128x128xbf16, #tpu.memory_space<vmem>>, vector<1x128x128xbf16>
    %469 = vector.shape_cast %468 : vector<1x128x128xbf16> to vector<128x128xbf16>
    %cst_306 = arith.constant dense<0.000000e+00> : vector<128x128xf32>
    %470 = tpu.matmul %467, %469, %cst_306 {dimension_numbers = #tpu.dot_dimension_numbers<[1], [0], [0], [1], [0, 0, 1, 1], [], []>} : vector<128x128xbf16>, vector<128x128xbf16>, vector<128x128xf32> -> vector<128x128xf32>
    %471 = arith.addf %466, %470 : vector<128x128xf32>
    %472 = vector.broadcast %457 : vector<1x128xf32> to vector<128x128xf32>
    %473 = arith.addf %471, %472 : vector<128x128xf32>
    %cst_307 = arith.constant 0.000000e+00 : f32
    %474 = vector.broadcast %cst_307 : f32 to vector<128x128xf32>
    %475 = arith.maximumf %473, %474 : vector<128x128xf32>
    %476 = arith.truncf %475 : vector<128x128xf32> to vector<128x128xbf16>
    %c0_308 = arith.constant 0 : index
    %c0_309 = arith.constant 0 : index
    %c0_310 = arith.constant 0 : index
    %477 = vector.load %arg8[%c0_308, %c0_309, %c0_310] : memref<1x256x128xbf16, #tpu.memory_space<vmem>>, vector<1x128x128xbf16>
    %478 = vector.shape_cast %477 : vector<1x128x128xbf16> to vector<128x128xbf16>
    %479 = vector.shape_cast %476 : vector<128x128xbf16> to vector<1x128x128xbf16>
    tpu.vector_store %arg8[%c0_308, %c0_309, %c0_310], %479 {strides = array<i32>} : memref<1x256x128xbf16, #tpu.memory_space<vmem>>, vector<1x128x128xbf16>,
    %c144_311 = arith.constant 144 : index
    %c0_312 = arith.constant 0 : index
    %480 = vector.load %arg10[%c144_311, %c0_312] : memref<320x128xbf16, #tpu.memory_space<vmem>>, vector<128x128xbf16>
    %c0_313 = arith.constant 0 : index
    %c0_314 = arith.constant 0 : index
    %c0_315 = arith.constant 0 : index
    %481 = vector.load %arg6[%c0_313, %c0_314, %c0_315] : memref<3x128x128xbf16, #tpu.memory_space<vmem>>, vector<1x128x128xbf16>
    %482 = vector.shape_cast %481 : vector<1x128x128xbf16> to vector<128x128xbf16>
    %cst_316 = arith.constant dense<0.000000e+00> : vector<128x128xf32>
    %483 = tpu.matmul %480, %482, %cst_316 {dimension_numbers = #tpu.dot_dimension_numbers<[1], [0], [0], [1], [0, 0, 1, 1], [], []>} : vector<128x128xbf16>, vector<128x128xbf16>, vector<128x128xf32> -> vector<128x128xf32>
    %c160_317 = arith.constant 160 : index
    %c0_318 = arith.constant 0 : index
    %484 = vector.load %arg10[%c160_317, %c0_318] : memref<320x128xbf16, #tpu.memory_space<vmem>>, vector<128x128xbf16>
    %c1_319 = arith.constant 1 : index
    %c0_320 = arith.constant 0 : index
    %c0_321 = arith.constant 0 : index
    %485 = vector.load %arg6[%c1_319, %c0_320, %c0_321] : memref<3x128x128xbf16, #tpu.memory_space<vmem>>, vector<1x128x128xbf16>
    %486 = vector.shape_cast %485 : vector<1x128x128xbf16> to vector<128x128xbf16>
    %cst_322 = arith.constant dense<0.000000e+00> : vector<128x128xf32>
    %487 = tpu.matmul %484, %486, %cst_322 {dimension_numbers = #tpu.dot_dimension_numbers<[1], [0], [0], [1], [0, 0, 1, 1], [], []>} : vector<128x128xbf16>, vector<128x128xbf16>, vector<128x128xf32> -> vector<128x128xf32>
    %488 = arith.addf %483, %487 : vector<128x128xf32>
    %c176_323 = arith.constant 176 : index
    %c0_324 = arith.constant 0 : index
    %489 = vector.load %arg10[%c176_323, %c0_324] : memref<320x128xbf16, #tpu.memory_space<vmem>>, vector<128x128xbf16>
    %c2_325 = arith.constant 2 : index
    %c0_326 = arith.constant 0 : index
    %c0_327 = arith.constant 0 : index
    %490 = vector.load %arg6[%c2_325, %c0_326, %c0_327] : memref<3x128x128xbf16, #tpu.memory_space<vmem>>, vector<1x128x128xbf16>
    %491 = vector.shape_cast %490 : vector<1x128x128xbf16> to vector<128x128xbf16>
    %cst_328 = arith.constant dense<0.000000e+00> : vector<128x128xf32>
    %492 = tpu.matmul %489, %491, %cst_328 {dimension_numbers = #tpu.dot_dimension_numbers<[1], [0], [0], [1], [0, 0, 1, 1], [], []>} : vector<128x128xbf16>, vector<128x128xbf16>, vector<128x128xf32> -> vector<128x128xf32>
    %493 = arith.addf %488, %492 : vector<128x128xf32>
    %494 = vector.broadcast %457 : vector<1x128xf32> to vector<128x128xf32>
    %495 = arith.addf %493, %494 : vector<128x128xf32>
    %cst_329 = arith.constant 0.000000e+00 : f32
    %496 = vector.broadcast %cst_329 : f32 to vector<128x128xf32>
    %497 = arith.maximumf %495, %496 : vector<128x128xf32>
    %498 = arith.truncf %497 : vector<128x128xf32> to vector<128x128xbf16>
    %c0_330 = arith.constant 0 : index
    %c128_331 = arith.constant 128 : index
    %c0_332 = arith.constant 0 : index
    %499 = vector.load %arg8[%c0_330, %c128_331, %c0_332] : memref<1x256x128xbf16, #tpu.memory_space<vmem>>, vector<1x128x128xbf16>
    %500 = vector.shape_cast %499 : vector<1x128x128xbf16> to vector<128x128xbf16>
    %501 = vector.shape_cast %498 : vector<128x128xbf16> to vector<1x128x128xbf16>
    tpu.vector_store %arg8[%c0_330, %c128_331, %c0_332], %501 {strides = array<i32>} : memref<1x256x128xbf16, #tpu.memory_space<vmem>>, vector<1x128x128xbf16>,
    return
  }
  func.func @transform_0(%arg0: i32) -> (i32, i32, i32) {
    %c0_i32 = arith.constant 0 : i32
    %c0_i32_0 = arith.constant 0 : i32
    %c0_i32_1 = arith.constant 0 : i32
    return %arg0, %c0_i32, %c0_i32_0 : i32, i32, i32
  }
  func.func @transform_1(%arg0: i32) -> (i32, i32, i32) {
    %c0_i32 = arith.constant 0 : i32
    %c0_i32_0 = arith.constant 0 : i32
    %c0_i32_1 = arith.constant 0 : i32
    return %arg0, %c0_i32, %c0_i32_0 : i32, i32, i32
  }
  func.func @transform_2(%arg0: i32) -> (i32, i32) {
    %c0_i32 = arith.constant 0 : i32
    %c0_i32_0 = arith.constant 0 : i32
    %c0_i32_1 = arith.constant 0 : i32
    return %c0_i32, %c0_i32_0 : i32, i32
  }
  func.func @transform_3(%arg0: i32) -> (i32, i32, i32) {
    %c0_i32 = arith.constant 0 : i32
    %c0_i32_0 = arith.constant 0 : i32
    %c0_i32_1 = arith.constant 0 : i32
    %c0_i32_2 = arith.constant 0 : i32
    return %c0_i32, %c0_i32_0, %c0_i32_1 : i32, i32, i32
  }
  func.func @transform_4(%arg0: i32) -> (i32, i32) {
    %c0_i32 = arith.constant 0 : i32
    %c0_i32_0 = arith.constant 0 : i32
    %c0_i32_1 = arith.constant 0 : i32
    return %c0_i32, %c0_i32_0 : i32, i32
  }
  func.func @transform_5(%arg0: i32) -> (i32, i32, i32) {
    %c0_i32 = arith.constant 0 : i32
    %c0_i32_0 = arith.constant 0 : i32
    %c0_i32_1 = arith.constant 0 : i32
    %c0_i32_2 = arith.constant 0 : i32
    return %c0_i32, %c0_i32_0, %c0_i32_1 : i32, i32, i32
  }
  func.func @transform_6(%arg0: i32) -> (i32, i32) {
    %c0_i32 = arith.constant 0 : i32
    %c0_i32_0 = arith.constant 0 : i32
    %c0_i32_1 = arith.constant 0 : i32
    return %c0_i32, %c0_i32_0 : i32, i32
  }
  func.func @transform_7(%arg0: i32) -> (i32, i32, i32) {
    %c0_i32 = arith.constant 0 : i32
    %c0_i32_0 = arith.constant 0 : i32
    %c0_i32_1 = arith.constant 0 : i32
    return %arg0, %c0_i32, %c0_i32_0 : i32, i32, i32
  }
}

</mosaic_0001>

<bundles_post_ra>
// kernel: tpu_custom_call.1
= control target key start
LH: loop header
LB: loop body
LE: loop exit
PB: predicated region body
PF: predicated region fallthrough
CT: control target
= control target key end

     0   :  { %s8944_s0 = inlined_call_operand.hbm [shape: bf16[2,256,128], index: 0, kind: input, shape index: {}]   ;;  %s8945_s1 = inlined_call_operand.hbm [shape: bf16[2,64,128], index: 1, kind: input, shape index: {}]   ;;  %s8946_s2 = inlined_call_operand.vmem [shape: bf16[16,8], index: 2, kind: input, shape index: {}]   ;;  %s8947_s3 = inlined_call_operand.hbm [shape: bf16[3,128,128], index: 3, kind: input, shape index: {}]   ;;  %s8948_s4 = inlined_call_operand.vmem [shape: f32[1,128], index: 4, kind: input, shape index: {}]   ;;  %s8949_s5 = inlined_call_operand.hbm [shape: bf16[3,128,128], index: 5, kind: input, shape index: {}]   ;;  %s8950_s6 = inlined_call_operand.vmem [shape: f32[1,128], index: 6, kind: input, shape index: {}]   ;;  %s8951_s7 = inlined_call_operand.hbm [shape: bf16[2,256,128], index: 7, kind: output, shape index: {}]  }
   0x1   :  { %8976 = sst [smem:[#allocation29_spill]] %s8944_s0 }
   0x2   :  { %8977 = sst [smem:[#allocation30_spill]] %s8947_s3 }
   0x3   :  { %8978 = sst [smem:[#allocation31_spill]] %s8949_s5 }
   0x4   :  { %12 = vsyncpa [#allocation6], 0 }
   0x5   :  { %14 = vsyncpa [#allocation6 + $0x1], 0 }
   0x6   :  { %15 = vsyncpa [#allocation9], 0 }
   0x7   :  { %17 = vsyncpa [#allocation9 + $0x1], 0 }
   0x8   :  { %18 = vsyncpa [#allocation12], 0 }
   0x9   :  { %19 = vsyncpa [#allocation7], 0 }
   0xa   :  { %21 = vsyncpa [#allocation7 + $0x1], 0  ;;  %s7397_s24 = smov 0   ;;  %s7399_s25 = smov 0  }
   0xb   :  { %s7401_s26 = smov 0   ;;  %s7403_s27 = smov 0  }
   0xc LB: > { %8979 = sst [smem:[#allocation19_spill]] %s7335_s26  ;;  %s7418_s28 = sadd.s32 4294967295, %s7339_s27   ;;  %s7339_s27 = sphi %s7403_s27, %s9094_s27   ;;  %s7335_s26 = sphi %s7401_s26, %s9091_s26   ;;  %s7331_s25 = sphi %s7399_s25, %s9093_s25   ;;  %s7327_s24 = sphi %s7397_s24, %s9092_s24  }
   0xd   : > { %s5509_s29 = sadd.s32 4294967294, %s7339_s27   ;;  %p47_p0 = scmp.ne.s32.totalorder %s7331_s25, %s7327_s24 }
   0xe   : > { %p8956_p1 = scmp.eq.s32.totalorder %s7418_s28, 0  ;;  %p202_p2 = scmp.eq.s32.totalorder %s7418_s28, 1 }
   0xf   : > { %p208_p3 = scmp.eq.s32.totalorder %s5509_s29, 1  ;;  %p5510_p5 = scmp.ge.s32.totalorder %s7339_s27, 1 }
  0x10   : > { %p7427_p4 = por %p8956_p1, %p47_p0  ;;  %p215_p7 = scmp.lt.s32.totalorder %s7339_s27, 3 }
  0x11   : > { %p7432_p6 = por %p208_p3, %p47_p0  ;;  %s7341_s10 = smov [#allocation10]  }
  0x12   : > { %s8980_s30 = scalar_select %p7427_p4, 1, 0 }
  0x13   : > { %s8981_s8 = scalar_select %p7432_p6, 1, 0 }
  0x14   : > { %p7437_p8 = pnand %p5510_p5, %p215_p7  ;;  %s230_s11 = sshll.u32 %s7341_s10, 4  ;;  %s231_s11 = int_to_ptr.vmem [resolvable:$true] %s230_s11 }
  0x15   : > { %s7342_s13 = smov [#allocation11]   ;;  %s7166_s15 = scalar_lea.vmem %s231_s11, 3072 }
  0x16   : > { %p6921_p9 = pneg %p7437_p8  ;;  %s246_s14 = sshll.u32 %s7342_s13, 4  ;;  %s247_s14 = int_to_ptr.vmem [resolvable:$true] %s246_s14 }
  0x17   : > { %p7167_p13 = scmp.ne.s32.totalorder %s231_s11, %s7166_s15  ;;  %p7174_p5 = scmp.lt.s32.totalorder %s231_s11, %s231_s11 }
  0x18   : > { %p7446_p11 = pnand %p6921_p9, %p8956_p1  ;;  %p7175_p7 = scmp.lt.s32.totalorder %s7166_s15, %s7166_s15 }
  0x1a   : > { %p7157_p12 = pneg %p7446_p11  ;;  %p7176_p10 = por %p7175_p7, %p7174_p5 }
  0x1c   : > { %p7169_p0 = pnand %p7167_p13, %p7157_p12 }
  0x1e   : > { %p7170_p3 = pneg %p7169_p0 }
  0x20   : > { %p7177_p9 = pnand %p7176_p10, %p7170_p3 }
  0x22   : > { %7180 = shalt.err (!%p7177_p9)
}
  0x23   : > { %s8952_s16 = smov 64   ;;  %s8954_s17 = smov 4  }
  0x24   : > { %s8984_s3 = sld [smem:[#allocation30_spill]]  ;;  %s7192_s20 = scalar_lea.vmem %s247_s14, 3072 }
  0x25   : > { %p7193_p13 = scmp.ne.s32.totalorder %s247_s14, %s7192_s20  ;;  %p7200_p10 = scmp.lt.s32.totalorder %s247_s14, %s247_s14 }
  0x26   : > { %p7201_p3 = scmp.lt.s32.totalorder %s7192_s20, %s7192_s20 }
  0x27   : > { %p7195_p0 = pnand %p7193_p13, %p7157_p12 }
  0x28   : > { %p7202_p7 = por %p7201_p3, %p7200_p10 }
  0x29   : > { %p7196_p5 = pneg %p7195_p0 }
  0x2a   : > { %6924 = dma.hbm_to_vmem [thread:$0]  (!%p7446_p11), %s8984_s3, 3072, %s231_s11, [#allocation9], %s8952_s16, %s8952_s16, %s8954_s17  }
  0x2b   : > { %p7203_p9 = pnand %p7202_p7, %p7196_p5 }
  0x2d   : > { %7206 = shalt.err (!%p7203_p9)
}
  0x2e   : > { %s8985_s5 = sld [smem:[#allocation31_spill]]  ;;  %s7475_s23 = sadd.s32 1, %s7339_s27  }
  0x2f   : > { %s34_s29 = sadd.s32 1, %s7335_s26  ;;  %s31_s10 = ssub.s32 %s7339_s27, %s7475_s23 }
  0x30   : > { %p41_p12 = scmp.ne.s32.totalorder %s7335_s26, %s7331_s25  ;;  %p32_p13 = scmp.eq.s32.totalorder %s31_s10, 0 }
  0x31   : > { %p42_p0 = scmp.eq.s32.totalorder %s7339_s27, 0  ;;  %p6941_p10 = scmp.lt.s32.totalorder %s7339_s27, 2 }
  0x32   : > { %p7485_p5 = por %p202_p2, %p41_p12  ;;  %s7494_s13 = sand.u32 1, %s7335_s26  }
  0x33   : > { %s7491_s12 = scalar_select %p32_p13, %s7335_s26, %s34_s29  }
  0x34   : > { %6927 = dma.hbm_to_vmem [thread:$0]  (!%p7446_p11), %s8985_s5, 3072, %s247_s14, [#allocation12], %s8952_s16, %s8952_s16, %s8954_s17  }
  0x35   : > { %s8986_s11 = scalar_select %p7485_p5, 1, 0 }
  0x36   : > { %8987 = sst [smem:[#allocation20_spill]] %s7491_s12  ;;  %p43_p3 = por %p42_p0, %p41_p12 }
  0x37   : > { %s5514_s14 = sshll.u32 %s7494_s13, 7  ;;  %s5802_s15 = sshll.u32 %s7339_s27, 11 }
  0x38   : > { %s8988_s0 = sld [smem:[#allocation29_spill]]  ;;  %s267_s21 = scalar_lea.vmem [#allocation5], %s5514_s14 }
  0x39   : > { %s274_s22 = sshll.u32 %s267_s21, 4  ;;  %p7505_p2 = pnand %p6941_p10, %p43_p3  ;;  %s7503_s22 = int_to_ptr.vmem [resolvable:$true] %s274_s22 }
  0x3a   : > { %s264_s17 = scalar_lea.sflag [#allocation6], %s7494_s13 }
  0x3b   : > { %p7209_p7 = pneg %p7505_p2 }
  0x3e   : > { %s7501_s20 = scalar_lea.hbm %s8988_s0, %s5802_s15  ;;  %s7212_s18 = scalar_lea.hbm %s8988_s0, 4096 }
  0x3f   : > { %s7207_s3 = scalar_lea.hbm %s7501_s20, 2048  ;;  %p7213_p13 = scmp.lt.s32.totalorder %s7501_s20, %s8988_s0 }
  0x40   : > { %p7208_p11 = scmp.ne.s32.totalorder %s7501_s20, %s7207_s3  ;;  %p7214_p0 = scmp.lt.s32.totalorder %s7212_s18, %s7207_s3 }
  0x42   : > { %p7210_p9 = pnand %p7209_p7, %p7208_p11  ;;  %p7215_p10 = por %p7214_p0, %p7213_p13 }
  0x44   : > { %p7211_p12 = pneg %p7210_p9 }
  0x46   : > { %p7216_p3 = pnand %p7215_p10, %p7211_p12 }
  0x48   : > { %7219 = shalt.err (!%p7216_p3)
}
  0x49   : > { %s7220_s10 = scalar_lea.vmem %s7503_s22, 2048  ;;  %s7345_s14 = smov [#allocation5]  }
  0x4a   : > { %p7221_p1 = scmp.ne.s32.totalorder %s7503_s22, %s7220_s10  ;;  %s7225_s15 = sshll.u32 %s7345_s14, 4  ;;  %s7226_s15 = int_to_ptr.vmem [resolvable:$false] %s7225_s15 }
  0x4b   : > { %s7227_s16 = scalar_lea.vmem %s7226_s15, 4096  ;;  %p7228_p6 = scmp.lt.s32.totalorder %s7503_s22, %s7226_s15 }
  0x4c   : > { %p7223_p11 = pnand %p7221_p1, %p7209_p7  ;;  %p7229_p5 = scmp.lt.s32.totalorder %s7227_s16, %s7220_s10 }
  0x4e   : > { %p7224_p9 = pneg %p7223_p11  ;;  %p7230_p4 = por %p7229_p5, %p7228_p6 }
  0x50   : > { %p7231_p13 = pnand %p7230_p4, %p7224_p9 }
  0x52   : > { %7234 = shalt.err (!%p7231_p13)
}
  0x53   : > { %s8990_s3 = smov 4   ;;  %s8991_s18 = smov 64  }
  0x54   : > { %6931 = dma.hbm_to_vmem [thread:$0]  (!%p7505_p2), %s7501_s20, 2048, %s7503_s22, %s264_s17, %s8991_s18, %s8991_s18, %s8990_s3  }
  0x55   : > { %s5803_s19 = sshll.u32 %s7339_s27, 9  ;;  %s8992_s14 = sshll.u32 %s7494_s13, 5 }
  0x56   : > { %s7545_s10 = scalar_lea.hbm %s8945_s1, %s5803_s19  ;;  %s288_s15 = scalar_lea.vmem [#allocation8], %s8992_s14 }
  0x57   : > { %s295_s0 = sshll.u32 %s288_s15, 4  ;;  %s8993_s5 = sand.u32 1, %s7339_s27   ;;  %s7549_s0 = int_to_ptr.vmem [resolvable:$true] %s295_s0 }
  0x58   : > { %s285_s12 = scalar_lea.sflag [#allocation9], %s8993_s5  ;;  %s7235_s26 = scalar_lea.hbm %s7545_s10, 512 }
  0x59   : > { %p7236_p1 = scmp.ne.s32.totalorder %s7545_s10, %s7235_s26  ;;  %s7240_s22 = scalar_lea.hbm %s8945_s1, 1024 }
  0x5a   : > { %p7241_p5 = scmp.lt.s32.totalorder %s7545_s10, %s8945_s1  ;;  %p7242_p12 = scmp.lt.s32.totalorder %s7240_s22, %s7235_s26 }
  0x5b   : > { %p7238_p4 = pnand %p7236_p1, %p7209_p7 }
  0x5c   : > { %p7243_p0 = por %p7242_p12, %p7241_p5 }
  0x5d   : > { %p7239_p6 = pneg %p7238_p4 }
  0x5f   : > { %p7244_p10 = pnand %p7243_p0, %p7239_p6 }
  0x61   : > { %7247 = shalt.err (!%p7244_p10)
}
  0x62   : > { %s7248_s5 = scalar_lea.vmem %s7549_s0, 512  ;;  %s7346_s21 = smov [#allocation8]  }
  0x63   : > { %p7249_p3 = scmp.ne.s32.totalorder %s7549_s0, %s7248_s5  ;;  %s7253_s16 = sshll.u32 %s7346_s21, 4  ;;  %s7254_s16 = int_to_ptr.vmem [resolvable:$false] %s7253_s16 }
  0x64   : > { %s7255_s14 = scalar_lea.vmem %s7254_s16, 1024  ;;  %p7256_p13 = scmp.lt.s32.totalorder %s7549_s0, %s7254_s16 }
  0x65   : > { %p7251_p11 = pnand %p7249_p3, %p7209_p7  ;;  %p7257_p1 = scmp.lt.s32.totalorder %s7255_s14, %s7248_s5 }
  0x67   : > { %p7252_p9 = pneg %p7251_p11  ;;  %p7258_p4 = por %p7257_p1, %p7256_p13 }
  0x69   : > { %p7259_p5 = pnand %p7258_p4, %p7252_p9 }
  0x6b   : > { %7262 = shalt.err (!%p7259_p5)
}
  0x6c   : > { %6934 = dma.hbm_to_vmem [thread:$0]  (!%p7505_p2), %s7545_s10, 512, %s7549_s0, %s285_s12, %s8991_s18, %s8991_s18, %s8990_s3  }
  0x6d   : > { %307 = sbr.rel (%p7437_p8) target bundleno = 1250 (0x4e2), region = 48 }
  0x72   : > { %s7581_s26 = sand.u32 1, %s7331_s25   ;;  %p8994_p7 = scmp.ne.s32.totalorder %s8980_s30, 0 }
  0x73   : > { %s5521_s15 = sshll.u32 %s7581_s26, 7  ;;  %s310_s17 = scalar_lea.sflag [#allocation6], %s7581_s26 }
  0x74   : > { %s7587_s29 = scalar_lea.vmem [#allocation5], %s5521_s15 }
  0x75   : > { %7306 = dma.done.wait (%p8994_p7), %s310_s17, 2048  }
  0x76   : > { %7308 = vsyncadd (%p8994_p7), %s310_s17, 4294965248  ;;  %s318_s0 = sand.u32 1, %s7418_s28   ;;  %s5522_s9 = sshll.u32 %s7581_s26, 5 }
  0x77   : > { %s319_s12 = scalar_lea.sflag [#allocation9], %s318_s0  ;;  %s7595_s3 = scalar_lea.vmem [#allocation8], %s5522_s9 }
  0x78   : > { %7310 = dma.done.wait (%p8994_p7), %s319_s12, 512  }
  0x79   : > { %7312 = vsyncadd (%p8994_p7), %s319_s12, 4294966784  ;;  %p8995_p8 = scmp.eq.s32.totalorder %s7418_s28, 0 }
  0x7b   : > { %7314 = dma.done.wait (%p8995_p8), [#allocation9], 3072   ;;  %p8996_p2 = pmov %p8995_p8 }
  0x7d   : > { %7316 = vsyncadd (%p8996_p2), [#allocation9], 4294964224  ;;  %p8997_p6 = pmov %p8996_p2 }
  0x7e   : > { %p8998_p12 = pmov %p8996_p2 }
  0x7f   : > { %7318 = dma.done.wait (%p8997_p6), [#allocation12], 3072  }
  0x80   : > { %7320 = vsyncadd (%p8998_p12), [#allocation12], 4294964224  ;;  %v7347_v0 = vmov 0.0   ;;  %vm7348_vm0 = vmmov 0   ;;  %vm636_vm1 = vcmask 1043456   ;;  %v6990_v5 = vld [vmem:[%s8946_s2] sm:$0xff]  }
  0x81   : > { %6475 = vmatprep.subr.bf16.mxu0 %v7347_v0  ;;  %6481 = vmatprep.subr.bf16.mxu1 %v7347_v0  ;;  %v626_v1 = vld [vmem:[%s7595_s3] sm:$0xf]  ;;  %v683_v2 = vld [vmem:[%s7595_s3 + $0x4] sm:$0xf]  ;;  %vm632_vm2 = vcmask 64512   ;;  %v6991_v18 = vld [vmem:[#allocation10 + $0x38] sm:$0xff]  }
  0x82   : > { %6477 = vmatprep.mubr.msk.bf16.mxu0 %vm7348_vm0, %v7347_v0  ;;  %6483 = vmatprep.mubr.msk.bf16.mxu1 %vm7348_vm0, %v7347_v0  ;;  %v638_v3 = vsel %vm636_vm1, %v626_v1, 0  ;;  %v685_v4 = vsel %vm636_vm1, %v683_v2, 0  ;;  %v730_v6 = vld [vmem:[%s7595_s3 + $0x8] sm:$0xf]  ;;  %v777_v7 = vld [vmem:[%s7595_s3 + $0xc] sm:$0xf] }
  0x83   : > { %6476 = vmatpush3.bf16.msra.mxu0 %v638_v3  ;;  %6482 = vmatpush3.bf16.msra.mxu1 %v685_v4  ;;  %v824_v8 = vld [vmem:[%s7595_s3 + $0x10] sm:$0xf]  ;;  %v732_v9 = vsel %vm636_vm1, %v730_v6, 0  ;;  %v779_v10 = vsel %vm636_vm1, %v777_v7, 0  ;;  %v871_v11 = vld [vmem:[%s7595_s3 + $0x14] sm:$0xf] }
  0x84   : > { %6487 = vmatprep.subr.bf16.mxu0 %v7347_v0  ;;  %6493 = vmatprep.subr.bf16.mxu1 %v7347_v0  ;;  %v826_v12 = vsel %vm636_vm1, %v824_v8, 0  ;;  %v873_v13 = vsel %vm636_vm1, %v871_v11, 0  ;;  %v918_v14 = vld [vmem:[%s7595_s3 + $0x18] sm:$0xf]  ;;  %v965_v15 = vld [vmem:[%s7595_s3 + $0x1c] sm:$0xf] }
  0x85   : > { %v920_v16 = vsel %vm636_vm1, %v918_v14, 0  ;;  %v967_v17 = vsel %vm636_vm1, %v965_v15, 0  ;;  %v6992_v19 = vld [vmem:[#allocation10 + $0x30] sm:$0xff]   ;;  %v6993_v20 = vld [vmem:[#allocation10 + $0x78] sm:$0xff]   ;;  %v6994_v21 = vld [vmem:[#allocation10 + $0x28] sm:$0xff]   ;;  %vm8969_vm3 = vcmask 1040384  }
  0x86   : > { %6478 = vmatmul.mubr.msk.bf16.vlgmr.msra.gmra.mxu0 %vm632_vm2, %v6990_v5  ;;  %6484 = vmatmul.mubr.msk.bf16.vlgmr.msra.gmra.mxu1 %vm632_vm2, %v6990_v5  ;;  %v5902_v22 = vld [vmem:[%s7587_s29] sm:$0xff]   ;;  %v6995_v23 = vld [vmem:[#allocation10 + $0x70] sm:$0xff]   ;;  %v6206_v26 = vld [vmem:[%s7587_s29 + $0x8] sm:$0xff]   ;;  %s7349_s10 = smov 6   ;;  %vm8971_vm4 = vcmask 1046528   ;;  %s7350_s20 = smov 12  }
  0x87   : > { %6488 = vmatpush3.bf16.msra.mxu0 %v732_v9  ;;  %6489 = vmatprep.mubr.msk.bf16.mxu0 %vm7348_vm0, %v7347_v0  ;;  %v6996_v24 = vld [vmem:[#allocation10 + $0x20] sm:$0xff]   ;;  %v5903_v25 = vunpack.c.l.bf16 %v5902_v22  ;;  %v6997_v29 = vld [vmem:[#allocation10 + $0x68] sm:$0xff]   ;;  %v6998_v30 = vld [vmem:[#allocation10 + $0x18] sm:$0xff]   ;;  %v5904_v34 = vunpack.c.h.bf16 %v5902_v22  ;;  %v5912_v37 = vunpack.c.l.bf16 %v6206_v26  ;;  %v5913_v48 = vunpack.c.h.bf16 %v6206_v26  ;;  %s7352_s19 = smov 8   ;;  %s7353_s5 = smov 16  }
  0x88   : > { %6494 = vmatpush3.bf16.msra.mxu1 %v779_v10  ;;  %6495 = vmatprep.mubr.msk.bf16.mxu1 %vm7348_vm0, %v7347_v0  ;;  %v7653_v41 = vld [vmem:[%s7587_s29 + $0x10] sm:$0xff]   ;;  %v6999_v57 = vld [vmem:[#allocation10 + $0x60] sm:$0xff]   ;;  %v7001_v59 = vld [vmem:[#allocation10 + $0x58] sm:$0xff]   ;;  %s8814_s14 = scalar_lea.vmem [#allocation13], %s5521_s15  ;;  %s5900_s15 = sshll.u32 %s7418_s28, 11 }
  0x89   : > { %6499 = vmatprep.subr.bf16.mxu0 %v7347_v0  ;;  %6505 = vmatprep.subr.bf16.mxu1 %v7347_v0  ;;  %v5921_v52 = vunpack.c.l.bf16 %v7653_v41  ;;  %v7000_v58 = vld [vmem:[#allocation10 + $0x10] sm:$0xff]   ;;  %v7002_v63 = vld [vmem:[#allocation10 + $0x8] sm:$0xff]   ;;  %v5922_v11 = vunpack.c.h.bf16 %v7653_v41  ;;  %s5394_s17 = sshll.u32 %s8814_s14, 4  ;;  %s8897_s9 = scalar_lea.hbm %s8951_s7, %s5900_s15  ;;  %s8899_s17 = int_to_ptr.vmem [resolvable:$true] %s5394_s17 }
  0x8a   : > { %v7003_v22 = vld [vmem:[#allocation10 + $0x50] sm:$0xff]   ;;  %s5381_s12 = scalar_lea.sflag [#allocation7], %s7581_s26  ;;  %s7263_s3 = scalar_lea.vmem %s8899_s17, 2048 }
  0x8b   : > { %p7264_p0 = scmp.ne.s32.totalorder %s8899_s17, %s7263_s3  ;;  %p9087_p10 = scmp.ne.s32.totalorder %s8986_s11, 0 }
  0x8c   : > { %s7354_s28 = smov [#allocation13]  }
  0x8d   : > { %p7265_p3 = pnand %p7264_p0, %p9087_p10  ;;  %s7267_s30 = sshll.u32 %s7354_s28, 4  ;;  %s7268_s30 = int_to_ptr.vmem [resolvable:$false] %s7267_s30 }
  0x8e   : > { %6490 = vmatmul.mubr.msk.bf16.vlgmr.msra.gmra.mxu0 %vm632_vm2, %v6990_v5  ;;  %6496 = vmatmul.mubr.msk.bf16.vlgmr.msra.gmra.mxu1 %vm632_vm2, %v6990_v5  ;;  %s7269_s18 = scalar_lea.vmem %s7268_s30, 4096  ;;  %p7270_p9 = scmp.lt.s32.totalorder %s8899_s17, %s7268_s30 }
  0x8f   : > { %6500 = vmatpush3.bf16.msra.mxu0 %v826_v12  ;;  %6501 = vmatprep.mubr.msk.bf16.mxu0 %vm7348_vm0, %v7347_v0  ;;  %p7266_p11 = pneg %p7265_p3  ;;  %p7271_p13 = scmp.lt.s32.totalorder %s7269_s18, %s7263_s3 }
  0x90   : > { %6506 = vmatpush3.bf16.msra.mxu1 %v873_v13  ;;  %6507 = vmatprep.mubr.msk.bf16.mxu1 %vm7348_vm0, %v7347_v0 }
  0x91   : > { %6511 = vmatprep.subr.bf16.mxu0 %v7347_v0  ;;  %6517 = vmatprep.subr.bf16.mxu1 %v7347_v0  ;;  %p7272_p1 = por %p7271_p13, %p7270_p9 }
  0x93   : > { %p7273_p4 = pnand %p7272_p1, %p7266_p11 }
  0x96   : > { %6502 = vmatmul.mubr.msk.bf16.vlgmr.msra.gmra.mxu0 %vm632_vm2, %v6990_v5  ;;  %6508 = vmatmul.mubr.msk.bf16.vlgmr.msra.gmra.mxu1 %vm632_vm2, %v6990_v5 }
  0x97   : > { %6512 = vmatpush3.bf16.msra.mxu0 %v920_v16  ;;  %6513 = vmatprep.mubr.msk.bf16.mxu0 %vm7348_vm0, %v7347_v0 }
  0x98   : > { %6518 = vmatpush3.bf16.msra.mxu1 %v967_v17  ;;  %6519 = vmatprep.mubr.msk.bf16.mxu1 %vm7348_vm0, %v7347_v0 }
  0x99   : > { %6555 = vmatprep.subr.bf16.mxu1 %v6991_v18  ;;  %6523 = vmatprep.subr.bf16.mxu0 %v6993_v20 }
  0x9e   : > { %6514 = vmatmul.mubr.msk.bf16.vlgmr.msra.gmra.mxu0 %vm632_vm2, %v6990_v5  ;;  %6520 = vmatmul.mubr.msk.bf16.vlgmr.msra.gmra.mxu1 %vm632_vm2, %v6990_v5 }
  0x9f   : > { %6556 = vmatpush3.bf16.msra.mxu1 %v6991_v18  ;;  %6524 = vmatpush3.bf16.msra.mxu0 %v6993_v20 }
  0xa0   : > { %6557 = vmatprep.subr.bf16.mxu1 %v6992_v19  ;;  %6525 = vmatprep.subr.bf16.mxu0 %v6995_v23 }
  0xa3   : > { %6558 = vmatpush3.bf16.msra.mxu1 %v6992_v19  ;;  %6526 = vmatpush3.bf16.msra.mxu0 %v6995_v23  ;;  %v7004_v23 = vld [vmem:[#allocation10] sm:$0xff]  }
  0xa4   : > { %6559 = vmatprep.subr.bf16.mxu1 %v6994_v21  ;;  %6527 = vmatprep.subr.bf16.mxu0 %v6997_v29 }
  0xa7   : > { %6560 = vmatpush3.bf16.msra.mxu1 %v6994_v21  ;;  %6528 = vmatpush3.bf16.msra.mxu0 %v6997_v29 }
  0xa8   : > { %6561 = vmatprep.subr.bf16.mxu1 %v6996_v24  ;;  %6529 = vmatprep.subr.bf16.mxu0 %v6999_v57 }
  0xab   : > { %6562 = vmatpush3.bf16.msra.mxu1 %v6996_v24  ;;  %6530 = vmatpush3.bf16.msra.mxu0 %v6999_v57  ;;  %v7006_v24 = vld [vmem:[#allocation10 + $0x48] sm:$0xff]  }
  0xac   : > { %6563 = vmatprep.subr.bf16.mxu1 %v6998_v30  ;;  %6531 = vmatprep.subr.bf16.mxu0 %v7001_v59 }
  0xaf   : > { %6564 = vmatpush3.bf16.msra.mxu1 %v6998_v30  ;;  %6532 = vmatpush3.bf16.msra.mxu0 %v7001_v59 }
  0xb0   : > { %6565 = vmatprep.subr.bf16.mxu1 %v7000_v58  ;;  %6533 = vmatprep.subr.bf16.mxu0 %v7003_v22 }
  0xb3   : > { %6566 = vmatpush3.bf16.msra.mxu1 %v7000_v58  ;;  %6534 = vmatpush3.bf16.msra.mxu0 %v7003_v22 }
  0xb4   : > { %6567 = vmatprep.subr.bf16.mxu1 %v7002_v63  ;;  %6535 = vmatprep.subr.bf16.mxu0 %v7006_v24 }
  0xb7   : > { %6568 = vmatpush3.bf16.msra.mxu1 %v7002_v63  ;;  %6536 = vmatpush3.bf16.msra.mxu0 %v7006_v24 }
  0xb8   : > { %6569 = vmatprep.subr.bf16.mxu1 %v7004_v23 }
  0xbb   : > { %6570 = vmatpush3.bf16.msra.mxu1 %v7004_v23 }
 0x146   : > { %v674_v27 = vpop.f32.mrf.mxu0  ;;  %v7646_v28 = vpop.f32.mrf.mxu1 }
 0x147   : > { %v7648_v31 = vadd.f32 %v5903_v25, %v674_v27  ;;  %v1060_v32 = vmul.f32 0.53333336, %v674_v27  ;;  %v1064_v33 = vmul.f32 0.46666667, %v7646_v28  ;;  %v1112_v38 = vmul.f32 0.06666667, %v674_v27 }
 0x148   : > { %v6479_v35 = vpop.f32.mrf.mxu0  ;;  %v6485_v36 = vpop.f32.mrf.mxu1  ;;  %v1116_v40 = vmul.f32 0.93333334, %v7646_v28  ;;  %v1164_v13 = vmul.f32 0.6, %v7646_v28  ;;  %v6210_v25 = vld [vmem:[%s7587_s29 + $0x18] sm:$0xff]  }
 0x149   : > { %v1066_v39 = vadd.f32 %v1064_v33, %v1060_v32  ;;  %v1023_v42 = vrot.slane %v7648_v31, 7  ;;  %v1030_v12 = vrot.slane %v7648_v31, 1  ;;  %v1216_v29 = vmul.f32 0.13333334, %v7646_v28 }
 0x14a   : > { %v677_v43 = vpop.f32.mrf.mxu0  ;;  %v7656_v44 = vpop.f32.mrf.mxu1  ;;  %v1118_v53 = vadd.f32 %v1116_v40, %v1112_v38  ;;  %v5930_v40 = vunpack.c.l.bf16 %v6210_v25 }
 0x14b   : > { %v7658_v45 = vadd.f32 %v5904_v34, %v677_v43  ;;  %v1061_v46 = vmul.f32 0.53333336, %v677_v43  ;;  %v1065_v47 = vmul.f32 0.46666667, %v7656_v44  ;;  %v7661_v51 = vadd.f32 %v5912_v37, %v1066_v39  ;;  %v7707_v34 = vld [vmem:[%s7587_s29 + $0x20] sm:$0xff]  }
 0x14c   : > { %v6480_v49 = vpop.f32.mrf.mxu0  ;;  %v6486_v50 = vpop.f32.mrf.mxu1  ;;  %v1028_v55 = vsel %vm8969_vm3, 0.0, %v1023_v42  ;;  %v1113_v0 = vmul.f32 0.06666667, %v677_v43  ;;  %v1117_v1 = vmul.f32 0.93333334, %v7656_v44  ;;  %v7679_v8 = vadd.f32 %v5921_v52, %v1118_v53  ;;  %v7723_v53 = vld [vmem:[%s7587_s29 + $0x28] sm:$0xff]  }
 0x14d   : > { %v1067_v54 = vadd.f32 %v1065_v47, %v1061_v46  ;;  %v1024_v56 = vrot.slane %v7658_v45, 7  ;;  %1036 = vrot.lane.b32.xlu0 %v1028_v55, %s7349_s10  ;;  %v1076_v61 = vrot.slane %v7661_v51, 7  ;;  %v1031_v5 = vrot.slane %v7658_v45, 1 }
 0x14e   : > { %v7667_v60 = vpop.f32.mrf.mxu0  ;;  %v7670_v62 = vpop.f32.mrf.mxu1  ;;  %v1119_v14 = vadd.f32 %v1117_v1, %v1113_v0  ;;  %v1128_v21 = vrot.slane %v7679_v8, 7  ;;  %v1165_v41 = vmul.f32 0.6, %v7656_v44  ;;  %v5931_v47 = vunpack.c.h.bf16 %v6210_v25  ;;  %v7008_v0 = vld [vmem:[#allocation10 + $0x40] sm:$0xff]  }
 0x14f   : > { %v1081_v2 = vsel %vm8969_vm3, 0.0, %v1076_v61  ;;  %v1025_v3 = vsel %vm8969_vm3, %v1023_v42, %v1024_v56  ;;  %v7676_v7 = vadd.f32 %v5913_v48, %v1067_v54  ;;  %v1168_v15 = vmul.f32 0.4, %v7667_v60  ;;  %6537 = vmatprep.subr.bf16.mxu0 %v7008_v0 }
 0x150   : > { %v6491_v4 = vpop.f32.mrf.mxu0  ;;  %v6497_v6 = vpop.f32.mrf.mxu1  ;;  %1088 = vrot.lane.b32.xlu1 %v1081_v2, %s7349_s10  ;;  %v1035_v16 = vsel %vm8971_vm4, %v1031_v5, 0.0  ;;  %v1032_v19 = vsel %vm8971_vm4, %v1030_v12, %v1031_v5  ;;  %v1220_v30 = vmul.f32 0.8666667, %v7667_v60  ;;  %v7703_v32 = vadd.f32 %v5922_v11, %v1119_v14  ;;  %6538 = vmatpush3.bf16.msra.mxu0 %v7008_v0 }
 0x151   : > { %1038 = vrot.lane.b32.xlu0 %v1025_v3, %s7349_s10  ;;  %v1077_v20 = vrot.slane %v7676_v7, 7  ;;  %v1083_v36 = vrot.slane %v7676_v7, 1  ;;  %v1170_v28 = vadd.f32 %v1168_v15, %v1164_v13  ;;  %v1133_v39 = vsel %vm8969_vm3, 0.0, %v1128_v21 }
 0x152   : > { %v7682_v9 = vpop.f32.mrf.mxu0  ;;  %v7684_v10 = vpop.f32.mrf.mxu1  ;;  %v1268_v46 = vmul.f32 0.6666667, %v7667_v60  ;;  %v1082_v48 = vrot.slane %v7661_v51, 1  ;;  %v5939_v49 = vunpack.c.l.bf16 %v7707_v34  ;;  %v1222_v50 = vadd.f32 %v1220_v30, %v1216_v29 }
 0x153   : > { %v1169_v33 = vmul.f32 0.4, %v7682_v9  ;;  %v1078_v35 = vsel %vm8969_vm3, %v1076_v61, %v1077_v20  ;;  %v1087_v54 = vsel %vm8971_vm4, %v1083_v36, 0.0  ;;  %v1129_v55 = vrot.slane %v7703_v32, 7 }
 0x154   : > { %v6492_v17 = vpop.f32.mrf.mxu0  ;;  %v6498_v18 = vpop.f32.mrf.mxu1  ;;  %1044 = vrot.lane.b32.xlu1 %v1035_v16, %s7350_s20  ;;  %v1272_v58 = vmul.f32 0.33333334, %v7670_v62  ;;  %v1084_v59 = vsel %vm8971_vm4, %v1082_v48, %v1083_v36  ;;  %v1135_v61 = vrot.slane %v7703_v32, 1  ;;  %v7731_v63 = vadd.f32 %v5930_v40, %v1170_v28 }
 0x155   : > { %1042 = vrot.lane.b32.xlu0 %v1032_v19, %s7350_s20  ;;  %v1171_v52 = vadd.f32 %v1169_v33, %v1165_v41  ;;  %v1320_v3 = vmul.f32 0.2, %v7667_v60  ;;  %v1134_v4 = vrot.slane %v7679_v8, 1  ;;  %v5948_v5 = vunpack.c.l.bf16 %v7723_v53  ;;  %v7747_v17 = vld [vmem:[%s7587_s29 + $0x30] sm:$0xff]  }
 0x156   : > { %v7697_v26 = vpop.f32.mrf.mxu0  ;;  %v7699_v27 = vpop.f32.mrf.mxu1  ;;  %v1221_v11 = vmul.f32 0.8666667, %v7682_v9  ;;  %v1324_v12 = vmul.f32 0.8, %v7670_v62  ;;  %v1130_v13 = vsel %vm8969_vm3, %v1128_v21, %v1129_v55  ;;  %v1274_v16 = vadd.f32 %v1272_v58, %v1268_v46 }
 0x157   : > { %v7741_v6 = vadd.f32 %v5931_v47, %v1171_v52  ;;  %v1136_v60 = vsel %vm8971_vm4, %v1134_v4, %v1135_v61  ;;  %v1180_v18 = vrot.slane %v7731_v63, 7  ;;  %v7752_v19 = vadd.f32 %v5939_v49, %v1222_v50 }
 0x158   : > { %v6503_v37 = vpop.f32.mrf.mxu0  ;;  %v6509_v38 = vpop.f32.mrf.mxu1  ;;  %1090 = vrot.lane.b32.xlu1 %v1078_v35, %s7349_s10  ;;  %v1217_v20 = vmul.f32 0.13333334, %v7656_v44  ;;  %v5940_v23 = vunpack.c.h.bf16 %v7707_v34  ;;  %v1269_v24 = vmul.f32 0.6666667, %v7682_v9  ;;  %v1273_v25 = vmul.f32 0.33333334, %v7684_v10 }
 0x159   : > { %1140 = vrot.lane.b32.xlu0 %v1133_v39, %s7349_s10  ;;  %v1139_v30 = vsel %vm8971_vm4, %v1135_v61, 0.0  ;;  %v1181_v33 = vrot.slane %v7741_v6, 7  ;;  %v5957_v35 = vunpack.c.l.bf16 %v7747_v17  ;;  %v1326_v37 = vadd.f32 %v1324_v12, %v1320_v3 }
 0x15a   : > { %v7715_v42 = vpop.f32.mrf.mxu0  ;;  %v7717_v43 = vpop.f32.mrf.mxu1  ;;  %v1223_v29 = vadd.f32 %v1221_v11, %v1217_v20  ;;  %v1185_v38 = vsel %vm8969_vm3, 0.0, %v1180_v18  ;;  %v1232_v34 = vrot.slane %v7752_v19, 7  ;;  %v7769_v28 = vadd.f32 %v5948_v5, %v1274_v16 }
 0x15b   : > { %v1275_v39 = vadd.f32 %v1273_v25, %v1269_v24  ;;  %v5949_v40 = vunpack.c.h.bf16 %v7723_v53  ;;  %v1580_v41 = vmul.f32 0.8666667, %v7699_v27  ;;  %v1632_v46 = vmul.f32 0.4, %v7699_v27 }
 0x15c   : > { %v6504_v56 = vpop.f32.mrf.mxu0  ;;  %v6510_v57 = vpop.f32.mrf.mxu1  ;;  %1096 = vrot.lane.b32.xlu1 %v1087_v54, %s7350_s20  ;;  %v7775_v47 = vadd.f32 %v5940_v23, %v1223_v29  ;;  %v1182_v48 = vsel %vm8969_vm3, %v1180_v18, %v1181_v33  ;;  %v1187_v49 = vrot.slane %v7741_v6, 1  ;;  %v1237_v52 = vsel %vm8969_vm3, 0.0, %v1232_v34 }
 0x15d   : > { %1094 = vrot.lane.b32.xlu0 %v1084_v59, %s7350_s20  ;;  %v1284_v54 = vrot.slane %v7769_v28, 7  ;;  %v7783_v55 = vadd.f32 %v5957_v35, %v1326_v37  ;;  %v1581_v56 = vmul.f32 0.8666667, %v7717_v43  ;;  %v1633_v57 = vmul.f32 0.4, %v7717_v43 }
 0x15e   : > { %v7734_v1 = vpop.f32.mrf.mxu0  ;;  %v7736_v2 = vpop.f32.mrf.mxu1  ;;  %v7789_v58 = vadd.f32 %v5949_v40, %v1275_v39  ;;  %v1191_v0 = vsel %vm8971_vm4, %v1187_v49, 0.0  ;;  %v1233_v3 = vrot.slane %v7775_v47, 7  ;;  %v5958_v24 = vunpack.c.h.bf16 %v7747_v17 }
 0x15f   : > { %v1584_v50 = vmul.f32 0.13333334, %v7734_v1  ;;  %v1636_v53 = vmul.f32 0.6, %v7734_v1  ;;  %v1289_v11 = vsel %vm8969_vm3, 0.0, %v1284_v54  ;;  %v1336_v12 = vrot.slane %v7783_v55, 7 }
 0x160   : > { %v6515_v14 = vpop.f32.mrf.mxu0  ;;  %v6521_v15 = vpop.f32.mrf.mxu1  ;;  %1142 = vrot.lane.b32.xlu1 %v1130_v13, %s7349_s10  ;;  %v1321_v13 = vmul.f32 0.2, %v7682_v9  ;;  %v1285_v18 = vrot.slane %v7789_v58, 7  ;;  %v1372_v9 = vmul.f32 0.73333335, %v7670_v62  ;;  %v1186_v25 = vrot.slane %v7731_v63, 1 }
 0x161   : > { %1146 = vrot.lane.b32.xlu0 %v1136_v60, %s7350_s20  ;;  %v7791_v59 = vadd.f32 %v1584_v50, %v1580_v41  ;;  %v7793_v61 = vadd.f32 %v1636_v53, %v1632_v46  ;;  %v1325_v14 = vmul.f32 0.8, %v7684_v10  ;;  %v1234_v60 = vsel %vm8969_vm3, %v1232_v34, %v1233_v3 }
 0x162   : > { %v7756_v22 = vpop.f32.mrf.mxu0  ;;  %v7758_v21 = vpop.f32.mrf.mxu1  ;;  %v1341_v20 = vsel %vm8969_vm3, 0.0, %v1336_v12  ;;  %v1684_v29 = vmul.f32 0.93333334, %v7734_v1  ;;  %v1424_v33 = vmul.f32 0.26666668, %v7670_v62  ;;  %v1239_v37 = vrot.slane %v7775_v47, 1 }
 0x163   : > { %v1585_v4 = vmul.f32 0.13333334, %v7756_v22  ;;  %v1637_v5 = vmul.f32 0.6, %v7756_v22  ;;  %v1327_v23 = vadd.f32 %v1325_v14, %v1321_v13  ;;  %v1373_v35 = vmul.f32 0.73333335, %v7684_v10 }
 0x164   : > { %v6516_v44 = vpop.f32.mrf.mxu0  ;;  %v6522_v36 = vpop.f32.mrf.mxu1  ;;  %1148 = vrot.lane.b32.xlu1 %v1139_v30, %s7350_s20  ;;  %v1736_v30 = vmul.f32 0.46666667, %v7734_v1  ;;  %v1376_v17 = vmul.f32 0.26666668, %v7697_v26  ;;  %v1688_v34 = vmul.f32 0.06666667, %v7736_v2 }
 0x165   : > { %1192 = vrot.lane.b32.xlu0 %v1185_v38, %s7349_s10  ;;  %v7805_v15 = vadd.f32 %v1585_v4, %v1581_v56  ;;  %v7807_v16 = vadd.f32 %v1637_v5, %v1633_v57  ;;  %v6218_v44 = vld [vmem:[%s7587_s29 + $0x38] sm:$0xff]   ;;  %v1286_v36 = vsel %vm8969_vm3, %v1284_v54, %v1285_v18  ;;  %v1188_v38 = vsel %vm8971_vm4, %v1186_v25, %v1187_v49 }
 0x166   : > { %v1740_v1 = vmul.f32 0.53333336, %v7736_v2  ;;  %v7831_v39 = vadd.f32 %v5958_v24, %v1327_v23  ;;  %v1428_v62 = vmul.f32 0.73333335, %v7697_v26  ;;  %v1685_v40 = vmul.f32 0.93333334, %v7756_v22 }
 0x167   : > { %v1737_v41 = vmul.f32 0.46666667, %v7756_v22  ;;  %v1377_v46 = vmul.f32 0.26666668, %v7715_v42  ;;  %v1238_v49 = vrot.slane %v7752_v19, 1  ;;  %v7842_v50 = vadd.f32 %v1688_v34, %v1684_v29  ;;  %v6222_v23 = vld [vmem:[%s7587_s29 + $0x48] sm:$0xff]  }
 0x168   : > { %1194 = vrot.lane.b32.xlu1 %v1182_v48, %s7349_s10  ;;  %v7839_v48 = vld [vmem:[%s7587_s29 + $0x40] sm:$0xff]   ;;  %v1243_v54 = vsel %vm8971_vm4, %v1239_v37, 0.0  ;;  %v1291_v53 = vrot.slane %v7789_v58, 1  ;;  %v1689_v56 = vmul.f32 0.06666667, %v7758_v21  ;;  %v1378_v22 = vadd.f32 %v1376_v17, %v1372_v9 }
 0x169   : > { %1244 = vrot.lane.b32.xlu0 %v1237_v52, %s7349_s10  ;;  %v7844_v52 = vadd.f32 %v1740_v1, %v1736_v30  ;;  %v1741_v57 = vmul.f32 0.53333336, %v7758_v21  ;;  %v1290_v3 = vrot.slane %v7769_v28, 1  ;;  %v5966_v4 = vunpack.c.l.bf16 %v6218_v44 }
 0x16a   : > { %v7854_v5 = vadd.f32 %v1689_v56, %v1685_v40  ;;  %v1430_v13 = vadd.f32 %v1428_v62, %v1424_v33  ;;  %v1476_v14 = vmul.f32 0.8, %v7697_v26  ;;  %v5975_v18 = vunpack.c.l.bf16 %v7839_v48  ;;  %v7883_v40 = vld [vmem:[%s7587_s29 + $0x50] sm:$0xff]  }
 0x16b   : > { %v1480_v9 = vmul.f32 0.2, %v7699_v27  ;;  %v1295_v24 = vsel %vm8971_vm4, %v1291_v53, 0.0  ;;  %v1337_v25 = vrot.slane %v7831_v39, 7  ;;  %v1292_v29 = vsel %vm8971_vm4, %v1290_v3, %v1291_v53 }
 0x16c   : > { %1200 = vrot.lane.b32.xlu1 %v1191_v0, %s7350_s20  ;;  %v1240_v0 = vsel %vm8971_vm4, %v1238_v49, %v1239_v37  ;;  %v1342_v30 = vrot.slane %v7783_v55, 1  ;;  %v1343_v33 = vrot.slane %v7831_v39, 1  ;;  %v1425_v37 = vmul.f32 0.26666668, %v7684_v10 }
 0x16d   : > { %1296 = vrot.lane.b32.xlu0 %v1289_v11, %s7349_s10  ;;  %v7856_v11 = vadd.f32 %v1741_v57, %v1737_v41  ;;  %v1429_v17 = vmul.f32 0.73333335, %v7715_v42  ;;  %v1528_v34 = vmul.f32 0.33333334, %v7697_v26  ;;  %v1532_v62 = vmul.f32 0.6666667, %v7699_v27 }
 0x16e   : > { %v1338_v41 = vsel %vm8969_vm3, %v1336_v12, %v1337_v25  ;;  %v1482_v10 = vadd.f32 %v1480_v9, %v1476_v14  ;;  %v7892_v26 = vadd.f32 %v5975_v18, %v1430_v13  ;;  %v1477_v53 = vmul.f32 0.8, %v7715_v42 }
 0x16f   : > { %v1431_v27 = vadd.f32 %v1429_v17, %v1425_v37  ;;  %v5993_v12 = vunpack.c.l.bf16 %v7883_v40  ;;  %v1534_v56 = vadd.f32 %v1532_v62, %v1528_v34  ;;  %v1481_v57 = vmul.f32 0.2, %v7717_v43 }
 0x170   : > { %1246 = vrot.lane.b32.xlu1 %v1234_v60, %s7349_s10  ;;  %v5967_v60 = vunpack.c.h.bf16 %v6218_v44  ;;  %v7868_v44 = vadd.f32 %v5966_v4, %v1378_v22  ;;  %v1347_v22 = vsel %vm8971_vm4, %v1343_v33, 0.0  ;;  %v1440_v4 = vrot.slane %v7892_v26, 7 }
 0x171   : > { %1348 = vrot.lane.b32.xlu0 %v1341_v20, %s7349_s10  ;;  %v1379_v20 = vadd.f32 %v1377_v46, %v1373_v35  ;;  %v7873_v35 = vld [vmem:[#allocation10 + $0x78] sm:$0xff]   ;;  %v1344_v46 = vsel %vm8971_vm4, %v1342_v30, %v1343_v33  ;;  %v1483_v18 = vadd.f32 %v1481_v57, %v1477_v53  ;;  %v1529_v34 = vmul.f32 0.33333334, %v7715_v42 }
 0x172   : > { %6619 = vmatprep.subr.bf16.mxu1 %v7873_v35  ;;  %v1388_v49 = vrot.slane %v7868_v44, 7  ;;  %v1445_v25 = vsel %vm8969_vm3, 0.0, %v1440_v4  ;;  %v1533_v62 = vmul.f32 0.6666667, %v7717_v43  ;;  %v5994_v42 = vunpack.c.h.bf16 %v7883_v40  ;;  %v6234_v53 = vld [vmem:[%s7587_s29 + $0x78] sm:$0xff]  }
 0x173   : > { %v7879_v1 = vadd.f32 %v5967_v60, %v1379_v20  ;;  %v5985_v60 = vunpack.c.h.bf16 %v6222_v23  ;;  %v6038_v57 = vunpack.c.l.bf16 %v6234_v53 }
 0x174   : > { %1298 = vrot.lane.b32.xlu1 %v1286_v36, %s7349_s10  ;;  %v7870_v36 = vld [vmem:[#allocation10 + $0xb8] sm:$0xff]   ;;  %v1393_v3 = vsel %vm8969_vm3, 0.0, %v1388_v49 }
 0x175   : > { %1198 = vrot.lane.b32.xlu0 %v1188_v38, %s7350_s20  ;;  %v5984_v38 = vunpack.c.l.bf16 %v6222_v23  ;;  %6587 = vmatprep.subr.bf16.mxu0 %v7870_v36  ;;  %v1395_v9 = vrot.slane %v7879_v1, 1  ;;  %v7917_v30 = vadd.f32 %v5985_v60, %v1483_v18  ;;  %v6039_v60 = vunpack.c.h.bf16 %v6234_v53  ;;  %v6232_v53 = vld [vmem:[%s7587_s29 + $0x70] sm:$0xff]  }
 0x176   : > { %v7951_v18 = vadd.f32 %v6038_v57, %v7736_v2 }
 0x177   : > { %v7904_v13 = vadd.f32 %v5984_v38, %v1482_v10  ;;  %v1399_v33 = vsel %vm8971_vm4, %v1395_v9, 0.0  ;;  %v1493_v10 = vrot.slane %v7917_v30, 7  ;;  %v1499_v40 = vrot.slane %v7917_v30, 1 }
 0x178   : > { %1252 = vrot.lane.b32.xlu1 %v1243_v54, %s7350_s20  ;;  %v5976_v54 = vunpack.c.h.bf16 %v7839_v48  ;;  %v7351_v48 = vmov 0   ;;  %v1796_v2 = vrot.slane %v7951_v18, 7 }
 0x179   : > { %1250 = vrot.lane.b32.xlu0 %v1240_v0, %s7350_s20  ;;  %v1389_v0 = vrot.slane %v7879_v1, 7  ;;  %610 = vst [vmem:[#allocation2 + $0x8] sm:$0xf] %v7351_v48  ;;  %611 = vst [vmem:[#allocation2 + $0xc] sm:$0xf] %v7351_v48 }
 0x17a   : > { %612 = vst [vmem:[#allocation2 + $0x90] sm:$0xf] %v7351_v48  ;;  %613 = vst [vmem:[#allocation2 + $0x94] sm:$0xf] %v7351_v48  ;;  %v7907_v14 = vadd.f32 %v5976_v54, %v1431_v27  ;;  %v1535_v27 = vadd.f32 %v1533_v62, %v1529_v34  ;;  %v6230_v62 = vld [vmem:[%s7587_s29 + $0x68] sm:$0xff]  }
 0x17b   : > { %618 = vst [vmem:[#allocation3 + $0x8] sm:$0xf] %v7351_v48  ;;  %619 = vst [vmem:[#allocation3 + $0xc] sm:$0xf] %v7351_v48  ;;  %v1390_v20 = vsel %vm8969_vm3, %v1388_v49, %v1389_v0  ;;  %v1394_v49 = vrot.slane %v7868_v44, 1 }
 0x17c   : > { %1304 = vrot.lane.b32.xlu1 %v1295_v24, %s7350_s20  ;;  %620 = vst [vmem:[#allocation3 + $0x90] sm:$0xf] %v7351_v48  ;;  %621 = vst [vmem:[#allocation3 + $0x94] sm:$0xf] %v7351_v48  ;;  %v7911_v24 = vadd.f32 %v5993_v12, %v1534_v56  ;;  %v1441_v37 = vrot.slane %v7907_v14, 7  ;;  %v1447_v54 = vrot.slane %v7907_v14, 1 }
 0x17d   : > { %1302 = vrot.lane.b32.xlu0 %v1292_v29, %s7350_s20  ;;  %v1492_v29 = vrot.slane %v7904_v13, 7  ;;  %v1396_v12 = vsel %vm8971_vm4, %v1394_v49, %v1395_v9  ;;  %v1446_v56 = vrot.slane %v7892_v26, 1  ;;  %v6226_v48 = vld [vmem:[%s7587_s29 + $0x58] sm:$0xff]  }
 0x17e   : > { %v1544_v23 = vrot.slane %v7911_v24, 7  ;;  %v1451_v0 = vsel %vm8971_vm4, %v1447_v54, 0.0  ;;  %v6003_v34 = vunpack.c.h.bf16 %v6226_v48 }
 0x17f   : > { %v1497_v17 = vsel %vm8969_vm3, 0.0, %v1492_v29  ;;  %v1494_v43 = vsel %vm8969_vm3, %v1492_v29, %v1493_v10  ;;  %v1550_v29 = vrot.slane %v7911_v24, 1 }
 0x180   : > { %1350 = vrot.lane.b32.xlu1 %v1338_v41, %s7349_s10  ;;  %v7005_v38 = vld [vmem:[#allocation2 + $0x8] sm:$0xff]   ;;  %v1442_v41 = vsel %vm8969_vm3, %v1440_v4, %v1441_v37  ;;  %v1498_v4 = vrot.slane %v7904_v13, 1  ;;  %v6002_v37 = vunpack.c.l.bf16 %v6226_v48  ;;  %v6021_v48 = vunpack.c.h.bf16 %v6230_v62 }
 0x181   : > { %1354 = vrot.lane.b32.xlu0 %v1344_v46, %s7350_s20  ;;  %6571 = vmatprep.mubr.bf16.mxu1 %v7005_v38  ;;  %v1549_v46 = vsel %vm8969_vm3, 0.0, %v1544_v23  ;;  %v7962_v38 = vadd.f32 %v6039_v60, %v7758_v21 }
 0x183   : > { %v1797_v21 = vrot.slane %v7962_v38, 7 }
 0x184   : > { %1356 = vrot.lane.b32.xlu1 %v1347_v22, %s7350_s20  ;;  %v7941_v22 = vadd.f32 %v5994_v42, %v1535_v27  ;;  %v6020_v27 = vunpack.c.l.bf16 %v6230_v62  ;;  %v1801_v42 = vsel %vm8969_vm3, 0.0, %v1796_v2 }
 0x185   : > { %1400 = vrot.lane.b32.xlu0 %v1393_v3, %s7349_s10  ;;  %v1448_v3 = vsel %vm8971_vm4, %v1446_v56, %v1447_v54 }
 0x186   : > { %v1545_v9 = vrot.slane %v7941_v22, 7  ;;  %v7988_v56 = vadd.f32 %v6020_v27, %v7842_v50 }
 0x188   : > { %1402 = vrot.lane.b32.xlu1 %v1390_v20, %s7349_s10  ;;  %v1503_v20 = vsel %vm8971_vm4, %v1499_v40, 0.0 }
 0x189   : > { %1452 = vrot.lane.b32.xlu0 %v1445_v25, %s7349_s10  ;;  %v1500_v25 = vsel %vm8971_vm4, %v1498_v4, %v1499_v40 }
 0x18c   : > { %1408 = vrot.lane.b32.xlu1 %v1399_v33, %s7350_s20  ;;  %v1551_v33 = vrot.slane %v7941_v22, 1 }
 0x18d   : > { %1504 = vrot.lane.b32.xlu0 %v1497_v17, %s7349_s10  ;;  %v6228_v17 = vld [vmem:[%s7587_s29 + $0x60] sm:$0xff]  }
 0x18e   : > { %v1552_v10 = vsel %vm8971_vm4, %v1550_v29, %v1551_v33  ;;  %v6011_v49 = vunpack.c.l.bf16 %v6228_v17  ;;  %v6012_v57 = vunpack.c.h.bf16 %v6228_v17  ;;  %v8009_v29 = vadd.f32 %v6021_v48, %v7854_v5 }
 0x190   : > { %1454 = vrot.lane.b32.xlu1 %v1442_v41, %s7349_s10  ;;  %v1546_v41 = vsel %vm8969_vm3, %v1544_v23, %v1545_v9  ;;  %v1555_v23 = vsel %vm8971_vm4, %v1551_v33, 0.0  ;;  %v7997_v4 = vadd.f32 %v6012_v57, %v7807_v16  ;;  %v1701_v17 = vrot.slane %v8009_v29, 7 }
 0x191   : > { %1556 = vrot.lane.b32.xlu0 %v1549_v46, %s7349_s10  ;;  %v7970_v46 = vadd.f32 %v6002_v37, %v7791_v59  ;;  %v7982_v59 = vadd.f32 %v6011_v49, %v7793_v61  ;;  %v1700_v61 = vrot.slane %v7988_v56, 7 }
 0x192   : > { %v1649_v33 = vrot.slane %v7997_v4, 7 }
 0x193   : > { %v1596_v54 = vrot.slane %v7970_v46, 7  ;;  %v1602_v5 = vrot.slane %v7970_v46, 1  ;;  %v1702_v62 = vsel %vm8969_vm3, %v1700_v61, %v1701_v17  ;;  %v1654_v49 = vrot.slane %v7982_v59, 1 }
 0x194   : > { %1506 = vrot.lane.b32.xlu1 %v1494_v43, %s7349_s10  ;;  %v7976_v43 = vadd.f32 %v6003_v34, %v7805_v15  ;;  %v6030_v34 = vunpack.c.h.bf16 %v6232_v53 }
 0x195   : > { %1406 = vrot.lane.b32.xlu0 %v1396_v12, %s7350_s20  ;;  %v1798_v12 = vsel %vm8969_vm3, %v1796_v2, %v1797_v21  ;;  %v1601_v40 = vsel %vm8969_vm3, 0.0, %v1596_v54 }
 0x196   : > { %v1597_v15 = vrot.slane %v7976_v43, 7  ;;  %v1603_v60 = vrot.slane %v7976_v43, 1  ;;  %v8029_v21 = vadd.f32 %v6030_v34, %v7856_v11 }
 0x198   : > { %1460 = vrot.lane.b32.xlu1 %v1451_v0, %s7350_s20  ;;  %v6029_v0 = vunpack.c.l.bf16 %v6232_v53  ;;  %v1598_v50 = vsel %vm8969_vm3, %v1596_v54, %v1597_v15  ;;  %v1607_v16 = vsel %vm8971_vm4, %v1603_v60, 0.0  ;;  %v1706_v54 = vrot.slane %v7988_v56, 1 }
 0x199   : > { %1458 = vrot.lane.b32.xlu0 %v1448_v3, %s7350_s20  ;;  %v1648_v3 = vrot.slane %v7982_v59, 7  ;;  %v1753_v57 = vrot.slane %v8029_v21, 7 }
 0x19b   : > { %v1653_v9 = vsel %vm8969_vm3, 0.0, %v1648_v3  ;;  %v1650_v37 = vsel %vm8969_vm3, %v1648_v3, %v1649_v33 }
 0x19c   : > { %1512 = vrot.lane.b32.xlu1 %v1503_v20, %s7350_s20  ;;  %v8002_v20 = vadd.f32 %v6029_v0, %v7844_v52  ;;  %v1759_v0 = vrot.slane %v8029_v21, 1 }
 0x19d   : > { %1510 = vrot.lane.b32.xlu0 %v1500_v25, %s7350_s20  ;;  %v1705_v25 = vsel %vm8969_vm3, 0.0, %v1700_v61 }
 0x19e   : > { %v1752_v52 = vrot.slane %v8002_v20, 7  ;;  %v1758_v15 = vrot.slane %v8002_v20, 1  ;;  %v1763_v17 = vsel %vm8971_vm4, %v1759_v0, 0.0 }
 0x1a0   : > { %1558 = vrot.lane.b32.xlu1 %v1546_v41, %s7349_s10  ;;  %v1757_v2 = vsel %vm8969_vm3, 0.0, %v1752_v52  ;;  %v1655_v41 = vrot.slane %v7997_v4, 1  ;;  %v1754_v61 = vsel %vm8969_vm3, %v1752_v52, %v1753_v57  ;;  %v1760_v48 = vsel %vm8971_vm4, %v1758_v15, %v1759_v0 }
 0x1a1   : > { %1562 = vrot.lane.b32.xlu0 %v1552_v10, %s7350_s20  ;;  %v1604_v10 = vsel %vm8971_vm4, %v1602_v5, %v1603_v60  ;;  %v1803_v60 = vrot.slane %v7962_v38, 1 }
 0x1a2   : > { %v1659_v27 = vsel %vm8971_vm4, %v1655_v41, 0.0 }
 0x1a4   : > { %1564 = vrot.lane.b32.xlu1 %v1555_v23, %s7350_s20  ;;  %v1656_v23 = vsel %vm8971_vm4, %v1654_v49, %v1655_v41 }
 0x1a5   : > { %1808 = vrot.lane.b32.xlu0 %v1801_v42, %s7349_s10  ;;  %v1707_v42 = vrot.slane %v8009_v29, 1 }
 0x1a7   : > { %v1708_v11 = vsel %vm8971_vm4, %v1706_v54, %v1707_v42 }
 0x1a8   : > { %1810 = vrot.lane.b32.xlu1 %v1798_v12, %s7349_s10  ;;  %v1711_v12 = vsel %vm8971_vm4, %v1707_v42, 0.0 }
 0x1a9   : > { %1608 = vrot.lane.b32.xlu0 %v1601_v40, %s7349_s10 }
 0x1ac   : > { %1610 = vrot.lane.b32.xlu1 %v1598_v50, %s7349_s10  ;;  %v1802_v50 = vrot.slane %v7951_v18, 1 }
 0x1ad   : > { %1660 = vrot.lane.b32.xlu0 %v1653_v9, %s7349_s10 }
 0x1b0   : > { %1616 = vrot.lane.b32.xlu1 %v1607_v16, %s7350_s20 }
 0x1b1   : > { %1712 = vrot.lane.b32.xlu0 %v1705_v25, %s7349_s10 }
 0x1b4   : > { %1662 = vrot.lane.b32.xlu1 %v1650_v37, %s7349_s10 }
 0x1b5   : > { %1764 = vrot.lane.b32.xlu0 %v1757_v2, %s7349_s10  ;;  %v1804_v2 = vsel %vm8971_vm4, %v1802_v50, %v1803_v60  ;;  %v7016_v50 = vld [vmem:[#allocation10 + $0xb0] sm:$0xff]  }
 0x1b8   : > { %1714 = vrot.lane.b32.xlu1 %v1702_v62, %s7349_s10 }
 0x1b9   : > { %1614 = vrot.lane.b32.xlu0 %v1604_v10, %s7350_s20 }
 0x1bc   : > { %1668 = vrot.lane.b32.xlu1 %v1659_v27, %s7350_s20 }
 0x1bd   : > { %1666 = vrot.lane.b32.xlu0 %v1656_v23, %s7350_s20 }
 0x1bf   : > { %v1037_v53 = vpop.permute.xlu0 %1036 }
 0x1c0   : > { %1720 = vrot.lane.b32.xlu1 %v1711_v12, %s7350_s20  ;;  %v1040_v25 = vadd.f32 %v1037_v53, %v7648_v31  ;;  %v7017_v53 = vld [vmem:[#allocation10 + $0x70] sm:$0xff]  }
 0x1c1   : > { %1718 = vrot.lane.b32.xlu0 %v1708_v11, %s7350_s20 }
 0x1c2   : > { %v1089_v40 = vpop.permute.xlu1 %1088 }
 0x1c3   : > { %v1039_v3 = vpop.permute.xlu0 %1038  ;;  %v1092_v41 = vadd.f32 %v1089_v40, %v7661_v51 }
 0x1c4   : > { %1766 = vrot.lane.b32.xlu1 %v1754_v61, %s7349_s10  ;;  %v1041_v9 = vadd.f32 %v1039_v3, %v7658_v45  ;;  %v1807_v45 = vsel %vm8971_vm4, %v1803_v60, 0.0  ;;  %v7020_v3 = vld [vmem:[#allocation10 + $0x68] sm:$0xff]   ;;  %v7022_v60 = vld [vmem:[#allocation10 + $0x60] sm:$0xff]  }
 0x1c5   : > { %1770 = vrot.lane.b32.xlu0 %v1760_v48, %s7350_s20 }
 0x1c6   : > { %v1045_v16 = vpop.permute.xlu1 %1044 }
 0x1c7   : > { %v1047_v33 = vadd.f32 %v1045_v16, %v1041_v9  ;;  %v1043_v37 = vpop.permute.xlu0 %1042  ;;  %v7024_v16 = vld [vmem:[#allocation10 + $0x58] sm:$0xff]  }
 0x1c8   : > { %v1046_v52 = vadd.f32 %v1043_v37, %v1040_v25  ;;  %1772 = vrot.lane.b32.xlu1 %v1763_v17, %s7350_s20  ;;  %v7018_v25 = vld [vmem:[#allocation10 + $0xa8] sm:$0xff]  }
 0x1c9   : > { %1814 = vrot.lane.b32.xlu0 %v1804_v2, %s7350_s20  ;;  %v7026_v2 = vld [vmem:[#allocation10 + $0x50] sm:$0xff]  }
 0x1ca   : > { %v5908_v5 = vpack.c.bf16 %v1047_v33, %v1046_v52  ;;  %v1091_v34 = vpop.permute.xlu1 %1090  ;;  %v7021_v33 = vld [vmem:[#allocation10 + $0xa0] sm:$0xff]  }
 0x1cb   : > { %v1141_v62 = vpop.permute.xlu0 %1140  ;;  %v1093_v31 = vadd.f32 %v1091_v34, %v7676_v7 }
 0x1cc   : > { %6205 = vst [vmem:[#allocation2 + $0x10] sm:$0xff] %v5908_v5   ;;  %1816 = vrot.lane.b32.xlu1 %v1807_v45, %s7350_s20  ;;  %v1144_v11 = vadd.f32 %v1141_v62, %v7679_v8  ;;  %v7023_v45 = vld [vmem:[#allocation10 + $0x98] sm:$0xff]  }
 0x1ce   : > { %v1097_v10 = vpop.permute.xlu1 %1096 }
 0x1cf   : > { %v1099_v49 = vadd.f32 %v1097_v10, %v1093_v31  ;;  %v1095_v27 = vpop.permute.xlu0 %1094  ;;  %v7029_v31 = vld [vmem:[#allocation10 + $0x48] sm:$0xff]  }
 0x1d0   : > { %v1098_v42 = vadd.f32 %v1095_v27, %v1092_v41 }
 0x1d2   : > { %v5917_v23 = vpack.c.bf16 %v1099_v49, %v1098_v42  ;;  %v1143_v54 = vpop.permute.xlu1 %1142 }
 0x1d3   : > { %v1147_v12 = vpop.permute.xlu0 %1146  ;;  %v7007_v57 = vld [vmem:[#allocation2 + $0x10] sm:$0xff]   ;;  %v1145_v15 = vadd.f32 %v1143_v54, %v7703_v32 }
 0x1d4   : > { %6207 = vst [vmem:[#allocation2 + $0x18] sm:$0xff] %v5917_v23   ;;  %6539 = vmatprep.mubr.bf16.mxu0 %v7007_v57  ;;  %6572 = vmatmul.mubr.bf16.vlgmr.msra.gmra.mxu1 %v7007_v57  ;;  %v1150_v51 = vadd.f32 %v1147_v12, %v1144_v11  ;;  %v7025_v54 = vld [vmem:[#allocation10 + $0x90] sm:$0xff]  }
 0x1d5   : > { %6620 = vmatpush3.bf16.msra.mxu1 %v7873_v35 }
 0x1d6   : > { %v1149_v0 = vpop.permute.xlu1 %1148  ;;  %6621 = vmatprep.subr.bf16.mxu1 %v7017_v53 }
 0x1d7   : > { %v1151_v7 = vadd.f32 %v1149_v0, %v1145_v15  ;;  %v1193_v40 = vpop.permute.xlu0 %1192 }
 0x1d8   : > { %v1196_v5 = vadd.f32 %v1193_v40, %v7731_v63 }
 0x1d9   : > { %v5926_v61 = vpack.c.bf16 %v1151_v7, %v1150_v51  ;;  %6622 = vmatpush3.bf16.msra.mxu1 %v7017_v53  ;;  %v7032_v53 = vld [vmem:[#allocation10 + $0x40] sm:$0xff]   ;;  %v7027_v51 = vld [vmem:[#allocation10 + $0x88] sm:$0xff]   ;;  %v8070_v7 = vld [vmem:[#allocation10 + $0xb8] sm:$0xff]  }
 0x1da   : > { %v1195_v48 = vpop.permute.xlu1 %1194  ;;  %6623 = vmatprep.subr.bf16.mxu1 %v7020_v3 }
 0x1db   : > { %6209 = vst [vmem:[#allocation2 + $0x20] sm:$0xff] %v5926_v61   ;;  %v1245_v9 = vpop.permute.xlu0 %1244  ;;  %v7009_v8 = vld [vmem:[#allocation2 + $0x18] sm:$0xff]  }
 0x1dc   : > { %6540 = vmatmul.mubr.bf16.vlgmr.msra.gmra.mxu0 %v7009_v8  ;;  %6575 = vmatprep.mubr.bf16.mxu1 %v7009_v8  ;;  %v1248_v27 = vadd.f32 %v1245_v9, %v7752_v19  ;;  %v8075_v8 = vld [vmem:[#allocation10 + $0x38] sm:$0xff]  }
 0x1dd   : > { %6588 = vmatpush3.bf16.msra.mxu0 %v7870_v36  ;;  %6624 = vmatpush3.bf16.msra.mxu1 %v7020_v3  ;;  %v1197_v36 = vadd.f32 %v1195_v48, %v7741_v6  ;;  %v7031_v48 = vld [vmem:[#allocation10 + $0x80] sm:$0xff]  }
 0x1de   : > { %v1201_v32 = vpop.permute.xlu1 %1200  ;;  %6589 = vmatprep.subr.bf16.mxu0 %v7016_v50  ;;  %6625 = vmatprep.subr.bf16.mxu1 %v7022_v60 }
 0x1df   : > { %v1297_v35 = vpop.permute.xlu0 %1296  ;;  %v1203_v41 = vadd.f32 %v1201_v32, %v1197_v36 }
 0x1e0   : > { %v1300_v11 = vadd.f32 %v1297_v35, %v7769_v28 }
 0x1e1   : > { %6590 = vmatpush3.bf16.msra.mxu0 %v7016_v50  ;;  %6626 = vmatpush3.bf16.msra.mxu1 %v7022_v60 }
 0x1e2   : > { %v1247_v37 = vpop.permute.xlu1 %1246  ;;  %v7010_v17 = vld [vmem:[#allocation2 + $0x20] sm:$0xff]   ;;  %6591 = vmatprep.subr.bf16.mxu0 %v7018_v25  ;;  %6627 = vmatprep.subr.bf16.mxu1 %v7024_v16 }
 0x1e3   : > { %v1349_v52 = vpop.permute.xlu0 %1348  ;;  %6543 = vmatprep.mubr.bf16.mxu0 %v7010_v17  ;;  %6576 = vmatmul.mubr.bf16.gmra.mxu1 %v7010_v17  ;;  %v1249_v49 = vadd.f32 %v1247_v37, %v7775_v47 }
 0x1e4   : > { %v1352_v50 = vadd.f32 %v1349_v52, %v7783_v55 }
 0x1e5   : > { %6592 = vmatpush3.bf16.msra.mxu0 %v7018_v25  ;;  %6628 = vmatpush3.bf16.msra.mxu1 %v7024_v16 }
 0x1e6   : > { %v1299_v34 = vpop.permute.xlu1 %1298  ;;  %6593 = vmatprep.subr.bf16.mxu0 %v7021_v33  ;;  %6629 = vmatprep.subr.bf16.mxu1 %v7026_v2 }
 0x1e7   : > { %v1199_v62 = vpop.permute.xlu0 %1198  ;;  %v1301_v57 = vadd.f32 %v1299_v34, %v7789_v58 }
 0x1e8   : > { %v1202_v10 = vadd.f32 %v1199_v62, %v1196_v5 }
 0x1e9   : > { %6594 = vmatpush3.bf16.msra.mxu0 %v7021_v33  ;;  %6630 = vmatpush3.bf16.msra.mxu1 %v7026_v2 }
 0x1ea   : > { %v5935_v42 = vpack.c.bf16 %v1203_v41, %v1202_v10  ;;  %v1253_v23 = vpop.permute.xlu1 %1252  ;;  %6595 = vmatprep.subr.bf16.mxu0 %v7023_v45  ;;  %6631 = vmatprep.subr.bf16.mxu1 %v7029_v31 }
 0x1eb   : > { %v1251_v63 = vpop.permute.xlu0 %1250  ;;  %v1255_v6 = vadd.f32 %v1253_v23, %v1249_v49 }
 0x1ec   : > { %6211 = vst [vmem:[#allocation2 + $0x28] sm:$0xff] %v5935_v42   ;;  %v1254_v12 = vadd.f32 %v1251_v63, %v1248_v27 }
 0x1ed   : > { %6596 = vmatpush3.bf16.msra.mxu0 %v7023_v45  ;;  %6632 = vmatpush3.bf16.msra.mxu1 %v7029_v31 }
 0x1ee   : > { %v5944_v15 = vpack.c.bf16 %v1255_v6, %v1254_v12  ;;  %v1305_v47 = vpop.permute.xlu1 %1304  ;;  %6597 = vmatprep.subr.bf16.mxu0 %v7025_v54  ;;  %6633 = vmatprep.subr.bf16.mxu1 %v7032_v53 }
 0x1ef   : > { %v1303_v19 = vpop.permute.xlu0 %1302  ;;  %v1307_v0 = vadd.f32 %v1305_v47, %v1301_v57 }
 0x1f0   : > { %6213 = vst [vmem:[#allocation2 + $0x30] sm:$0xff] %v5944_v15   ;;  %v1306_v40 = vadd.f32 %v1303_v19, %v1300_v11 }
 0x1f1   : > { %6598 = vmatpush3.bf16.msra.mxu0 %v7025_v54  ;;  %6634 = vmatpush3.bf16.msra.mxu1 %v7032_v53 }
 0x1f2   : > { %v5953_v3 = vpack.c.bf16 %v1307_v0, %v1306_v40  ;;  %v1351_v61 = vpop.permute.xlu1 %1350  ;;  %6599 = vmatprep.subr.bf16.mxu0 %v7027_v51  ;;  %6683 = vmatprep.subr.bf16.mxu1 %v8070_v7  ;;  %v7030_v0 = vld [vmem:[#allocation2 + $0x18] sm:$0xff]  }
 0x1f3   : > { %v1355_v58 = vpop.permute.xlu0 %1354  ;;  %v7011_v28 = vld [vmem:[#allocation2 + $0x28] sm:$0xff]   ;;  %v1353_v60 = vadd.f32 %v1351_v61, %v7831_v39 }
 0x1f4   : > { %6215 = vst [vmem:[#allocation2 + $0x38] sm:$0xff] %v5953_v3   ;;  %6544 = vmatmul.mubr.bf16.gmra.mxu0 %v7011_v28  ;;  %6579 = vmatprep.mubr.bf16.mxu1 %v7011_v28  ;;  %v1358_v32 = vadd.f32 %v1355_v58, %v1352_v50  ;;  %v7034_v50 = vld [vmem:[#allocation2 + $0x20] sm:$0xff]  }
 0x1f5   : > { %6600 = vmatpush3.bf16.msra.mxu0 %v7027_v51 }
 0x1f6   : > { %v1357_v9 = vpop.permute.xlu1 %1356  ;;  %6601 = vmatprep.subr.bf16.mxu0 %v7031_v48 }
 0x1f7   : > { %v1359_v35 = vadd.f32 %v1357_v9, %v1353_v60  ;;  %v1401_v25 = vpop.permute.xlu0 %1400  ;;  %v7012_v16 = vld [vmem:[#allocation2 + $0x30] sm:$0xff]  }
 0x1f8   : > { %6547 = vmatprep.mubr.bf16.mxu0 %v7012_v16  ;;  %6580 = vmatmul.mubr.bf16.gmra.mxu1 %v7012_v16  ;;  %v1404_v34 = vadd.f32 %v1401_v25, %v7868_v44  ;;  %v7038_v60 = vld [vmem:[#allocation10 + $0x30] sm:$0xff]   ;;  %v7041_v16 = vld [vmem:[#allocation10 + $0x28] sm:$0xff]  }
 0x1f9   : > { %v5962_v33 = vpack.c.bf16 %v1359_v35, %v1358_v32  ;;  %6602 = vmatpush3.bf16.msra.mxu0 %v7031_v48  ;;  %v7054_v9 = vld [vmem:[#allocation10 + $0xb0] sm:$0xff]   ;;  %v7037_v32 = vld [vmem:[#allocation2 + $0x28] sm:$0xff]  }
 0x1fa   : > { %v1403_v37 = vpop.permute.xlu1 %1402  ;;  %6651 = vmatprep.subr.bf16.mxu0 %v8075_v8 }
 0x1fb   : > { %6217 = vst [vmem:[#allocation2 + $0x40] sm:$0xff] %v5962_v33   ;;  %v1453_v55 = vpop.permute.xlu0 %1452  ;;  %v7014_v17 = vld [vmem:[#allocation2 + $0x38] sm:$0xff]   ;;  %v1405_v62 = vadd.f32 %v1403_v37, %v7879_v1  ;;  %v7056_v33 = vld [vmem:[#allocation10 + $0xa8] sm:$0xff]   ;;  %v7043_v37 = vld [vmem:[#allocation10 + $0x20] sm:$0xff]  }
 0x1fc   : > { %6548 = vmatmul.mubr.bf16.gmra.mxu0 %v7014_v17  ;;  %6583 = vmatprep.mubr.bf16.mxu1 %v7014_v17  ;;  %v1456_v27 = vadd.f32 %v1453_v55, %v7892_v26 }
 0x1fe   : > { %v1409_v39 = vpop.permute.xlu1 %1408 }
 0x1ff   : > { %v1505_v52 = vpop.permute.xlu0 %1504  ;;  %v1411_v41 = vadd.f32 %v1409_v39, %v1405_v62 }
 0x200   : > { %v1508_v44 = vadd.f32 %v1505_v52, %v7904_v13  ;;  %v7039_v52 = vld [vmem:[#allocation2 + $0x30] sm:$0xff]  }
 0x202   : > { %v1455_v2 = vpop.permute.xlu1 %1454  ;;  %v7019_v5 = vld [vmem:[#allocation2 + $0x40] sm:$0xff]  }
 0x203   : > { %v1557_v36 = vpop.permute.xlu0 %1556  ;;  %6551 = vmatprep.mubr.bf16.mxu0 %v7019_v5  ;;  %6584 = vmatmul.mubr.bf16.gmra.mxu1 %v7019_v5  ;;  %v1457_v49 = vadd.f32 %v1455_v2, %v7907_v14  ;;  %v7058_v2 = vld [vmem:[#allocation10 + $0xa0] sm:$0xff]  }
 0x204   : > { %v1560_v51 = vadd.f32 %v1557_v36, %v7911_v24  ;;  %v7045_v36 = vld [vmem:[#allocation10 + $0x18] sm:$0xff]  }
 0x206   : > { %v1507_v45 = vpop.permute.xlu1 %1506 }
 0x207   : > { %v1407_v31 = vpop.permute.xlu0 %1406  ;;  %v1509_v53 = vadd.f32 %v1507_v45, %v7917_v30 }
 0x208   : > { %v1410_v10 = vadd.f32 %v1407_v31, %v1404_v34  ;;  %v7059_v34 = vld [vmem:[#allocation10 + $0x98] sm:$0xff]  }
 0x20a   : > { %v5971_v42 = vpack.c.bf16 %v1411_v41, %v1410_v10  ;;  %v1461_v23 = vpop.permute.xlu1 %1460  ;;  %v7044_v10 = vld [vmem:[#allocation2 + $0x40] sm:$0xff]  }
 0x20b   : > { %v1459_v63 = vpop.permute.xlu0 %1458  ;;  %v1463_v6 = vadd.f32 %v1461_v23, %v1457_v49  ;;  %v7047_v49 = vld [vmem:[#allocation10 + $0x10] sm:$0xff]  }
 0x20c   : > { %6219 = vst [vmem:[#allocation2 + $0x48] sm:$0xff] %v5971_v42   ;;  %v1462_v54 = vadd.f32 %v1459_v63, %v1456_v27  ;;  %v7061_v63 = vld [vmem:[#allocation10 + $0x90] sm:$0xff]  }
 0x20e   : > { %v5980_v12 = vpack.c.bf16 %v1463_v6, %v1462_v54  ;;  %v1513_v1 = vpop.permute.xlu1 %1512 }
 0x20f   : > { %v1511_v57 = vpop.permute.xlu0 %1510  ;;  %v1515_v11 = vadd.f32 %v1513_v1, %v1509_v53 }
 0x210   : > { %6221 = vst [vmem:[#allocation2 + $0x50] sm:$0xff] %v5980_v12   ;;  %v1514_v15 = vadd.f32 %v1511_v57, %v1508_v44  ;;  %v7049_v12 = vld [vmem:[#allocation10 + $0x8] sm:$0xff]  }
 0x211   : > { %v7063_v57 = vld [vmem:[#allocation10 + $0x88] sm:$0xff]  }
 0x212   : > { %v5989_v47 = vpack.c.bf16 %v1515_v11, %v1514_v15  ;;  %v1559_v14 = vpop.permute.xlu1 %1558 }
 0x213   : > { %v1563_v19 = vpop.permute.xlu0 %1562  ;;  %v7028_v26 = vld [vmem:[#allocation2 + $0x48] sm:$0xff]   ;;  %v1561_v40 = vadd.f32 %v1559_v14, %v7941_v22 }
 0x214   : > { %6223 = vst [vmem:[#allocation2 + $0x58] sm:$0xff] %v5989_v47   ;;  %6552 = vmatmul.mubr.bf16.gmra.mxu0 %v7028_v26  ;;  %v1566_v13 = vadd.f32 %v1563_v19, %v1560_v51  ;;  %v7046_v23 = vld [vmem:[#allocation2 + $0x48] sm:$0xff]   ;;  %v7053_v26 = vld [vmem:[#allocation10] sm:$0xff]  }
 0x215   : > { %6603 = vmatprep.mubr.bf16.mxu0 %v7030_v0  ;;  %v7051_v51 = vld [vmem:[#allocation2 + $0x48] sm:$0xff]  }
 0x216   : > { %v1565_v30 = vpop.permute.xlu1 %1564 }
 0x217   : > { %v8086_v3 = vpop.permute.xlu0 %1808  ;;  %v1567_v61 = vadd.f32 %v1565_v30, %v1561_v40  ;;  %v8088_v48 = vld [vmem:[#allocation2 + $0x50] sm:$0xff]   ;;  %v7065_v40 = vld [vmem:[#allocation10 + $0x80] sm:$0xff]  }
 0x218   : > { %6635 = vmatprep.mubr.bf16.mxu1 %v8088_v48  ;;  %v7048_v19 = vld [vmem:[#allocation2 + $0x50] sm:$0xff]  }
 0x219   : > { %v5998_v58 = vpack.c.bf16 %v1567_v61, %v1566_v13 }
 0x21a   : > { %v8091_v28 = vpop.permute.xlu1 %1810 }
 0x21b   : > { %6225 = vst [vmem:[#allocation2 + $0x60] sm:$0xff] %v5998_v58   ;;  %v1609_v24 = vpop.permute.xlu0 %1608  ;;  %v8093_v22 = vld [vmem:[#allocation2 + $0x58] sm:$0xff]  }
 0x21c   : > { %6604 = vmatmul.mubr.bf16.vlgmr.msra.gmra.mxu0 %v7034_v50  ;;  %6636 = vmatmul.mubr.bf16.vlgmr.msra.gmra.mxu1 %v8093_v22  ;;  %v1612_v62 = vadd.f32 %v1609_v24, %v7970_v46 }
 0x21d   : > { %6607 = vmatprep.mubr.bf16.mxu0 %v7037_v32  ;;  %6652 = vmatpush3.bf16.msra.mxu0 %v8075_v8  ;;  %v7042_v8 = vld [vmem:[#allocation2 + $0x38] sm:$0xff]  }
 0x21e   : > { %v1611_v35 = vpop.permute.xlu1 %1610  ;;  %6653 = vmatprep.subr.bf16.mxu0 %v7038_v60  ;;  %6684 = vmatpush3.bf16.msra.mxu1 %v8070_v7 }
 0x21f   : > { %v1661_v25 = vpop.permute.xlu0 %1660  ;;  %6685 = vmatprep.subr.bf16.mxu1 %v7054_v9  ;;  %v1613_v45 = vadd.f32 %v1611_v35, %v7976_v43  ;;  %v1812_v35 = vadd.f32 %v8086_v3, %v7951_v18  ;;  %v7064_v3 = vld [vmem:[#allocation2 + $0x58] sm:$0xff]  }
 0x220   : > { %v1664_v54 = vadd.f32 %v1661_v25, %v7982_v59  ;;  %v1813_v25 = vadd.f32 %v8091_v28, %v7962_v38 }
 0x221   : > { %6654 = vmatpush3.bf16.msra.mxu0 %v7038_v60 }
 0x222   : > { %v1617_v55 = vpop.permute.xlu1 %1616  ;;  %v8098_v17 = vld [vmem:[#allocation2 + $0x60] sm:$0xff]   ;;  %6655 = vmatprep.subr.bf16.mxu0 %v7041_v16  ;;  %6686 = vmatpush3.bf16.msra.mxu1 %v7054_v9 }
 0x223   : > { %v1713_v39 = vpop.permute.xlu0 %1712  ;;  %6639 = vmatprep.mubr.bf16.mxu1 %v8098_v17  ;;  %6687 = vmatprep.subr.bf16.mxu1 %v7056_v33  ;;  %v1619_v27 = vadd.f32 %v1617_v55, %v1613_v45 }
 0x224   : > { %6608 = vmatmul.mubr.bf16.gmra.mxu0 %v7039_v52 }
 0x225   : > { %6611 = vmatprep.mubr.bf16.mxu0 %v7042_v8  ;;  %6656 = vmatpush3.bf16.msra.mxu0 %v7041_v16  ;;  %v7072_v8 = vld [vmem:[#allocation2 + $0x90] sm:$0xff]  }
 0x226   : > { %v1663_v7 = vpop.permute.xlu1 %1662  ;;  %6657 = vmatprep.subr.bf16.mxu0 %v7043_v37  ;;  %6688 = vmatpush3.bf16.msra.mxu1 %v7056_v33 }
 0x227   : > { %v8101_v5 = vpop.permute.xlu0 %1764  ;;  %6689 = vmatprep.subr.bf16.mxu1 %v7058_v2  ;;  %v1665_v6 = vadd.f32 %v1663_v7, %v7997_v4  ;;  %v1716_v4 = vadd.f32 %v1713_v39, %v7988_v56 }
 0x228   : > { %v1768_v61 = vadd.f32 %v8101_v5, %v8002_v20 }
 0x229   : > { %6658 = vmatpush3.bf16.msra.mxu0 %v7043_v37 }
 0x22a   : > { %v1715_v31 = vpop.permute.xlu1 %1714  ;;  %6659 = vmatprep.subr.bf16.mxu0 %v7045_v36  ;;  %6690 = vmatpush3.bf16.msra.mxu1 %v7058_v2 }
 0x22b   : > { %v1615_v41 = vpop.permute.xlu0 %1614  ;;  %6691 = vmatprep.subr.bf16.mxu1 %v7059_v34  ;;  %v1717_v11 = vadd.f32 %v1715_v31, %v8009_v29 }
 0x22c   : > { %v1618_v42 = vadd.f32 %v1615_v41, %v1612_v62  ;;  %6612 = vmatmul.mubr.bf16.gmra.mxu0 %v7044_v10 }
 0x22d   : > { %6615 = vmatprep.mubr.bf16.mxu0 %v7046_v23  ;;  %6660 = vmatpush3.bf16.msra.mxu0 %v7045_v36 }
 0x22e   : > { %v6007_v46 = vpack.c.bf16 %v1619_v27, %v1618_v42  ;;  %v1669_v43 = vpop.permute.xlu1 %1668  ;;  %6661 = vmatprep.subr.bf16.mxu0 %v7047_v49  ;;  %6692 = vmatpush3.bf16.msra.mxu1 %v7059_v34 }
 0x22f   : > { %v1667_v53 = vpop.permute.xlu0 %1666  ;;  %v1671_v44 = vadd.f32 %v1669_v43, %v1665_v6  ;;  %6693 = vmatprep.subr.bf16.mxu1 %v7061_v63 }
 0x230   : > { %6227 = vst [vmem:[#allocation2 + $0x68] sm:$0xff] %v6007_v46   ;;  %v1670_v1 = vadd.f32 %v1667_v53, %v1664_v54 }
 0x231   : > { %6662 = vmatpush3.bf16.msra.mxu0 %v7047_v49 }
 0x232   : > { %v6016_v15 = vpack.c.bf16 %v1671_v44, %v1670_v1  ;;  %v1721_v59 = vpop.permute.xlu1 %1720  ;;  %6663 = vmatprep.subr.bf16.mxu0 %v7049_v12  ;;  %6694 = vmatpush3.bf16.msra.mxu1 %v7061_v63  ;;  %v7073_v1 = vld [vmem:[#allocation11 + $0x38] sm:$0xff]  }
 0x233   : > { %v1719_v47 = vpop.permute.xlu0 %1718  ;;  %v1723_v14 = vadd.f32 %v1721_v59, %v1717_v11  ;;  %6695 = vmatprep.subr.bf16.mxu1 %v7063_v57  ;;  %v7075_v59 = vld [vmem:[#allocation11 + $0x78] sm:$0xff]  }
 0x234   : > { %6229 = vst [vmem:[#allocation2 + $0x70] sm:$0xff] %v6016_v15   ;;  %v1722_v0 = vadd.f32 %v1719_v47, %v1716_v4  ;;  %6616 = vmatmul.mubr.bf16.gmra.mxu0 %v7048_v19  ;;  %v7074_v15 = vld [vmem:[#allocation11 + $0x30] sm:$0xff]  }
 0x235   : > { %6664 = vmatpush3.bf16.msra.mxu0 %v7049_v12  ;;  %6667 = vmatprep.mubr.bf16.mxu0 %v7051_v51  ;;  %v7076_v51 = vld [vmem:[#allocation11 + $0x28] sm:$0xff]  }
 0x236   : > { %v6025_v30 = vpack.c.bf16 %v1723_v14, %v1722_v0  ;;  %v1767_v29 = vpop.permute.xlu1 %1766  ;;  %6665 = vmatprep.subr.bf16.mxu0 %v7053_v26  ;;  %6696 = vmatpush3.bf16.msra.mxu1 %v7063_v57  ;;  %v367_v14 = vlaneseq }
 0x237   : > { %v1771_v56 = vpop.permute.xlu0 %1770  ;;  %v7052_v13 = vld [vmem:[#allocation2 + $0x68] sm:$0xff]   ;;  %6697 = vmatprep.subr.bf16.mxu1 %v7065_v40  ;;  %v1769_v58 = vadd.f32 %v1767_v29, %v8029_v21 }
 0x238   : > { %6231 = vst [vmem:[#allocation2 + $0x78] sm:$0xff] %v6025_v30   ;;  %6640 = vmatmul.mubr.bf16.gmra.mxu1 %v7052_v13  ;;  %v1774_v60 = vadd.f32 %v1771_v56, %v1768_v61  ;;  %v7067_v28 = vld [vmem:[#allocation2 + $0x68] sm:$0xff]   ;;  %v8161_v29 = vshrl.u32 %v367_v14, 7  ;;  %v7077_v56 = vld [vmem:[#allocation11 + $0x70] sm:$0xff]   ;;  %v8166_v61 = vld [vmem:[%s8948_s4] ss:$0 sm:$0xff] }
 0x239   : > { %6666 = vmatpush3.bf16.msra.mxu0 %v7053_v26 }
 0x23a   : > { %v1773_v50 = vpop.permute.xlu1 %1772  ;;  %6698 = vmatpush3.bf16.msra.mxu1 %v7065_v40  ;;  %6715 = vmatprep.subr.bf16.mxu0 %v7075_v59 }
 0x23b   : > { %v1775_v9 = vadd.f32 %v1773_v50, %v1769_v58  ;;  %v7055_v24 = vld [vmem:[#allocation2 + $0x70] sm:$0xff]   ;;  %v1815_v32 = vpop.permute.xlu0 %1814  ;;  %6747 = vmatprep.subr.bf16.mxu1 %v7073_v1 }
 0x23c   : > { %6643 = vmatprep.mubr.bf16.mxu1 %v7055_v24  ;;  %6668 = vmatmul.mubr.bf16.vlgmr.msra.gmra.mxu0 %v8088_v48  ;;  %v1818_v21 = vadd.f32 %v1815_v32, %v1812_v35  ;;  %v7066_v48 = vld [vmem:[#allocation2 + $0x60] sm:$0xff]   ;;  %v7079_v32 = vld [vmem:[#allocation11 + $0x68] sm:$0xff]  }
 0x23d   : > { %v6034_v16 = vpack.c.bf16 %v1775_v9, %v1774_v60  ;;  %6671 = vmatprep.mubr.bf16.mxu0 %v8093_v22  ;;  %v7068_v22 = vld [vmem:[#allocation2 + $0x70] sm:$0xff]   ;;  %6716 = vmatpush3.bf16.msra.mxu0 %v7075_v59 }
 0x23e   : > { %v1817_v20 = vpop.permute.xlu1 %1816  ;;  %6717 = vmatprep.subr.bf16.mxu0 %v7077_v56 }
 0x23f   : > { %6233 = vst [vmem:[#allocation2 + $0x80] sm:$0xff] %v6034_v16   ;;  %v1819_v33 = vadd.f32 %v1817_v20, %v1813_v25  ;;  %v7057_v37 = vld [vmem:[#allocation2 + $0x78] sm:$0xff]   ;;  %v388_v20 = vand.u32 15, %v8161_v29 }
 0x240   : > { %6644 = vmatmul.mubr.bf16.gmra.mxu1 %v7057_v37  ;;  %v7069_v39 = vld [vmem:[#allocation2 + $0x78] sm:$0xff]  }
 0x241   : > { %v6043_v55 = vpack.c.bf16 %v1819_v33, %v1818_v21  ;;  %6718 = vmatpush3.bf16.msra.mxu0 %v7077_v56  ;;  %vm8180_vm5 = vcmp.ne.s32.totalorder %v388_v20, 0 }
 0x242   : > { %6719 = vmatprep.subr.bf16.mxu0 %v7079_v32 }
 0x243   : > { %6235 = vst [vmem:[#allocation2 + $0x88] sm:$0xff] %v6043_v55  }
 0x244   : > { %6672 = vmatmul.mubr.bf16.gmra.mxu0 %v8098_v17 }
 0x245   : > { %6675 = vmatprep.mubr.bf16.mxu0 %v7052_v13  ;;  %6720 = vmatpush3.bf16.msra.mxu0 %v7079_v32 }
 0x246   : > { %v7060_v18 = vld [vmem:[#allocation2 + $0x80] sm:$0xff]  }
 0x247   : > { %6647 = vmatprep.mubr.bf16.mxu1 %v7060_v18  ;;  %v7070_v52 = vld [vmem:[#allocation2 + $0x80] sm:$0xff]  }
 0x24a   : > { %v7062_v38 = vld [vmem:[#allocation2 + $0x88] sm:$0xff]  }
 0x24b   : > { %6648 = vmatmul.mubr.bf16.gmra.mxu1 %v7062_v38  ;;  %v7071_v17 = vld [vmem:[#allocation2 + $0x88] sm:$0xff]  }
 0x24c   : > { %6676 = vmatmul.mubr.bf16.gmra.mxu0 %v7055_v24  ;;  %6699 = vmatprep.mubr.bf16.mxu1 %v7064_v3  ;;  %v7078_v24 = vld [vmem:[#allocation11 + $0x20] sm:$0xff]  }
 0x24d   : > { %6679 = vmatprep.mubr.bf16.mxu0 %v7057_v37 }
 0x253   : > { %6700 = vmatmul.mubr.bf16.vlgmr.msra.gmra.mxu1 %v7066_v48  ;;  %v7080_v48 = vld [vmem:[#allocation11 + $0x18] sm:$0xff]  }
 0x254   : > { %6680 = vmatmul.mubr.bf16.gmra.mxu0 %v7060_v18  ;;  %6703 = vmatprep.mubr.bf16.mxu1 %v7067_v28 }
 0x255   : > { %6748 = vmatpush3.bf16.msra.mxu1 %v7073_v1 }
 0x256   : > { %6749 = vmatprep.subr.bf16.mxu1 %v7074_v15 }
 0x259   : > { %6750 = vmatpush3.bf16.msra.mxu1 %v7074_v15 }
 0x25a   : > { %6751 = vmatprep.subr.bf16.mxu1 %v7076_v51 }
 0x25b   : > { %6704 = vmatmul.mubr.bf16.gmra.mxu1 %v7068_v22 }
 0x25c   : > { %6707 = vmatprep.mubr.bf16.mxu1 %v7069_v39 }
 0x25d   : > { %6752 = vmatpush3.bf16.msra.mxu1 %v7076_v51 }
 0x25e   : > { %6753 = vmatprep.subr.bf16.mxu1 %v7078_v24 }
 0x261   : > { %6754 = vmatpush3.bf16.msra.mxu1 %v7078_v24  ;;  %v7083_v24 = vld [vmem:[#allocation11 + $0x58] sm:$0xff]  }
 0x262   : > { %6755 = vmatprep.subr.bf16.mxu1 %v7080_v48 }
 0x263   : > { %6708 = vmatmul.mubr.bf16.gmra.mxu1 %v7070_v52 }
 0x264   : > { %6711 = vmatprep.mubr.bf16.mxu1 %v7071_v17  ;;  %v7081_v17 = vld [vmem:[#allocation11 + $0x60] sm:$0xff]  }
 0x265   : > { %6721 = vmatprep.subr.bf16.mxu0 %v7081_v17  ;;  %6756 = vmatpush3.bf16.msra.mxu1 %v7080_v48 }
 0x266   : > { %6722 = vmatpush3.bf16.msra.mxu0 %v7081_v17  ;;  %v7084_v17 = vld [vmem:[#allocation11 + $0x8] sm:$0xff]  }
 0x267   : > { %6723 = vmatprep.subr.bf16.mxu0 %v7083_v24 }
 0x26a   : > { %6724 = vmatpush3.bf16.msra.mxu0 %v7083_v24 }
 0x26b   : > { %6712 = vmatmul.mubr.bf16.gmra.mxu1 %v7072_v8 }
 0x294   : > { %v6573_v36 = vpop.f32.mrf.mxu1 }
 0x296   : > { %v2163_v62 = vpop.f32.mrf.mxu1 }
 0x298   : > { %v6574_v31 = vpop.f32.mrf.mxu1 }
 0x29a   : > { %v2166_v10 = vpop.f32.mrf.mxu1 }
 0x29c   : > { %v6541_v2 = vpop.f32.mrf.mxu0 }
 0x29d   : > { %v2172_v0 = vadd.f32 %v6573_v36, %v6541_v2 }
 0x29e   : > { %v2012_v7 = vpop.f32.mrf.mxu0 }
 0x29f   : > { %v2164_v13 = vadd.f32 %v2163_v62, %v2012_v7  ;;  %v370_v62 = vadd.s32 16, %v8161_v29 }
 0x2a0   : > { %v6542_v5 = vpop.f32.mrf.mxu0 }
 0x2a1   : > { %v2175_v60 = vadd.f32 %v6574_v31, %v6542_v5 }
 0x2a2   : > { %v2015_v34 = vpop.f32.mrf.mxu0 }
 0x2a3   : > { %v8125_v27 = vpop.f32.mrf.mxu1  ;;  %v2167_v21 = vadd.f32 %v2166_v10, %v2015_v34  ;;  %v369_v34 = vadd.s32 8, %v8161_v29 }
 0x2a5   : > { %v8129_v23 = vpop.f32.mrf.mxu1  ;;  %v395_v32 = vand.u32 15, %v369_v34 }
 0x2a7   : > { %v8133_v6 = vpop.f32.mrf.mxu1  ;;  %vm8235_vm6 = vcmp.ne.s32.totalorder %v395_v32, 15 }
 0x2a9   : > { %v8137_v46 = vpop.f32.mrf.mxu1 }
 0x2b4   : > { %v8119_v45 = vpop.f32.mrf.mxu0 }
 0x2b6   : > { %v8121_v41 = vpop.f32.mrf.mxu0 }
 0x2b7   : > { %v2180_v8 = vadd.f32 %v8129_v23, %v8121_v41 }
 0x2b8   : > { %v8123_v49 = vpop.f32.mrf.mxu0  ;;  %v8139_v43 = vpop.f32.mrf.mxu1 }
 0x2b9   : > { %v2191_v31 = vadd.f32 %v8133_v6, %v8123_v49  ;;  %v2188_v49 = vadd.f32 %v8125_v27, %v8119_v45 }
 0x2ba   : > { %v8127_v42 = vpop.f32.mrf.mxu0  ;;  %v8143_v44 = vpop.f32.mrf.mxu1 }
 0x2bc   : > { %v8131_v63 = vpop.f32.mrf.mxu0  ;;  %v8149_v11 = vpop.f32.mrf.mxu1 }
 0x2be   : > { %v8135_v54 = vpop.f32.mrf.mxu0  ;;  %v8155_v19 = vpop.f32.mrf.mxu1 }
 0x2c0   : > { %v8141_v53 = vpop.f32.mrf.mxu0 }
 0x2c2   : > { %v8145_v12 = vpop.f32.mrf.mxu0 }
 0x2c3   : > { %v8159_v40 = vpop.f32.mrf.mxu1 }
 0x2c5   : > { %v8168_v35 = vpop.f32.mrf.mxu1 }
 0x2c7   : > { %v8176_v28 = vpop.f32.mrf.mxu1 }
 0x2c9   : > { %v8197_v1 = vpop.f32.mrf.mxu1 }
 0x2d4   : > { %v8147_v57 = vpop.f32.mrf.mxu0 }
 0x2d6   : > { %v8151_v4 = vpop.f32.mrf.mxu0 }
 0x2d8   : > { %v8153_v47 = vpop.f32.mrf.mxu0 }
 0x2da   : > { %v8157_v26 = vpop.f32.mrf.mxu0 }
 0x2dc   : > { %v6605_v30 = vpop.f32.mrf.mxu0 }
 0x2dd   : > { %v2454_v58 = vadd.f32 %v6605_v30, %v2172_v0  ;;  %v8208_v30 = vpop.f32.mrf.mxu1 }
 0x2de   : > { %v2389_v50 = vpop.f32.mrf.mxu0 }
 0x2df   : > { %v2452_v9 = vadd.f32 %v2389_v50, %v2164_v13  ;;  %v2476_v25 = vadd.f32 %v8166_v61, %v2454_v58 }
 0x2e0   : > { %v6606_v16 = vpop.f32.mrf.mxu0 }
 0x2e1   : > { %v2474_v33 = vadd.f32 %v8166_v61, %v2452_v9  ;;  %v2455_v37 = vadd.f32 %v6606_v16, %v2175_v60  ;;  %v8178_v22 = vmax.f32 %v2476_v25, 0.0  ;;  %v7082_v9 = vld [vmem:[#allocation11 + $0x10] sm:$0xff]   ;;  %v371_v25 = vadd.s32 24, %v8161_v29 }
 0x2e2   : > { %v2392_v55 = vpop.f32.mrf.mxu0  ;;  %v2183_v16 = vadd.f32 %v8137_v46, %v8127_v42  ;;  %6757 = vmatprep.subr.bf16.mxu1 %v7082_v9 }
 0x2e3   : > { %v8173_v18 = vmax.f32 %v2474_v33, 0.0  ;;  %v2477_v38 = vadd.f32 %v8166_v61, %v2455_v37  ;;  %v2453_v3 = vadd.f32 %v2392_v55, %v2167_v21  ;;  %v2525_v14 = vrot.slane %v8178_v22, 7  ;;  %6758 = vmatpush3.bf16.msra.mxu1 %v7082_v9 }
 0x2e4   : > { %v6609_v39 = vpop.f32.mrf.mxu0  ;;  %v2573_v50 = vrot.slane %v8178_v22, 1  ;;  %v402_v37 = vand.u32 15, %v370_v62  ;;  %v372_v55 = vadd.s32 32, %v8161_v29  ;;  %v409_v34 = vand.u32 15, %v371_v25  ;;  %6759 = vmatprep.subr.bf16.mxu1 %v7084_v17  ;;  %v7090_v25 = vld [vmem:[#allocation11 + $0x40] sm:$0xff]  }
 0x2e5   : > { %v8186_v2 = vmax.f32 %v2477_v38, 0.0  ;;  %v2475_v7 = vadd.f32 %v8166_v61, %v2453_v3  ;;  %v2522_v5 = vrot.slane %v8173_v18, 7  ;;  %v2458_v20 = vadd.f32 %v6609_v39, %v2188_v49  ;;  %v8229_v38 = vpop.f32.mrf.mxu1 }
 0x2e6   : > { %v2405_v36 = vpop.f32.mrf.mxu0  ;;  %v2570_v39 = vrot.slane %v8173_v18, 1  ;;  %vm8243_vm7 = vcmp.ne.s32.totalorder %v402_v37, 0  ;;  %vm8260_vm8 = vcmp.ne.s32.totalorder %v409_v34, 15  ;;  %v2204_v34 = vadd.f32 %v8139_v43, %v8131_v63 }
 0x2e7   : > { %v8194_v10 = vmax.f32 %v2475_v7, 0.0  ;;  %v2456_v41 = vadd.f32 %v2405_v36, %v2180_v8  ;;  %v2569_v23 = vsel %vm8969_vm3, 0.0, %v2522_v5  ;;  %v2527_v0 = vrot.slane %v8186_v2, 7  ;;  %v7085_v8 = vld [vmem:[#allocation11 + $0x50] sm:$0xff]   ;;  %6760 = vmatpush3.bf16.msra.mxu1 %v7084_v17 }
 0x2e8   : > { %v6610_v15 = vpop.f32.mrf.mxu0  ;;  %v2650_v59 = vsel %vm8180_vm5, %v2569_v23, 0.0  ;;  %v2575_v51 = vrot.slane %v8186_v2, 1  ;;  %6725 = vmatprep.subr.bf16.mxu0 %v7085_v8 }
 0x2e9   : > { %v2478_v6 = vadd.f32 %v8166_v61, %v2456_v41  ;;  %2714 = vrot.lane.b32.xlu0 %v2650_v59, %s7352_s19  ;;  %v2459_v56 = vadd.f32 %v6610_v15, %v2191_v31  ;;  %v2528_v58 = vsel %vm8969_vm3, %v2525_v14, %v2527_v0  ;;  %v2523_v60 = vrot.slane %v8194_v10, 7  ;;  %v7086_v31 = vld [vmem:[#allocation11] sm:$0xff]   ;;  %v7087_v41 = vld [vmem:[#allocation11 + $0x48] sm:$0xff]   ;;  %6726 = vmatpush3.bf16.msra.mxu0 %v7085_v8 }
 0x2ea   : > { %v2408_v13 = vpop.f32.mrf.mxu0  ;;  %2720 = vrot.lane.b32.xlu1 %v2528_v58, %s7352_s19  ;;  %v2571_v27 = vrot.slane %v8194_v10, 1  ;;  %v2576_v33 = vsel %vm8971_vm4, %v2573_v50, %v2575_v51  ;;  %v2196_v59 = vadd.f32 %v8143_v44, %v8135_v54  ;;  %6761 = vmatprep.subr.bf16.mxu1 %v7086_v31  ;;  %v7088_v54 = vld [vmem:[#allocation3 + $0x8] sm:$0xff]  }
 0x2eb   : > { %v8215_v45 = vmax.f32 %v2478_v6, 0.0  ;;  %v2481_v42 = vadd.f32 %v8166_v61, %v2459_v56  ;;  %v2457_v46 = vadd.f32 %v2408_v13, %v2183_v16  ;;  %v2524_v48 = vsel %vm8969_vm3, %v2522_v5, %v2523_v60  ;;  %v8252_v13 = vpop.f32.mrf.mxu1  ;;  %6727 = vmatprep.subr.bf16.mxu0 %v7087_v41  ;;  %6763 = vmatprep.mubr.bf16.mxu1 %v7088_v54 }
 0x2ec   : > { %v8222_v21 = vpop.f32.mrf.mxu0  ;;  %v2574_v36 = vsel %vm8971_vm4, %v2571_v27, %v2573_v50  ;;  %v2480_v5 = vadd.f32 %v8166_v61, %v2458_v20  ;;  %v2572_v23 = vsel %vm8971_vm4, %v2570_v39, %v2571_v27  ;;  %v2526_v49 = vsel %vm8969_vm3, %v2523_v60, %v2525_v14  ;;  %6762 = vmatpush3.bf16.msra.mxu1 %v7086_v31 }
 0x2ed   : > { %2766 = vrot.lane.b32.xlu0 %v2576_v33, %s7353_s5  ;;  %v2577_v62 = vrot.slane %v8215_v45, 1  ;;  %v416_v6 = vand.u32 15, %v372_v55  ;;  %v2529_v56 = vrot.slane %v8215_v45, 7  ;;  %v8254_v58 = vmax.f32 %v2481_v42, 0.0  ;;  %v8283_v20 = vpop.f32.mrf.mxu1  ;;  %6728 = vmatpush3.bf16.msra.mxu0 %v7087_v41 }
 0x2ee   : > { %v2421_v3 = vpop.f32.mrf.mxu0  ;;  %2716 = vrot.lane.b32.xlu1 %v2524_v48, %s7352_s19  ;;  %v2479_v50 = vadd.f32 %v8166_v61, %v2457_v46  ;;  %v2699_v24 = vsel %vm8235_vm6, %v2574_v36, 0.0  ;;  %v8269_v27 = vmax.f32 %v2480_v5, 0.0  ;;  %v2652_v32 = vsel %vm8243_vm7, %v2526_v49, 0.0  ;;  %6729 = vmatprep.subr.bf16.mxu0 %v7090_v25 }
 0x2ef   : > { %v2460_v44 = vadd.f32 %v2421_v3, %v2196_v59  ;;  %v2578_v60 = vsel %vm8971_vm4, %v2575_v51, %v2577_v62  ;;  %vm8274_vm9 = vcmp.ne.s32.totalorder %v416_v6, 0  ;;  %v2530_v51 = vsel %vm8969_vm3, %v2527_v0, %v2529_v56 }
 0x2f0   : > { %v6614_v9 = vpop.f32.mrf.mxu0  ;;  %v8285_v33 = vmax.f32 %v2479_v50, 0.0  ;;  %v2701_v55 = vsel %vm8260_vm8, %v2578_v60, 0.0  ;;  %v2535_v42 = vrot.slane %v8254_v58, 7  ;;  %v373_v3 = vadd.s32 40, %v8161_v29 }
 0x2f1   : > { %2762 = vrot.lane.b32.xlu0 %v2572_v23, %s7353_s5  ;;  %v2482_v46 = vadd.f32 %v8166_v61, %v2460_v44  ;;  %v374_v0 = vadd.s32 48, %v8161_v29  ;;  %v2207_v48 = vadd.f32 %v8149_v11, %v8141_v53  ;;  %v2654_v17 = vsel %vm8274_vm9, %v2530_v51, 0.0  ;;  %6730 = vmatpush3.bf16.msra.mxu0 %v7090_v25 }
 0x2f2   : > { %2764 = vrot.lane.b32.xlu1 %v2699_v24, %s7353_s5  ;;  %v2424_v37 = vpop.f32.mrf.mxu0  ;;  %v2533_v8 = vrot.slane %v8269_v27, 7  ;;  %v2583_v36 = vrot.slane %v8254_v58, 1  ;;  %v2581_v11 = vrot.slane %v8269_v27, 1  ;;  %v2531_v23 = vrot.slane %v8285_v33, 7 }
 0x2f3   : > { %v2463_v31 = vadd.f32 %v6614_v9, %v2207_v48  ;;  %v8314_v59 = vmax.f32 %v2482_v46, 0.0  ;;  %v2579_v63 = vrot.slane %v8285_v33, 1  ;;  %v423_v43 = vand.u32 15, %v373_v3 }
 0x2f4   : > { %v8305_v41 = vpop.f32.mrf.mxu0  ;;  %v2536_v53 = vsel %vm8969_vm3, %v2533_v8, %v2535_v42  ;;  %v375_v49 = vadd.s32 56, %v8161_v29  ;;  %v2199_v6 = vadd.f32 %v8155_v19, %v8145_v12  ;;  %v2462_v50 = vadd.f32 %v8222_v21, %v2204_v34 }
 0x2f5   : > { %2718 = vrot.lane.b32.xlu0 %v2652_v32, %s7352_s19  ;;  %9009 = vst [vmem:[#allocation21_spill] sm:$0xff] %v8314_v59  ;;  %v2584_v24 = vsel %vm8971_vm4, %v2581_v11, %v2583_v36  ;;  %v430_v54 = vand.u32 15, %v374_v0  ;;  %v376_v44 = vadd.s32 64, %v8161_v29  ;;  %v2485_v60 = vadd.f32 %v8166_v61, %v2463_v31 }
 0x2f6   : > { %2768 = vrot.lane.b32.xlu1 %v2701_v55, %s7353_s5  ;;  %v2461_v32 = vadd.f32 %v2424_v37, %v2199_v6  ;;  %v2437_v25 = vpop.f32.mrf.mxu0  ;;  %v2532_v12 = vsel %vm8969_vm3, %v2529_v56, %v2531_v23  ;;  %vm8334_vm10 = vcmp.ne.s32.totalorder %v423_v43, 15  ;;  %v2582_v21 = vsel %vm8971_vm4, %v2579_v63, %v2581_v11 }
 0x2f7   : > { %v437_v55 = vand.u32 15, %v375_v49  ;;  %v8961_v46 = vrot.slane %v8314_v59, 1  ;;  %v2484_v37 = vadd.f32 %v8166_v61, %v2462_v50  ;;  %v2580_v0 = vsel %vm8971_vm4, %v2577_v62, %v2579_v63 }
 0x2f8   : > { %v8296_v39 = vpop.f32.mrf.mxu1  ;;  %vm8346_vm11 = vcmp.ne.s32.totalorder %v430_v54, 0  ;;  %v2212_v48 = vadd.f32 %v8168_v35, %v8151_v4  ;;  %v444_v34 = vand.u32 15, %v376_v44  ;;  %v2537_v31 = vrot.slane %v8314_v59, 7  ;;  %v6618_v43 = vpop.f32.mrf.mxu0 }
 0x2f9   : > { %2722 = vrot.lane.b32.xlu0 %v2654_v17, %s7352_s19  ;;  %v2534_v17 = vsel %vm8969_vm3, %v2531_v23, %v2533_v8  ;;  %v2483_v11 = vadd.f32 %v8166_v61, %v2461_v32  ;;  %v2703_v63 = vsel %vm8334_vm10, %v2582_v21, 0.0  ;;  %vm8363_vm12 = vcmp.ne.s32.totalorder %v437_v55, 15 }
 0x2fa   : > { %v8307_v5 = vpop.f32.mrf.mxu1  ;;  %2728 = vrot.lane.b32.xlu1 %v2536_v53, %s7352_s19  ;;  %v8355_v53 = vmax.f32 %v2485_v60, 0.0  ;;  %v2464_v49 = vadd.f32 %v2437_v25, %v2212_v48  ;;  %v2586_v35 = vsel %vm8971_vm4, %v2583_v36, %v8961_v46  ;;  %v8370_v8 = vmax.f32 %v2484_v37, 0.0  ;;  %v2440_v36 = vpop.f32.mrf.mxu0  ;;  %v8437_v46 = vld [vmem:[#allocation11 + $0xb8] sm:$0xff]  }
 0x2fb   : > { %v2656_v23 = vsel %vm8346_vm11, %v2534_v17, 0.0  ;;  %vm8377_vm13 = vcmp.ne.s32.totalorder %v444_v34, 0  ;;  %v8384_v54 = vmax.f32 %v2483_v11, 0.0  ;;  %v2705_v44 = vsel %vm8363_vm12, %v2586_v35, 0.0  ;;  %6779 = vmatprep.subr.bf16.mxu0 %v8437_v46 }
 0x2fc   : > { %v8322_v9 = vpop.f32.mrf.mxu1  ;;  %9014 = vst [vmem:[#allocation22_spill] sm:$0xff] %v8355_v53  ;;  %9017 = vst [vmem:[#allocation23_spill] sm:$0xff] %v8370_v8  ;;  %v8960_v60 = vrot.slane %v8355_v53, 7  ;;  %v2486_v32 = vadd.f32 %v8166_v61, %v2464_v49  ;;  %v377_v25 = vadd.s32 72, %v8161_v29  ;;  %v2541_v21 = vrot.slane %v8370_v8, 7  ;;  %v8404_v34 = vpop.f32.mrf.mxu0 }
 0x2fd   : > { %2774 = vrot.lane.b32.xlu0 %v2584_v24, %s7353_s5  ;;  %v2538_v24 = vsel %vm8969_vm3, %v2535_v42, %v2537_v31  ;;  %9020 = vst [vmem:[#allocation24_spill] sm:$0xff] %v8384_v54  ;;  %v2591_v55 = vrot.slane %v8355_v53, 1  ;;  %v2220_v37 = vadd.f32 %v8159_v40, %v8147_v57  ;;  %v378_v48 = vadd.s32 80, %v8161_v29 }
 0x2fe   : > { %v8328_v51 = vpop.f32.mrf.mxu1  ;;  %2724 = vrot.lane.b32.xlu1 %v2532_v12, %s7352_s19  ;;  %v2223_v12 = vadd.f32 %v8176_v28, %v8153_v47  ;;  %v2658_v42 = vsel %vm8377_vm13, %v2538_v24, 0.0  ;;  %v2544_v47 = vsel %vm8969_vm3, %v2541_v21, %v8960_v60  ;;  %v2589_v28 = vrot.slane %v8370_v8, 1 }
 0x2ff   : > { %v2539_v11 = vrot.slane %v8384_v54, 7  ;;  %v2587_v40 = vrot.slane %v8384_v54, 1  ;;  %v451_v49 = vand.u32 15, %v377_v25  ;;  %v2466_v35 = vadd.f32 %v8305_v41, %v2220_v37 }
 0x300   : > { %v8341_v3 = vpop.f32.mrf.mxu1  ;;  %v2467_v17 = vadd.f32 %v6618_v43, %v2223_v12  ;;  %v379_v43 = vadd.s32 88, %v8161_v29  ;;  %v2215_v12 = vadd.f32 %v8197_v1, %v8157_v26 }
 0x301   : > { %2770 = vrot.lane.b32.xlu0 %v2580_v0, %s7353_s5  ;;  %v2540_v25 = vsel %vm8969_vm3, %v2537_v31, %v2539_v11  ;;  %vm8431_vm14 = vcmp.ne.s32.totalorder %v451_v49, 15  ;;  %v2488_v26 = vadd.f32 %v8166_v61, %v2466_v35  ;;  %v9023_v31 = vrot.slane %v8314_v59, 1 }
 0x302   : > { %v8358_v62 = vpop.f32.mrf.mxu1  ;;  %2772 = vrot.lane.b32.xlu1 %v2703_v63, %s7353_s5  ;;  %v8411_v63 = vmax.f32 %v2486_v32, 0.0  ;;  %v380_v32 = vadd.s32 96, %v8161_v29  ;;  %v2465_v1 = vadd.f32 %v2440_v36, %v2215_v12 }
 0x304   : > { %v8374_v6 = vpop.f32.mrf.mxu1  ;;  %v8964_v60 = vrot.slane %v8411_v63, 7 }
 0x305   : > { %2726 = vrot.lane.b32.xlu0 %v2656_v23, %s7352_s19  ;;  %v2592_v23 = vsel %vm8971_vm4, %v2589_v28, %v2591_v55 }
 0x306   : > { %2776 = vrot.lane.b32.xlu1 %v2705_v44, %s7353_s5  ;;  %v8400_v0 = vpop.f32.mrf.mxu1  ;;  %v458_v44 = vand.u32 15, %v378_v48  ;;  %v2590_v48 = vsel %vm8971_vm4, %v2587_v40, %v2589_v28  ;;  %v2542_v28 = vsel %vm8969_vm3, %v2539_v11, %v2541_v21  ;;  %v9029_v21 = vrot.slane %v8411_v63, 1 }
 0x308   : > { %vm8446_vm15 = vcmp.ne.s32.totalorder %v458_v44, 0  ;;  %v9027_v44 = vmov 0  ;;  %v2594_v11 = vsel %vm8971_vm4, %v2591_v55, %v9029_v21  ;;  %v9033_v55 = vrot.slane %v8355_v53, 7 }
 0x309   : > { %2730 = vrot.lane.b32.xlu0 %v2658_v42, %s7352_s19  ;;  %v2489_v42 = vadd.f32 %v8166_v61, %v2467_v17  ;;  %v2588_v17 = vsel %vm8971_vm4, %v9023_v31, %v2587_v40  ;;  %v2707_v40 = vsel %vm8431_vm14, %v2590_v48, 0.0  ;;  %v8466_v31 = vmax.f32 %v2488_v26, 0.0 }
 0x30a   : > { %2736 = vrot.lane.b32.xlu1 %v2544_v47, %s7352_s19  ;;  %v3221_v47 = vpop.f32.mrf.mxu0  ;;  %v2660_v48 = vsel %vm8446_vm15, %v2542_v28, 0.0  ;;  %v2546_v26 = vsel %vm8969_vm3, %v9033_v55, %v8964_v60  ;;  %v3230_v60 = vadd.f32 %v8404_v34, %v8208_v30 }
 0x30b   : > { %v8414_v57 = vpop.f32.mrf.mxu1  ;;  %v8453_v36 = vmax.f32 %v2489_v42, 0.0  ;;  %9030 = vst [vmem:[#allocation26_spill] sm:$0xff] %v8466_v31  ;;  %v2487_v42 = vadd.f32 %v8166_v61, %v2465_v1 }
 0x30c   : > { %v6670_v35 = vpop.f32.mrf.mxu0 }
 0x30d   : > { %2782 = vrot.lane.b32.xlu0 %v2592_v23, %s7353_s5  ;;  %v8421_v24 = vpop.f32.mrf.mxu1  ;;  %v465_v23 = vand.u32 15, %v379_v43  ;;  %v472_v43 = vand.u32 15, %v380_v32  ;;  %9026 = vst [vmem:[#allocation25_spill] sm:$0xff] %v8453_v36  ;;  %v383_v32 = vadd.s32 120, %v8161_v29  ;;  %v8487_v8 = vmax.f32 %v2487_v42, 0.0 }
 0x30e   : > { %2732 = vrot.lane.b32.xlu1 %v2540_v25, %s7352_s19  ;;  %v3224_v21 = vpop.f32.mrf.mxu0  ;;  %v3233_v54 = vadd.f32 %v6670_v35, %v8252_v13  ;;  %v2597_v13 = vrot.slane %v8466_v31, 1  ;;  %v9034_v35 = vmov 0 }
 0x30f   : > { %v8429_v41 = vpop.f32.mrf.mxu1  ;;  %vm8458_vm0 = vcmp.ne.s32.totalorder %v465_v23, 15  ;;  %vm8473_vm1 = vcmp.ne.s32.totalorder %v472_v43, 0  ;;  %v2599_v43 = vrot.slane %v8453_v36, 1  ;;  %v2595_v34 = vrot.slane %v8487_v8, 1 }
 0x310   : > { %v9028_v44 = vsel %vm8458_vm0, 4294967295, %v9027_v44  ;;  %v2662_v55 = vsel %vm8473_vm1, %v2546_v26, 0.0 }
 0x311   : > { %2778 = vrot.lane.b32.xlu0 %v2588_v17, %s7353_s5  ;;  %v8444_v49 = vpop.f32.mrf.mxu1  ;;  %v3222_v17 = vadd.f32 %v3221_v47, %v8229_v38  ;;  %v2709_v38 = vsel %vm8458_vm0, %v2594_v11, 0.0  ;;  %v2551_v47 = vrot.slane %v8453_v36, 7  ;;  %v2617_v26 = vsel %vm8971_vm4, %v2599_v43, 0.0 }
 0x312   : > { %2780 = vrot.lane.b32.xlu1 %v2707_v40, %s7353_s5  ;;  %v9031_v40 = vmov 0  ;;  %vm9045_vm0 = vcmask 1046528  }
 0x313   : > { %v6701_v12 = vpop.f32.mrf.mxu1  ;;  %v9032_v40 = vsel %vm8473_vm1, 4294967295, %v9031_v40 }
 0x314   : > { %v3511_v53 = vadd.f32 %v6701_v12, %v3230_v60 }
 0x315   : > { %2734 = vrot.lane.b32.xlu0 %v2660_v48, %s7352_s19  ;;  %v3446_v23 = vpop.f32.mrf.mxu1  ;;  %v493_v48 = vand.u32 15, %v383_v32  ;;  %v6673_v32 = vpop.f32.mrf.mxu0 }
 0x316   : > { %v3509_v1 = vadd.f32 %v3446_v23, %v3222_v17  ;;  %2784 = vrot.lane.b32.xlu1 %v2709_v38, %s7353_s5  ;;  %v2549_v17 = vrot.slane %v8466_v31, 7  ;;  %v382_v38 = vadd.s32 112, %v8161_v29  ;;  %v3527_v12 = vadd.f32 %v8166_v61, %v3511_v53 }
 0x317   : > { %v6702_v28 = vpop.f32.mrf.mxu1  ;;  %vm8501_vm2 = vcmp.ne.s32.totalorder %v493_v48, 15  ;;  %v3237_v48 = vpop.f32.mrf.mxu0 }
 0x318   : > { %v3525_v23 = vadd.f32 %v8166_v61, %v3509_v1  ;;  %v3512_v42 = vadd.f32 %v6702_v28, %v3233_v54  ;;  %v2552_v36 = vsel %vm8969_vm3, %v2549_v17, %v2551_v47  ;;  %v9035_v35 = vsel %vm8501_vm2, 4294967295, %v9034_v35 }
 0x319   : > { %2738 = vrot.lane.b32.xlu0 %v2662_v55, %s7352_s19  ;;  %v3449_v11 = vpop.f32.mrf.mxu1  ;;  %v381_v1 = vadd.s32 104, %v8161_v29  ;;  %v3225_v55 = vadd.f32 %v3224_v21, %v8283_v20  ;;  %v2600_v54 = vsel %vm8971_vm4, %v2597_v13, %v2599_v43  ;;  %v486_v28 = vand.u32 15, %v382_v38  ;;  %v8517_v20 = vld [vmem:[#allocation11 + $0x78] sm:$0xff]   ;;  %v6674_v53 = vpop.f32.mrf.mxu0 }
 0x31a   : > { %2744 = vrot.lane.b32.xlu1 %v2552_v36, %s7352_s19  ;;  %v8510_v47 = vmax.f32 %v3525_v23, 0.0  ;;  %v2547_v36 = vrot.slane %v8487_v8, 7  ;;  %v3528_v31 = vadd.f32 %v8166_v61, %v3512_v42  ;;  %v2713_v29 = vsel %vm8501_vm2, %v2617_v26, 0.0  ;;  %6811 = vmatprep.subr.bf16.mxu1 %v8517_v20 }
 0x31b   : > { %v6705_v30 = vpop.f32.mrf.mxu1  ;;  %v3510_v59 = vadd.f32 %v3449_v11, %v3225_v55  ;;  %v479_v60 = vand.u32 15, %v381_v1  ;;  %v9036_v43 = vrot.slane %v8411_v63, 1  ;;  %v3238_v38 = vadd.f32 %v3237_v48, %v8307_v5 }
 0x31c   : > { %vm8527_vm3 = vcmp.ne.s32.totalorder %v486_v28, 0  ;;  %vm9039_vm2 = vcmask 1040384   ;;  %v3573_v26 = vrot.slane %v8510_v47, 7  ;;  %v8533_v1 = vmax.f32 %v3528_v31, 0.0 }
 0x31d   : > { %2790 = vrot.lane.b32.xlu0 %v2600_v54, %s7353_s5  ;;  %v3462_v21 = vpop.f32.mrf.mxu1  ;;  %v2596_v23 = vsel %vm8971_vm4, %v9036_v43, %v2595_v34  ;;  %v2550_v42 = vsel %vm9039_vm2, %v2547_v36, %v2549_v17  ;;  %v3526_v55 = vadd.f32 %v8166_v61, %v3510_v59  ;;  %v9041_v54 = vrot.slane %v8411_v63, 7  ;;  %vm9042_vm4 = vmmov %vm9039_vm2 }
 0x31e   : > { %2792 = vrot.lane.b32.xlu1 %v2713_v29, %s7353_s5  ;;  %9040 = vst [vmem:[#allocation27_spill] sm:$0xff] %v8533_v1  ;;  %v3513_v5 = vadd.f32 %v3462_v21, %v3238_v38  ;;  %vm8540_vm1 = vcmp.ne.s32.totalorder %v479_v60, 15  ;;  %v2598_v17 = vsel %vm9045_vm0, %v2595_v34, %v2597_v13  ;;  %v8545_v48 = vmax.f32 %v3527_v12, 0.0 }
 0x31f   : > { %v2548_v29 = vsel %vm9042_vm4, %v9041_v54, %v2547_v36  ;;  %v6706_v43 = vpop.f32.mrf.mxu1  ;;  %v2664_v31 = vsel %vm8527_vm3, %v2550_v42, 0.0  ;;  %v3620_v59 = vsel %vm9039_vm2, 0.0, %v3573_v26  ;;  %v3240_v36 = vpop.f32.mrf.mxu0  ;;  %v8551_v21 = vmax.f32 %v3526_v55, 0.0  ;;  %vm9047_vm4 = vmmov %vm9039_vm2 }
 0x320   : > { %9046 = vst [vmem:[#allocation28_spill] sm:$0xff] %v8545_v48  ;;  %v2711_v60 = vsel %vm8540_vm1, %v2598_v17, 0.0  ;;  %v3529_v13 = vadd.f32 %v8166_v61, %v3513_v5  ;;  %v3249_v34 = vadd.f32 %v6674_v53, %v8322_v9  ;;  %v3626_v12 = vrot.slane %v8533_v1, 1 }
 0x321   : > { %2786 = vrot.lane.b32.xlu0 %v2596_v23, %s7353_s5  ;;  %v3578_v23 = vrot.slane %v8533_v1, 7  ;;  %v3465_v38 = vpop.f32.mrf.mxu1  ;;  %v3669_v42 = vsel %vm8180_vm5, %v3620_v59, 0.0  ;;  %v3576_v55 = vrot.slane %v8545_v48, 7  ;;  %v3246_v54 = vadd.f32 %v6673_v32, %v8296_v39  ;;  %vm9048_vm5 = vmmov %vm9045_vm0 }
 0x322   : > { %2740 = vrot.lane.b32.xlu1 %v2548_v29, %s7352_s19  ;;  %v6677_v29 = vpop.f32.mrf.mxu0  ;;  %v3624_v17 = vrot.slane %v8545_v48, 1  ;;  %v3574_v5 = vrot.slane %v8551_v21, 7  ;;  %v3622_v53 = vrot.slane %v8551_v21, 1  ;;  %v3241_v52 = vadd.f32 %v3240_v36, %v8328_v51  ;;  %vm9049_vm0 = vmmov %vm9039_vm2 }
 0x323   : > { %v3579_v9 = vsel %vm9047_vm4, %v3576_v55, %v3578_v23  ;;  %v3515_v59 = vadd.f32 %v6705_v30, %v3246_v54  ;;  %v6709_v39 = vpop.f32.mrf.mxu1  ;;  %v3621_v48 = vrot.slane %v8510_v47, 1  ;;  %vm9050_vm2 = vmmov %vm9048_vm5 }
 0x324   : > { %v3627_v32 = vsel %vm9048_vm5, %v3624_v17, %v3626_v12  ;;  %v3575_v1 = vsel %vm9049_vm0, %v3573_v26, %v3574_v5  ;;  %v3625_v51 = vsel %vm9050_vm2, %v3622_v53, %v3624_v17  ;;  %vm9051_vm4 = vmmov %vm9050_vm2 }
 0x325   : > { %2742 = vrot.lane.b32.xlu0 %v2664_v31, %s7352_s19  ;;  %v3516_v31 = vadd.f32 %v6706_v43, %v3249_v34  ;;  %v3514_v34 = vadd.f32 %v3465_v38, %v3241_v52  ;;  %v3531_v30 = vadd.f32 %v8166_v61, %v3515_v59  ;;  %v3478_v36 = vpop.f32.mrf.mxu1  ;;  %v3623_v54 = vsel %vm9051_vm4, %v3621_v48, %v3622_v53  ;;  %vm9052_vm5 = vmmov %vm9049_vm0 }
 0x326   : > { %2788 = vrot.lane.b32.xlu1 %v2711_v60, %s7353_s5  ;;  %v8569_v60 = vmax.f32 %v3529_v13, 0.0  ;;  %v3577_v38 = vsel %vm9052_vm5, %v3574_v5, %v3576_v55  ;;  %v3686_v17 = vsel %vm8235_vm6, %v3625_v51, 0.0  ;;  %vm9053_vm0 = vmmov %vm9050_vm2 }
 0x327   : > { %v3532_v43 = vadd.f32 %v8166_v61, %v3516_v31  ;;  %v6710_v53 = vpop.f32.mrf.mxu1  ;;  %v3671_v59 = vsel %vm8243_vm7, %v3577_v38, 0.0  ;;  %vm9054_vm2 = vmmov %vm9052_vm5 }
 0x328   : > { %v3628_v13 = vrot.slane %v8569_v60, 1  ;;  %vm9055_vm6 = vmmov %vm9054_vm2 }
 0x329   : > { %3701 = vrot.lane.b32.xlu0 %v3669_v42, %s7352_s19  ;;  %v3253_v42 = vpop.f32.mrf.mxu0  ;;  %v8587_v31 = vmax.f32 %v3532_v43, 0.0  ;;  %vm9056_vm7 = vmmov %vm9053_vm0 }
 0x32a   : > { %3707 = vrot.lane.b32.xlu1 %v3579_v9, %s7352_s19  ;;  %v3254_v9 = vadd.f32 %v3253_v42, %v8358_v62  ;;  %v3629_v48 = vsel %vm9053_vm0, %v3626_v12, %v3628_v13  ;;  %v8594_v62 = vmax.f32 %v3531_v30, 0.0  ;;  %v3481_v30 = vpop.f32.mrf.mxu1  ;;  %vm9059_vm4 = vmmov %vm9053_vm0 }
 0x32b   : > { %v6678_v26 = vpop.f32.mrf.mxu0  ;;  %v3586_v42 = vrot.slane %v8587_v31, 7  ;;  %v3688_v43 = vsel %vm8260_vm8, %v3629_v48, 0.0  ;;  %v3634_v51 = vrot.slane %v8587_v31, 1  ;;  %vm9057_vm8 = vmmov %vm9054_vm2 }
 0x32c   : > { %v3517_v52 = vadd.f32 %v3478_v36, %v3254_v9  ;;  %v3584_v15 = vrot.slane %v8594_v62, 7  ;;  %v3262_v36 = vadd.f32 %v6677_v29, %v8341_v3  ;;  %v6713_v3 = vpop.f32.mrf.mxu1  ;;  %vm9060_vm5 = vmmov %vm9054_vm2 }
 0x32d   : > { %3753 = vrot.lane.b32.xlu0 %v3627_v32, %s7353_s5  ;;  %v3580_v32 = vrot.slane %v8569_v60, 7  ;;  %v3256_v5 = vpop.f32.mrf.mxu0 }
 0x32e   : > { %3703 = vrot.lane.b32.xlu1 %v3575_v1, %s7352_s19  ;;  %v3530_v1 = vadd.f32 %v8166_v61, %v3514_v34  ;;  %v3533_v12 = vadd.f32 %v8166_v61, %v3517_v52  ;;  %v3265_v34 = vadd.f32 %v6678_v26, %v8374_v6  ;;  %v3587_v6 = vsel %vm9055_vm6, %v3584_v15, %v3586_v42  ;;  %vm9065_vm6 = vmmov %vm9053_vm0 }
 0x32f   : > { %v3581_v55 = vsel %vm9054_vm2, %v3578_v23, %v3580_v32  ;;  %v6681_v14 = vpop.f32.mrf.mxu0  ;;  %v3257_v16 = vadd.f32 %v3256_v5, %v8400_v0 }
 0x330   : > { %v8601_v7 = vmax.f32 %v3530_v1, 0.0  ;;  %v3673_v23 = vsel %vm8274_vm9, %v3581_v55, 0.0  ;;  %v3520_v38 = vadd.f32 %v6710_v53, %v3265_v34  ;;  %v8618_v1 = vmax.f32 %v3533_v12, 0.0  ;;  %vm9058_vm9 = vmmov %vm9053_vm0 }
 0x331   : > { %3749 = vrot.lane.b32.xlu0 %v3623_v54, %s7353_s5  ;;  %v3632_v54 = vrot.slane %v8594_v62, 1  ;;  %v3269_v52 = vpop.f32.mrf.mxu0  ;;  %v3518_v53 = vadd.f32 %v3481_v30, %v3257_v16 }
 0x332   : > { %3751 = vrot.lane.b32.xlu1 %v3686_v17, %s7353_s5  ;;  %v3582_v9 = vrot.slane %v8601_v7, 7  ;;  %v3630_v26 = vrot.slane %v8601_v7, 1  ;;  %v3519_v17 = vadd.f32 %v6709_v39, %v3262_v36  ;;  %v3536_v48 = vadd.f32 %v8166_v61, %v3520_v38  ;;  %v3494_v39 = vpop.f32.mrf.mxu1 }
 0x333   : > { %v3635_v29 = vsel %vm9056_vm7, %v3632_v54, %v3634_v51  ;;  %v3636_v55 = vrot.slane %v8618_v1, 1  ;;  %v3270_v12 = vadd.f32 %v3269_v52, %v8421_v24  ;;  %v3588_v34 = vrot.slane %v8618_v1, 7  ;;  %vm9066_vm7 = vmmov %vm9054_vm2 }
 0x334   : > { %v3535_v0 = vadd.f32 %v8166_v61, %v3519_v17  ;;  %v3631_v5 = vsel %vm9059_vm4, %v3628_v13, %v3630_v26  ;;  %v3585_v30 = vsel %vm9060_vm5, %v3582_v9, %v3584_v15  ;;  %v3534_v36 = vadd.f32 %v8166_v61, %v3518_v53  ;;  %vm9072_vm5 = vmmov %vm9053_vm0 }
 0x335   : > { %3705 = vrot.lane.b32.xlu0 %v3671_v59, %s7352_s19  ;;  %v3583_v59 = vsel %vm9057_vm8, %v3580_v32, %v3582_v9  ;;  %v6682_v32 = vpop.f32.mrf.mxu0  ;;  %v3521_v38 = vadd.f32 %v3494_v39, %v3270_v12  ;;  %v3637_v13 = vsel %vm9053_vm0, %v3634_v51, %v3636_v55  ;;  %v3589_v15 = vsel %vm9054_vm2, %v3586_v42, %v3588_v34  ;;  %vm9067_vm8 = vmmov %vm9053_vm0 }
 0x336   : > { %3755 = vrot.lane.b32.xlu1 %v3688_v43, %s7353_s5  ;;  %v3633_v43 = vsel %vm9058_vm9, %v3630_v26, %v3632_v54  ;;  %v8642_v24 = vmax.f32 %v3535_v0, 0.0  ;;  %v6714_v26 = vpop.f32.mrf.mxu1  ;;  %v8649_v19 = vmax.f32 %v3534_v36, 0.0  ;;  %v3692_v17 = vsel %vm8363_vm12, %v3637_v13, 0.0  ;;  %vm9063_vm12 = vmmov %vm9054_vm2 }
 0x337   : > { %v3690_v54 = vsel %vm8334_vm10, %v3633_v43, 0.0  ;;  %v3272_v9 = vpop.f32.mrf.mxu0  ;;  %v3537_v51 = vadd.f32 %v8166_v61, %v3521_v38  ;;  %v3281_v56 = vadd.f32 %v6682_v32, %v8429_v41  ;;  %v3677_v42 = vsel %vm8377_vm13, %v3589_v15, 0.0  ;;  %vm9061_vm10 = vmmov %vm9054_vm2 }
 0x338   : > { %v3273_v53 = vadd.f32 %v3272_v9, %v8444_v49  ;;  %v3640_v4 = vrot.slane %v8642_v24, 1  ;;  %v3590_v43 = vrot.slane %v8649_v19, 7  ;;  %v3638_v39 = vrot.slane %v8649_v19, 1  ;;  %vm9064_vm13 = vmmov %vm9053_vm0 }
 0x339   : > { %3709 = vrot.lane.b32.xlu0 %v3673_v23, %s7352_s19  ;;  %v8635_v23 = vmax.f32 %v3536_v48, 0.0  ;;  %v3278_v48 = vadd.f32 %v6681_v14, %v8414_v57  ;;  %v3524_v0 = vadd.f32 %v6714_v26, %v3281_v56  ;;  %vm9068_vm9 = vmmov %vm9054_vm2  ;;  %vm9069_vm4 = vnez %v9028_v44 }
 0x33a   : > { %3715 = vrot.lane.b32.xlu1 %v3587_v6, %s7352_s19  ;;  %v3675_v6 = vsel %vm8346_vm11, %v3585_v30, 0.0  ;;  %vm9062_vm11 = vmmov %vm9053_vm0  ;;  %v3591_v12 = vsel %vm9063_vm12, %v3588_v34, %v3590_v43  ;;  %v3641_v32 = vsel %vm9064_vm13, %v3638_v39, %v3640_v4 }
 0x33b   : > { %v3594_v16 = vrot.slane %v8635_v23, 7  ;;  %v3642_v52 = vrot.slane %v8635_v23, 1  ;;  %v3523_v50 = vadd.f32 %v6713_v3, %v3278_v48  ;;  %v3540_v14 = vadd.f32 %v8166_v61, %v3524_v0  ;;  %vm9073_vm0 = vmmov %vm9054_vm2 }
 0x33c   : > { %v3639_v3 = vsel %vm9065_vm6, %v3636_v55, %v3638_v39  ;;  %v3694_v34 = vsel %vm8431_vm14, %v3641_v32, 0.0  ;;  %vm9070_vm14 = vnez %v9032_v40  ;;  %vm9077_vm12 = vmmov %vm9072_vm5 }
 0x33d   : > { %3761 = vrot.lane.b32.xlu0 %v3635_v29, %s7353_s5  ;;  %v3592_v29 = vrot.slane %v8642_v24, 7  ;;  %v3643_v49 = vsel %vm9062_vm11, %v3640_v4, %v3642_v52  ;;  %v3539_v36 = vadd.f32 %v8166_v61, %v3523_v50  ;;  %vm9076_vm11 = vmmov %vm9072_vm5 }
 0x33e   : > { %3711 = vrot.lane.b32.xlu1 %v3583_v59, %s7352_s19  ;;  %v3497_v59 = vpop.f32.mrf.mxu1 }
 0x33f   : > { %v3595_v41 = vsel %vm9061_vm10, %v3592_v29, %v3594_v16  ;;  %v3522_v57 = vadd.f32 %v3497_v59, %v3273_v53  ;;  %v3593_v13 = vsel %vm9066_vm7, %v3590_v43, %v3592_v29  ;;  %v8689_v15 = vmax.f32 %v3539_v36, 0.0  ;;  %vm9075_vm10 = vmmov %vm9072_vm5 }
 0x340   : > { %v3679_v55 = vsel %vm8446_vm15, %v3593_v13, 0.0  ;;  %vm9071_vm15 = vmmov %vm9054_vm2 }
 0x341   : > { %3757 = vrot.lane.b32.xlu0 %v3631_v5, %s7353_s5  ;;  %v8667_v5 = vmax.f32 %v3537_v51, 0.0  ;;  %v3600_v51 = vrot.slane %v8689_v15, 7  ;;  %vm9074_vm2 = vmmov %vm9073_vm0 }
 0x342   : > { %3759 = vrot.lane.b32.xlu1 %v3690_v54, %s7353_s5  ;;  %v3538_v54 = vadd.f32 %v8166_v61, %v3522_v57 }
 0x343   : > { %v3644_v30 = vrot.slane %v8667_v5, 1  ;;  %v3596_v38 = vrot.slane %v8667_v5, 7 }
 0x344   : > { %v8691_v61 = vmax.f32 %v3538_v54, 0.0 }
 0x345   : > { %3713 = vrot.lane.b32.xlu0 %v3675_v6, %s7352_s19  ;;  %v8683_v6 = vmax.f32 %v3540_v14, 0.0  ;;  %v3645_v26 = vsel %vm9067_vm8, %v3642_v52, %v3644_v30  ;;  %v3597_v9 = vsel %vm9068_vm9, %v3594_v16, %v3596_v38 }
 0x346   : > { %3763 = vrot.lane.b32.xlu1 %v3692_v17, %s7353_s5  ;;  %v3696_v37 = vsel %vm9069_vm4, %v3645_v26, 0.0  ;;  %v3646_v56 = vrot.slane %v8691_v61, 1  ;;  %v3681_v29 = vsel %vm9070_vm14, %v3597_v9, 0.0  ;;  %v3598_v25 = vrot.slane %v8691_v61, 7 }
 0x347   : > { %v3602_v17 = vrot.slane %v8683_v6, 7  ;;  %v3650_v59 = vrot.slane %v8683_v6, 1 }
 0x348   : > { %v3647_v44 = vsel %vm9072_vm5, %v3644_v30, %v3646_v56  ;;  %v3601_v53 = vsel %vm9073_vm0, %v3598_v25, %v3600_v51  ;;  %v3599_v40 = vsel %vm9074_vm2, %v3596_v38, %v3598_v25  ;;  %v7103_v25 = vld [vmem:[#allocation11 + $0x68] sm:$0xff]  }
 0x349   : > { %3717 = vrot.lane.b32.xlu0 %v3677_v42, %s7352_s19  ;;  %v3603_v16 = vsel %vm9071_vm15, %v3600_v51, %v3602_v17  ;;  %v3648_v42 = vrot.slane %v8689_v15, 1  ;;  %v3683_v0 = vsel %vm8527_vm3, %v3601_v53, 0.0  ;;  %vm9078_vm3 = vnez %v9035_v35  ;;  %v7101_v17 = vld [vmem:[#allocation11 + $0x70] sm:$0xff]  }
 0x34a   : > { %3723 = vrot.lane.b32.xlu1 %v3595_v41, %s7352_s19 }
 0x34b   : > { %v3649_v43 = vsel %vm9075_vm10, %v3646_v56, %v3648_v42  ;;  %v3651_v30 = vsel %vm9077_vm12, %v3648_v42, %v3650_v59 }
 0x34c   : > { %v3698_v50 = vsel %vm8540_vm1, %v3649_v43, 0.0 }
 0x34d   : > { %3769 = vrot.lane.b32.xlu0 %v3643_v49, %s7353_s5  ;;  %v3668_v49 = vsel %vm9076_vm11, %v3650_v59, 0.0 }
 0x34e   : > { %3719 = vrot.lane.b32.xlu1 %v3591_v12, %s7352_s19 }
 0x351   : > { %3765 = vrot.lane.b32.xlu0 %v3639_v3, %s7353_s5 }
 0x352   : > { %3767 = vrot.lane.b32.xlu1 %v3694_v34, %s7353_s5 }
 0x355   : > { %3721 = vrot.lane.b32.xlu0 %v3679_v55, %s7352_s19 }
 0x356   : > { %3771 = vrot.lane.b32.xlu1 %v3696_v37, %s7353_s5 }
 0x359   : > { %3725 = vrot.lane.b32.xlu0 %v3681_v29, %s7352_s19  ;;  %v7096_v29 = vld [vmem:[#allocation11 + $0xb0] sm:$0xff]  }
 0x35a   : > { %3731 = vrot.lane.b32.xlu1 %v3603_v16, %s7352_s19 }
 0x35b   : > { %v2715_v52 = vpop.permute.xlu0 %2714 }
 0x35c   : > { %v2721_v48 = vpop.permute.xlu1 %2720  ;;  %v2746_v39 = vadd.f32 %v2715_v52, %v8173_v18  ;;  %v3700_v18 = vsel %vm9078_vm3, %v3668_v49, 0.0 }
 0x35d   : > { %3773 = vrot.lane.b32.xlu0 %v3647_v44, %s7353_s5  ;;  %v2749_v36 = vadd.f32 %v2721_v48, %v8186_v2 }
 0x35e   : > { %3727 = vrot.lane.b32.xlu1 %v3599_v40, %s7352_s19  ;;  %v7098_v40 = vld [vmem:[#allocation11 + $0xa8] sm:$0xff]  }
 0x35f   : > { %v2767_v4 = vpop.permute.xlu0 %2766 }
 0x360   : > { %v2717_v41 = vpop.permute.xlu1 %2716 }
 0x361   : > { %3729 = vrot.lane.b32.xlu0 %v3683_v0, %s7352_s19  ;;  %v2747_v14 = vadd.f32 %v2717_v41, %v8194_v10 }
 0x362   : > { %3775 = vrot.lane.b32.xlu1 %v3698_v50, %s7353_s5  ;;  %v7112_v50 = vld [vmem:[#allocation11 + $0x50] sm:$0xff]  }
 0x363   : > { %v2763_v57 = vpop.permute.xlu0 %2762 }
 0x364   : > { %v2794_v12 = vadd.f32 %v2763_v57, %v2746_v39  ;;  %v2765_v11 = vpop.permute.xlu1 %2764  ;;  %v7102_v39 = vld [vmem:[#allocation11 + $0x98] sm:$0xff]  }
 0x365   : > { %3777 = vrot.lane.b32.xlu0 %v3651_v30, %s7353_s5  ;;  %v2795_v32 = vadd.f32 %v2765_v11, %v2747_v14  ;;  %v9079_v14 = vld [vmem:[#allocation21_spill] sm:$0xff]  ;;  %v9080_v11 = vld [vmem:[#allocation24_spill] sm:$0xff] }
 0x366   : > { %3779 = vrot.lane.b32.xlu1 %v3700_v18, %s7353_s5 }
 0x367   : > { %v2719_v28 = vpop.permute.xlu0 %2718  ;;  %v6048_v54 = vpack.c.bf16 %v2795_v32, %v2794_v12 }
 0x368   : > { %v2748_v3 = vadd.f32 %v2719_v28, %v8178_v22  ;;  %v2769_v38 = vpop.permute.xlu1 %2768  ;;  %v7104_v28 = vld [vmem:[#allocation11 + $0x90] sm:$0xff]  }
 0x369   : > { %6236 = vst [vmem:[#allocation3 + $0x10] sm:$0xff] %v6048_v54   ;;  %v2797_v13 = vadd.f32 %v2769_v38, %v2749_v36  ;;  %v7114_v36 = vld [vmem:[#allocation11 + $0x48] sm:$0xff]  }
 0x36a   : > { %v2796_v10 = vadd.f32 %v2767_v4, %v2748_v3 }
 0x36b   : > { %v2723_v34 = vpop.permute.xlu0 %2722 }
 0x36c   : > { %v6053_v26 = vpack.c.bf16 %v2797_v13, %v2796_v10  ;;  %v2729_v55 = vpop.permute.xlu1 %2728  ;;  %v2750_v51 = vadd.f32 %v2723_v34, %v8215_v45  ;;  %v9081_v13 = vld [vmem:[#allocation22_spill] sm:$0xff] }
 0x36d   : > { %v2753_v48 = vadd.f32 %v2729_v55, %v8254_v58  ;;  %v7100_v58 = vld [vmem:[#allocation11 + $0xa0] sm:$0xff]   ;;  %v9082_v55 = vld [vmem:[#allocation23_spill] sm:$0xff] }
 0x36e   : > { %6237 = vst [vmem:[#allocation3 + $0x18] sm:$0xff] %v6053_v26  }
 0x36f   : > { %v2775_v9 = vpop.permute.xlu0 %2774 }
 0x370   : > { %v2725_v35 = vpop.permute.xlu1 %2724  ;;  %v7089_v37 = vld [vmem:[#allocation3 + $0x10] sm:$0xff]  }
 0x371   : > { %6731 = vmatprep.mubr.bf16.mxu0 %v7089_v37  ;;  %6764 = vmatmul.mubr.bf16.vlgmr.msra.gmra.mxu1 %v7089_v37  ;;  %v2751_v2 = vadd.f32 %v2725_v35, %v8285_v33  ;;  %v7108_v35 = vld [vmem:[#allocation11 + $0x88] sm:$0xff]   ;;  %v7118_v37 = vld [vmem:[#allocation11 + $0x40] sm:$0xff]  }
 0x372   : > { %6812 = vmatpush3.bf16.msra.mxu1 %v8517_v20  ;;  %v7105_v20 = vld [vmem:[#allocation11 + $0x60] sm:$0xff]  }
 0x373   : > { %v2771_v56 = vpop.permute.xlu0 %2770  ;;  %6813 = vmatprep.subr.bf16.mxu1 %v7101_v17 }
 0x374   : > { %v2798_v22 = vadd.f32 %v2771_v56, %v2750_v51  ;;  %v2773_v16 = vpop.permute.xlu1 %2772 }
 0x375   : > { %v7091_v52 = vld [vmem:[#allocation3 + $0x18] sm:$0xff]   ;;  %v2799_v44 = vadd.f32 %v2773_v16, %v2751_v2 }
 0x376   : > { %6732 = vmatmul.mubr.bf16.vlgmr.msra.gmra.mxu0 %v7091_v52  ;;  %6767 = vmatprep.mubr.bf16.mxu1 %v7091_v52  ;;  %v8743_v16 = vld [vmem:[#allocation11 + $0xb8] sm:$0xff]  }
 0x377   : > { %v2727_v42 = vpop.permute.xlu0 %2726  ;;  %v6058_v45 = vpack.c.bf16 %v2799_v44, %v2798_v22  ;;  %6780 = vmatpush3.bf16.msra.mxu0 %v8437_v46  ;;  %6814 = vmatpush3.bf16.msra.mxu1 %v7101_v17  ;;  %v8745_v44 = vld [vmem:[#allocation11 + $0x38] sm:$0xff]  }
 0x378   : > { %v2752_v53 = vadd.f32 %v2727_v42, %v8269_v27  ;;  %v2777_v33 = vpop.permute.xlu1 %2776  ;;  %6781 = vmatprep.subr.bf16.mxu0 %v7096_v29  ;;  %6815 = vmatprep.subr.bf16.mxu1 %v7103_v25  ;;  %v7109_v27 = vld [vmem:[#allocation11 + $0x58] sm:$0xff]  }
 0x379   : > { %6238 = vst [vmem:[#allocation3 + $0x20] sm:$0xff] %v6058_v45   ;;  %v2801_v4 = vadd.f32 %v2777_v33, %v2753_v48 }
 0x37a   : > { %v2800_v59 = vadd.f32 %v2775_v9, %v2752_v53 }
 0x37b   : > { %v2731_v43 = vpop.permute.xlu0 %2730  ;;  %6782 = vmatpush3.bf16.msra.mxu0 %v7096_v29  ;;  %6816 = vmatpush3.bf16.msra.mxu1 %v7103_v25  ;;  %v7111_v25 = vld [vmem:[#allocation11 + $0x80] sm:$0xff]  }
 0x37c   : > { %v6063_v0 = vpack.c.bf16 %v2801_v4, %v2800_v59  ;;  %v2737_v41 = vpop.permute.xlu1 %2736  ;;  %6783 = vmatprep.subr.bf16.mxu0 %v7098_v40  ;;  %6817 = vmatprep.subr.bf16.mxu1 %v7105_v20  ;;  %v2754_v12 = vadd.f32 %v2731_v43, %v9079_v14  ;;  %v9083_v59 = vld [vmem:[#allocation25_spill] sm:$0xff] }
 0x37d   : > { %v2757_v34 = vadd.f32 %v2737_v41, %v9081_v13  ;;  %v9085_v13 = vld [vmem:[#allocation27_spill] sm:$0xff] }
 0x37e   : > { %6239 = vst [vmem:[#allocation3 + $0x28] sm:$0xff] %v6063_v0   ;;  %v9084_v0 = vld [vmem:[#allocation26_spill] sm:$0xff] }
 0x37f   : > { %v2783_v46 = vpop.permute.xlu0 %2782  ;;  %6784 = vmatpush3.bf16.msra.mxu0 %v7098_v40  ;;  %6818 = vmatpush3.bf16.msra.mxu1 %v7105_v20 }
 0x380   : > { %v2733_v57 = vpop.permute.xlu1 %2732  ;;  %v7092_v49 = vld [vmem:[#allocation3 + $0x20] sm:$0xff]   ;;  %6785 = vmatprep.subr.bf16.mxu0 %v7100_v58  ;;  %6819 = vmatprep.subr.bf16.mxu1 %v7109_v27 }
 0x381   : > { %6735 = vmatprep.mubr.bf16.mxu0 %v7092_v49  ;;  %6768 = vmatmul.mubr.bf16.gmra.mxu1 %v7092_v49  ;;  %v2755_v32 = vadd.f32 %v2733_v57, %v9080_v11 }
 0x383   : > { %v2779_v30 = vpop.permute.xlu0 %2778  ;;  %6786 = vmatpush3.bf16.msra.mxu0 %v7100_v58  ;;  %6820 = vmatpush3.bf16.msra.mxu1 %v7109_v27 }
 0x384   : > { %v2802_v18 = vadd.f32 %v2779_v30, %v2754_v12  ;;  %v2781_v54 = vpop.permute.xlu1 %2780  ;;  %6787 = vmatprep.subr.bf16.mxu0 %v7102_v39  ;;  %6821 = vmatprep.subr.bf16.mxu1 %v7112_v50 }
 0x385   : > { %v7093_v3 = vld [vmem:[#allocation3 + $0x28] sm:$0xff]   ;;  %v2803_v38 = vadd.f32 %v2781_v54, %v2755_v32 }
 0x386   : > { %6736 = vmatmul.mubr.bf16.gmra.mxu0 %v7093_v3  ;;  %6771 = vmatprep.mubr.bf16.mxu1 %v7093_v3 }
 0x387   : > { %v2735_v10 = vpop.permute.xlu0 %2734  ;;  %v6068_v26 = vpack.c.bf16 %v2803_v38, %v2802_v18  ;;  %6788 = vmatpush3.bf16.msra.mxu0 %v7102_v39  ;;  %6822 = vmatpush3.bf16.msra.mxu1 %v7112_v50 }
 0x388   : > { %v2756_v9 = vadd.f32 %v2735_v10, %v9082_v55  ;;  %v2785_v17 = vpop.permute.xlu1 %2784  ;;  %6789 = vmatprep.subr.bf16.mxu0 %v7104_v28  ;;  %6823 = vmatprep.subr.bf16.mxu1 %v7114_v36  ;;  %v7110_v10 = vld [vmem:[#allocation3 + $0x18] sm:$0xff]  }
 0x389   : > { %6240 = vst [vmem:[#allocation3 + $0x30] sm:$0xff] %v6068_v26   ;;  %v2805_v56 = vadd.f32 %v2785_v17, %v2757_v34  ;;  %v9086_v55 = vld [vmem:[#allocation28_spill] sm:$0xff] }
 0x38a   : > { %v2804_v51 = vadd.f32 %v2783_v46, %v2756_v9 }
 0x38b   : > { %v2739_v2 = vpop.permute.xlu0 %2738  ;;  %6790 = vmatpush3.bf16.msra.mxu0 %v7104_v28  ;;  %6824 = vmatpush3.bf16.msra.mxu1 %v7114_v36 }
 0x38c   : > { %v6073_v22 = vpack.c.bf16 %v2805_v56, %v2804_v51  ;;  %v2745_v29 = vpop.permute.xlu1 %2744  ;;  %6791 = vmatprep.subr.bf16.mxu0 %v7108_v35  ;;  %6825 = vmatprep.subr.bf16.mxu1 %v7118_v37  ;;  %v2758_v20 = vadd.f32 %v2739_v2, %v8411_v63  ;;  %v7113_v56 = vld [vmem:[#allocation3 + $0x20] sm:$0xff]   ;;  %v7119_v2 = vld [vmem:[#allocation11 + $0x30] sm:$0xff]  }
 0x38d   : > { %v2761_v4 = vadd.f32 %v2745_v29, %v9083_v59  ;;  %v7116_v29 = vld [vmem:[#allocation3 + $0x28] sm:$0xff]  }
 0x38e   : > { %6241 = vst [vmem:[#allocation3 + $0x38] sm:$0xff] %v6073_v22  }
 0x38f   : > { %v2791_v52 = vpop.permute.xlu0 %2790  ;;  %6792 = vmatpush3.bf16.msra.mxu0 %v7108_v35  ;;  %6826 = vmatpush3.bf16.msra.mxu1 %v7118_v37 }
 0x390   : > { %v2793_v42 = vpop.permute.xlu1 %2792  ;;  %v7095_v48 = vld [vmem:[#allocation3 + $0x30] sm:$0xff]   ;;  %6793 = vmatprep.subr.bf16.mxu0 %v7111_v25  ;;  %6875 = vmatprep.subr.bf16.mxu1 %v8743_v16 }
 0x391   : > { %6739 = vmatprep.mubr.bf16.mxu0 %v7095_v48  ;;  %6772 = vmatmul.mubr.bf16.gmra.mxu1 %v7095_v48  ;;  %v2809_v27 = vadd.f32 %v2793_v42, %v2761_v4  ;;  %v7122_v48 = vld [vmem:[#allocation11 + $0x28] sm:$0xff]  }
 0x393   : > { %v2787_v45 = vpop.permute.xlu0 %2786  ;;  %6794 = vmatpush3.bf16.msra.mxu0 %v7111_v25 }
 0x394   : > { %v2741_v53 = vpop.permute.xlu1 %2740  ;;  %6843 = vmatprep.subr.bf16.mxu0 %v8745_v44  ;;  %v2806_v46 = vadd.f32 %v2787_v45, %v2758_v20  ;;  %v7136_v20 = vld [vmem:[#allocation11 + $0xb0] sm:$0xff]  }
 0x395   : > { %v7097_v33 = vld [vmem:[#allocation3 + $0x38] sm:$0xff]   ;;  %v2759_v43 = vadd.f32 %v2741_v53, %v8487_v8 }
 0x396   : > { %6740 = vmatmul.mubr.bf16.gmra.mxu0 %v7097_v33  ;;  %6775 = vmatprep.mubr.bf16.mxu1 %v7097_v33 }
 0x397   : > { %v2743_v40 = vpop.permute.xlu0 %2742 }
 0x398   : > { %v2760_v41 = vadd.f32 %v2743_v40, %v9084_v0  ;;  %v2789_v58 = vpop.permute.xlu1 %2788  ;;  %v7124_v40 = vld [vmem:[#allocation11 + $0x20] sm:$0xff]  }
 0x399   : > { %v2807_v50 = vadd.f32 %v2789_v58, %v2759_v43 }
 0x39a   : > { %v2808_v39 = vadd.f32 %v2791_v52, %v2760_v41 }
 0x39b   : > { %v3702_v57 = vpop.permute.xlu0 %3701  ;;  %v6078_v14 = vpack.c.bf16 %v2807_v50, %v2806_v46  ;;  %v7138_v46 = vld [vmem:[#allocation11 + $0xa8] sm:$0xff]  }
 0x39c   : > { %v6083_v49 = vpack.c.bf16 %v2809_v27, %v2808_v39  ;;  %v3708_v12 = vpop.permute.xlu1 %3707  ;;  %v3733_v63 = vadd.f32 %v3702_v57, %v8510_v47  ;;  %v7126_v57 = vld [vmem:[#allocation11 + $0x18] sm:$0xff]  }
 0x39d   : > { %6242 = vst [vmem:[#allocation3 + $0x40] sm:$0xff] %v6078_v14   ;;  %v3736_v34 = vadd.f32 %v3708_v12, %v9085_v13  ;;  %v7140_v12 = vld [vmem:[#allocation11 + $0xa0] sm:$0xff]  }
 0x39e   : > { %6243 = vst [vmem:[#allocation3 + $0x48] sm:$0xff] %v6083_v49  }
 0x39f   : > { %v3754_v30 = vpop.permute.xlu0 %3753 }
 0x3a0   : > { %v3704_v11 = vpop.permute.xlu1 %3703 }
 0x3a1   : > { %v3734_v8 = vadd.f32 %v3704_v11, %v8551_v21 }
 0x3a3   : > { %v3750_v32 = vpop.permute.xlu0 %3749 }
 0x3a4   : > { %v3781_v18 = vadd.f32 %v3750_v32, %v3733_v63  ;;  %v3752_v28 = vpop.permute.xlu1 %3751  ;;  %v7106_v36 = vld [vmem:[#allocation3 + $0x40] sm:$0xff]   ;;  %v7141_v63 = vld [vmem:[#allocation11 + $0x98] sm:$0xff]  }
 0x3a5   : > { %v3782_v54 = vadd.f32 %v3752_v28, %v3734_v8  ;;  %v7107_v3 = vld [vmem:[#allocation3 + $0x48] sm:$0xff]   ;;  %6743 = vmatprep.mubr.bf16.mxu0 %v7106_v36  ;;  %6776 = vmatmul.mubr.bf16.gmra.mxu1 %v7106_v36 }
 0x3a6   : > { %6744 = vmatmul.mubr.bf16.gmra.mxu0 %v7107_v3  ;;  %v7127_v11 = vld [vmem:[#allocation3 + $0x48] sm:$0xff]  }
 0x3a7   : > { %v3706_v38 = vpop.permute.xlu0 %3705  ;;  %v6088_v26 = vpack.c.bf16 %v3782_v54, %v3781_v18  ;;  %6795 = vmatprep.mubr.bf16.mxu0 %v7110_v10  ;;  %v7132_v28 = vld [vmem:[#allocation11 + $0x8] sm:$0xff]   ;;  %v7142_v10 = vld [vmem:[#allocation11 + $0x90] sm:$0xff]  }
 0x3a8   : > { %v3735_v9 = vadd.f32 %v3706_v38, %v9086_v55  ;;  %v3756_v17 = vpop.permute.xlu1 %3755  ;;  %v7134_v38 = vld [vmem:[#allocation11] sm:$0xff]  }
 0x3a9   : > { %6244 = vst [vmem:[#allocation3 + $0x50] sm:$0xff] %v6088_v26   ;;  %v3784_v21 = vadd.f32 %v3756_v17, %v3736_v34 }
 0x3aa   : > { %v3783_v47 = vadd.f32 %v3754_v30, %v3735_v9  ;;  %v7133_v9 = vld [vmem:[#allocation3 + $0x48] sm:$0xff]  }
 0x3ab   : > { %v3710_v35 = vpop.permute.xlu0 %3709 }
 0x3ac   : > { %v6093_v37 = vpack.c.bf16 %v3784_v21, %v3783_v47  ;;  %v3716_v51 = vpop.permute.xlu1 %3715  ;;  %v3737_v42 = vadd.f32 %v3710_v35, %v8569_v60  ;;  %v7123_v60 = vld [vmem:[#allocation3 + $0x38] sm:$0xff]   ;;  %v7144_v35 = vld [vmem:[#allocation11 + $0x88] sm:$0xff]  }
 0x3ad   : > { %v3740_v41 = vadd.f32 %v3716_v51, %v8587_v31 }
 0x3ae   : > { %6245 = vst [vmem:[#allocation3 + $0x58] sm:$0xff] %v6093_v37   ;;  %6796 = vmatmul.mubr.bf16.vlgmr.msra.gmra.mxu0 %v7113_v56 }
 0x3af   : > { %v3762_v22 = vpop.permute.xlu0 %3761  ;;  %6799 = vmatprep.mubr.bf16.mxu0 %v7116_v29  ;;  %6844 = vmatpush3.bf16.msra.mxu0 %v8745_v44  ;;  %v7120_v44 = vld [vmem:[#allocation3 + $0x30] sm:$0xff]  }
 0x3b0   : > { %v3712_v25 = vpop.permute.xlu1 %3711  ;;  %v8758_v52 = vld [vmem:[#allocation3 + $0x50] sm:$0xff]   ;;  %6845 = vmatprep.subr.bf16.mxu0 %v7119_v2 }
 0x3b1   : > { %6827 = vmatprep.mubr.bf16.mxu1 %v8758_v52  ;;  %v3738_v53 = vadd.f32 %v3712_v25, %v8601_v7  ;;  %v7130_v55 = vld [vmem:[#allocation3 + $0x50] sm:$0xff]  }
 0x3b3   : > { %v3758_v45 = vpop.permute.xlu0 %3757  ;;  %6846 = vmatpush3.bf16.msra.mxu0 %v7119_v2 }
 0x3b4   : > { %v3785_v33 = vadd.f32 %v3758_v45, %v3737_v42  ;;  %v3760_v59 = vpop.permute.xlu1 %3759  ;;  %6847 = vmatprep.subr.bf16.mxu0 %v7122_v48 }
 0x3b5   : > { %v8763_v4 = vld [vmem:[#allocation3 + $0x58] sm:$0xff]   ;;  %v3786_v43 = vadd.f32 %v3760_v59, %v3738_v53 }
 0x3b6   : > { %6828 = vmatmul.mubr.bf16.vlgmr.msra.gmra.mxu1 %v8763_v4  ;;  %6800 = vmatmul.mubr.bf16.gmra.mxu0 %v7120_v44 }
 0x3b7   : > { %v3714_v0 = vpop.permute.xlu0 %3713  ;;  %v6098_v58 = vpack.c.bf16 %v3786_v43, %v3785_v33  ;;  %6876 = vmatpush3.bf16.msra.mxu1 %v8743_v16  ;;  %6803 = vmatprep.mubr.bf16.mxu0 %v7123_v60  ;;  %v7129_v16 = vld [vmem:[#allocation11 + $0x10] sm:$0xff]  }
 0x3b8   : > { %v3739_v27 = vadd.f32 %v3714_v0, %v8594_v62  ;;  %v3764_v7 = vpop.permute.xlu1 %3763  ;;  %6848 = vmatpush3.bf16.msra.mxu0 %v7122_v48  ;;  %6877 = vmatprep.subr.bf16.mxu1 %v7136_v20  ;;  %v7125_v62 = vld [vmem:[#allocation3 + $0x40] sm:$0xff]  }
 0x3b9   : > { %6246 = vst [vmem:[#allocation3 + $0x60] sm:$0xff] %v6098_v58   ;;  %v3788_v50 = vadd.f32 %v3764_v7, %v3740_v41  ;;  %6849 = vmatprep.subr.bf16.mxu0 %v7124_v40  ;;  %v7146_v41 = vld [vmem:[#allocation3 + $0x58] sm:$0xff]  }
 0x3ba   : > { %v3787_v39 = vadd.f32 %v3762_v22, %v3739_v27 }
 0x3bb   : > { %v3718_v49 = vpop.permute.xlu0 %3717  ;;  %6878 = vmatpush3.bf16.msra.mxu1 %v7136_v20 }
 0x3bc   : > { %v6103_v14 = vpack.c.bf16 %v3788_v50, %v3787_v39  ;;  %v3724_v31 = vpop.permute.xlu1 %3723  ;;  %6850 = vmatpush3.bf16.msra.mxu0 %v7124_v40  ;;  %6879 = vmatprep.subr.bf16.mxu1 %v7138_v46  ;;  %v3741_v18 = vadd.f32 %v3718_v49, %v8618_v1  ;;  %v7154_v50 = vld [vmem:[#allocation3 + $0x90] sm:$0xff]  }
 0x3bd   : > { %6851 = vmatprep.subr.bf16.mxu0 %v7126_v57  ;;  %v3744_v17 = vadd.f32 %v3724_v31, %v8635_v23  ;;  %v7147_v23 = vld [vmem:[#allocation11 + $0x80] sm:$0xff]  }
 0x3be   : > { %6247 = vst [vmem:[#allocation3 + $0x68] sm:$0xff] %v6103_v14   ;;  %6804 = vmatmul.mubr.bf16.gmra.mxu0 %v7125_v62 }
 0x3bf   : > { %v3770_v30 = vpop.permute.xlu0 %3769  ;;  %6880 = vmatpush3.bf16.msra.mxu1 %v7138_v46  ;;  %6807 = vmatprep.mubr.bf16.mxu0 %v7127_v11 }
 0x3c0   : > { %v3720_v32 = vpop.permute.xlu1 %3719  ;;  %6852 = vmatpush3.bf16.msra.mxu0 %v7126_v57  ;;  %v8769_v8 = vld [vmem:[#allocation3 + $0x60] sm:$0xff]   ;;  %6881 = vmatprep.subr.bf16.mxu1 %v7140_v12 }
 0x3c1   : > { %6853 = vmatprep.subr.bf16.mxu0 %v7129_v16  ;;  %6831 = vmatprep.mubr.bf16.mxu1 %v8769_v8  ;;  %v3742_v54 = vadd.f32 %v3720_v32, %v8649_v19 }
 0x3c3   : > { %v3766_v36 = vpop.permute.xlu0 %3765  ;;  %6882 = vmatpush3.bf16.msra.mxu1 %v7140_v12 }
 0x3c4   : > { %v3789_v3 = vadd.f32 %v3766_v36, %v3741_v18  ;;  %v3768_v13 = vpop.permute.xlu1 %3767  ;;  %6854 = vmatpush3.bf16.msra.mxu0 %v7129_v16  ;;  %6883 = vmatprep.subr.bf16.mxu1 %v7141_v63 }
 0x3c5   : > { %v7131_v34 = vld [vmem:[#allocation3 + $0x68] sm:$0xff]   ;;  %v3790_v26 = vadd.f32 %v3768_v13, %v3742_v54  ;;  %6855 = vmatprep.subr.bf16.mxu0 %v7132_v28 }
 0x3c6   : > { %6832 = vmatmul.mubr.bf16.gmra.mxu1 %v7131_v34  ;;  %6808 = vmatmul.mubr.bf16.gmra.mxu0 %v7130_v55  ;;  %v7149_v58 = vld [vmem:[#allocation3 + $0x68] sm:$0xff]  }
 0x3c7   : > { %v3722_v1 = vpop.permute.xlu0 %3721  ;;  %v6108_v47 = vpack.c.bf16 %v3790_v26, %v3789_v3  ;;  %6884 = vmatpush3.bf16.msra.mxu1 %v7141_v63  ;;  %6859 = vmatprep.mubr.bf16.mxu0 %v7133_v9 }
 0x3c8   : > { %v3743_v21 = vadd.f32 %v3722_v1, %v8642_v24  ;;  %v3772_v19 = vpop.permute.xlu1 %3771  ;;  %6856 = vmatpush3.bf16.msra.mxu0 %v7132_v28  ;;  %6885 = vmatprep.subr.bf16.mxu1 %v7142_v10 }
 0x3c9   : > { %6248 = vst [vmem:[#allocation3 + $0x70] sm:$0xff] %v6108_v47   ;;  %v3792_v51 = vadd.f32 %v3772_v19, %v3744_v17  ;;  %6857 = vmatprep.subr.bf16.mxu0 %v7134_v38 }
 0x3ca   : > { %v3791_v37 = vadd.f32 %v3770_v30, %v3743_v21 }
 0x3cb   : > { %v3726_v56 = vpop.permute.xlu0 %3725  ;;  %6886 = vmatpush3.bf16.msra.mxu1 %v7142_v10 }
 0x3cc   : > { %v6113_v2 = vpack.c.bf16 %v3792_v51, %v3791_v37  ;;  %v3732_v22 = vpop.permute.xlu1 %3731  ;;  %6858 = vmatpush3.bf16.msra.mxu0 %v7134_v38  ;;  %6887 = vmatprep.subr.bf16.mxu1 %v7144_v35  ;;  %v3745_v48 = vadd.f32 %v3726_v56, %v8667_v5 }
 0x3cd   : > { %v3748_v43 = vadd.f32 %v3732_v22, %v8683_v6  ;;  %v7148_v6 = vld [vmem:[#allocation3 + $0x60] sm:$0xff]  }
 0x3ce   : > { %6249 = vst [vmem:[#allocation3 + $0x78] sm:$0xff] %v6113_v2   ;;  %v8802_v2 = vld [vmem:[%s8950_s6] ss:$0 sm:$0xff] }
 0x3cf   : > { %v3774_v24 = vpop.permute.xlu0 %3773  ;;  %6860 = vmatmul.mubr.bf16.vlgmr.msra.gmra.mxu0 %v8758_v52  ;;  %6888 = vmatpush3.bf16.msra.mxu1 %v7144_v35 }
 0x3d0   : > { %v3728_v29 = vpop.permute.xlu1 %3727  ;;  %6863 = vmatprep.mubr.bf16.mxu0 %v8763_v4  ;;  %v7137_v25 = vld [vmem:[#allocation3 + $0x70] sm:$0xff]   ;;  %6889 = vmatprep.subr.bf16.mxu1 %v7147_v23  ;;  %v3793_v40 = vadd.f32 %v3774_v24, %v3745_v48 }
 0x3d1   : > { %6835 = vmatprep.mubr.bf16.mxu1 %v7137_v25  ;;  %v3746_v45 = vadd.f32 %v3728_v29, %v8691_v61  ;;  %v7150_v27 = vld [vmem:[#allocation3 + $0x70] sm:$0xff]  }
 0x3d3   : > { %v3730_v42 = vpop.permute.xlu0 %3729  ;;  %6890 = vmatpush3.bf16.msra.mxu1 %v7147_v23 }
 0x3d4   : > { %v3776_v53 = vpop.permute.xlu1 %3775  ;;  %v3747_v20 = vadd.f32 %v3730_v42, %v8689_v15 }
 0x3d5   : > { %v7139_v33 = vld [vmem:[#allocation3 + $0x78] sm:$0xff]   ;;  %v3794_v59 = vadd.f32 %v3776_v53, %v3746_v45 }
 0x3d6   : > { %6836 = vmatmul.mubr.bf16.gmra.mxu1 %v7139_v33  ;;  %v7151_v7 = vld [vmem:[#allocation3 + $0x78] sm:$0xff]  }
 0x3d7   : > { %v3778_v52 = vpop.permute.xlu0 %3777  ;;  %v6118_v4 = vpack.c.bf16 %v3794_v59, %v3793_v40  ;;  %6864 = vmatmul.mubr.bf16.gmra.mxu0 %v8769_v8 }
 0x3d8   : > { %v3795_v44 = vadd.f32 %v3778_v52, %v3747_v20  ;;  %v3780_v0 = vpop.permute.xlu1 %3779  ;;  %6867 = vmatprep.mubr.bf16.mxu0 %v7131_v34 }
 0x3d9   : > { %6250 = vst [vmem:[#allocation3 + $0x80] sm:$0xff] %v6118_v4   ;;  %v3796_v5 = vadd.f32 %v3780_v0, %v3748_v43 }
 0x3db   : > { %v6123_v61 = vpack.c.bf16 %v3796_v5, %v3795_v44 }
 0x3dd   : > { %6251 = vst [vmem:[#allocation3 + $0x88] sm:$0xff] %v6123_v61  }
 0x3df   : > { %6868 = vmatmul.mubr.bf16.gmra.mxu0 %v7137_v25 }
 0x3e0   : > { %6871 = vmatprep.mubr.bf16.mxu0 %v7139_v33  ;;  %v7143_v60 = vld [vmem:[#allocation3 + $0x80] sm:$0xff]  }
 0x3e1   : > { %6839 = vmatprep.mubr.bf16.mxu1 %v7143_v60  ;;  %v7152_v46 = vld [vmem:[#allocation3 + $0x80] sm:$0xff]  }
 0x3e4   : > { %v7145_v15 = vld [vmem:[#allocation3 + $0x88] sm:$0xff]  }
 0x3e5   : > { %6840 = vmatmul.mubr.bf16.gmra.mxu1 %v7145_v15  ;;  %v7153_v39 = vld [vmem:[#allocation3 + $0x88] sm:$0xff]  }
 0x3e6   : > { %6891 = vmatprep.mubr.bf16.mxu1 %v7146_v41 }
 0x3e7   : > { %6872 = vmatmul.mubr.bf16.gmra.mxu0 %v7143_v60 }
 0x3ed   : > { %6892 = vmatmul.mubr.bf16.vlgmr.msra.gmra.mxu1 %v7148_v6 }
 0x3ee   : > { %6895 = vmatprep.mubr.bf16.mxu1 %v7149_v58 }
 0x3f5   : > { %6896 = vmatmul.mubr.bf16.gmra.mxu1 %v7150_v27 }
 0x3f6   : > { %6899 = vmatprep.mubr.bf16.mxu1 %v7151_v7 }
 0x3fd   : > { %6900 = vmatmul.mubr.bf16.gmra.mxu1 %v7152_v46 }
 0x3fe   : > { %6903 = vmatprep.mubr.bf16.mxu1 %v7153_v39 }
 0x405   : > { %6904 = vmatmul.mubr.bf16.gmra.mxu1 %v7154_v50 }
 0x431   : > { %v6765_v14 = vpop.f32.mrf.mxu1 }
 0x433   : > { %v4210_v62 = vpop.f32.mrf.mxu1 }
 0x435   : > { %v6766_v30 = vpop.f32.mrf.mxu1 }
 0x436   : > { %v6733_v57 = vpop.f32.mrf.mxu0 }
 0x437   : > { %v4213_v63 = vpop.f32.mrf.mxu1  ;;  %v4219_v19 = vadd.f32 %v6765_v14, %v6733_v57 }
 0x438   : > { %v4059_v49 = vpop.f32.mrf.mxu0 }
 0x439   : > { %v4211_v51 = vadd.f32 %v4210_v62, %v4059_v49 }
 0x43a   : > { %v6734_v31 = vpop.f32.mrf.mxu0 }
 0x43b   : > { %v4222_v23 = vadd.f32 %v6766_v30, %v6734_v31 }
 0x43c   : > { %v4062_v16 = vpop.f32.mrf.mxu0 }
 0x43d   : > { %v4214_v42 = vadd.f32 %v4213_v63, %v4062_v16 }
 0x441   : > { %v6769_v32 = vpop.f32.mrf.mxu1 }
 0x443   : > { %v4226_v18 = vpop.f32.mrf.mxu1 }
 0x445   : > { %v6770_v54 = vpop.f32.mrf.mxu1 }
 0x446   : > { %v6737_v12 = vpop.f32.mrf.mxu0 }
 0x447   : > { %v4229_v38 = vpop.f32.mrf.mxu1  ;;  %v4235_v33 = vadd.f32 %v6769_v32, %v6737_v12 }
 0x448   : > { %v4075_v11 = vpop.f32.mrf.mxu0 }
 0x449   : > { %v4227_v43 = vadd.f32 %v4226_v18, %v4075_v11 }
 0x44a   : > { %v6738_v8 = vpop.f32.mrf.mxu0 }
 0x44b   : > { %v4238_v60 = vadd.f32 %v6770_v54, %v6738_v8 }
 0x44c   : > { %v4078_v28 = vpop.f32.mrf.mxu0 }
 0x44d   : > { %v4230_v39 = vadd.f32 %v4229_v38, %v4078_v28 }
 0x451   : > { %v6773_v10 = vpop.f32.mrf.mxu1 }
 0x453   : > { %v4242_v34 = vpop.f32.mrf.mxu1 }
 0x455   : > { %v6774_v1 = vpop.f32.mrf.mxu1 }
 0x456   : > { %v6741_v36 = vpop.f32.mrf.mxu0 }
 0x457   : > { %v8793_v47 = vpop.f32.mrf.mxu1  ;;  %v4251_v62 = vadd.f32 %v6773_v10, %v6741_v36 }
 0x458   : > { %v4091_v3 = vpop.f32.mrf.mxu0 }
 0x459   : > { %v4243_v11 = vadd.f32 %v4242_v34, %v4091_v3 }
 0x45a   : > { %v8783_v13 = vpop.f32.mrf.mxu0 }
 0x45b   : > { %v4254_v38 = vadd.f32 %v6774_v1, %v8783_v13 }
 0x45c   : > { %v8785_v26 = vpop.f32.mrf.mxu0 }
 0x45d   : > { %v4246_v3 = vadd.f32 %v8793_v47, %v8785_v26 }
 0x465   : > { %v8797_v35 = vpop.f32.mrf.mxu1 }
 0x466   : > { %v8787_v55 = vpop.f32.mrf.mxu0 }
 0x467   : > { %v8804_v24 = vpop.f32.mrf.mxu1  ;;  %v4267_v13 = vadd.f32 %v8797_v35, %v8787_v55 }
 0x468   : > { %v8789_v9 = vpop.f32.mrf.mxu0 }
 0x469   : > { %v8807_v40 = vpop.f32.mrf.mxu1  ;;  %v4259_v26 = vadd.f32 %v8804_v24, %v8789_v9 }
 0x46a   : > { %v8791_v17 = vpop.f32.mrf.mxu0 }
 0x46b   : > { %v4261_v41 = vpop.f32.mrf.mxu1  ;;  %v4270_v55 = vadd.f32 %v8807_v40, %v8791_v17 }
 0x46c   : > { %v8795_v21 = vpop.f32.mrf.mxu0 }
 0x46d   : > { %v4262_v9 = vadd.f32 %v4261_v41, %v8795_v21 }
 0x46e   : > { %v6797_v37 = vpop.f32.mrf.mxu0 }
 0x46f   : > { %v4501_v56 = vadd.f32 %v6797_v37, %v4219_v19 }
 0x470   : > { %v4436_v22 = vpop.f32.mrf.mxu0 }
 0x471   : > { %v4499_v29 = vadd.f32 %v4436_v22, %v4211_v51  ;;  %v4523_v48 = vadd.f32 %v8802_v2, %v4501_v56 }
 0x472   : > { %v6798_v25 = vpop.f32.mrf.mxu0 }
 0x473   : > { %v4502_v45 = vadd.f32 %v6798_v25, %v4222_v23  ;;  %v4521_v20 = vadd.f32 %v8802_v2, %v4499_v29  ;;  %v4539_v44 = vmax.f32 %v4523_v48, 0.0 }
 0x474   : > { %v4439_v53 = vpop.f32.mrf.mxu0 }
 0x475   : > { %v4524_v59 = vadd.f32 %v8802_v2, %v4502_v45  ;;  %v4500_v52 = vadd.f32 %v4439_v53, %v4214_v42  ;;  %v4537_v6 = vmax.f32 %v4521_v20, 0.0 }
 0x476   : > { %v6801_v4 = vpop.f32.mrf.mxu0  ;;  %v8818_v49 = vpop.f32.mrf.mxu1 }
 0x477   : > { %v4540_v0 = vmax.f32 %v4524_v59, 0.0  ;;  %v4522_v5 = vadd.f32 %v8802_v2, %v4500_v52  ;;  %v4505_v61 = vadd.f32 %v6801_v4, %v4235_v33 }
 0x478   : > { %v4452_v15 = vpop.f32.mrf.mxu0  ;;  %v8823_v8 = vpop.f32.mrf.mxu1 }
 0x479   : > { %v6133_v58 = vpack.c.bf16 %v4540_v0, %v4539_v44  ;;  %v4538_v27 = vmax.f32 %v4522_v5, 0.0  ;;  %v4503_v7 = vadd.f32 %v4452_v15, %v4227_v43  ;;  %v4527_v57 = vadd.f32 %v8802_v2, %v4505_v61 }
 0x47a   : > { %v6802_v46 = vpop.f32.mrf.mxu0  ;;  %v8830_v34 = vpop.f32.mrf.mxu1 }
 0x47b   : > { %6252 = vst [vmem:[%s8814_s14 + $0x8] sm:$0xff] %v6133_v58   ;;  %v6128_v50 = vpack.c.bf16 %v4538_v27, %v4537_v6  ;;  %v4506_v14 = vadd.f32 %v6802_v46, %v4238_v60  ;;  %v4525_v16 = vadd.f32 %v8802_v2, %v4503_v7  ;;  %v4543_v32 = vmax.f32 %v4527_v57, 0.0 }
 0x47c   : > { %v4455_v31 = vpop.f32.mrf.mxu0  ;;  %v4816_v45 = vpop.f32.mrf.mxu1 }
 0x47d   : > { %6129 = vst [vmem:[%s8814_s14] sm:$0xff] %v6128_v50   ;;  %v4528_v12 = vadd.f32 %v8802_v2, %v4506_v14  ;;  %v4504_v30 = vadd.f32 %v4455_v31, %v4230_v39  ;;  %v4541_v10 = vmax.f32 %v4525_v16, 0.0 }
 0x47e   : > { %v6805_v63 = vpop.f32.mrf.mxu0 }
 0x47f   : > { %v4544_v18 = vmax.f32 %v4528_v12, 0.0  ;;  %v4526_v28 = vadd.f32 %v8802_v2, %v4504_v30  ;;  %v4509_v54 = vadd.f32 %v6805_v63, %v4251_v62 }
 0x480   : > { %v4468_v36 = vpop.f32.mrf.mxu0 }
 0x481   : > { %v6143_v19 = vpack.c.bf16 %v4544_v18, %v4543_v32  ;;  %v4542_v37 = vmax.f32 %v4526_v28, 0.0  ;;  %v4507_v51 = vadd.f32 %v4468_v36, %v4243_v11  ;;  %v4531_v23 = vadd.f32 %v8802_v2, %v4509_v54 }
 0x482   : > { %v6806_v56 = vpop.f32.mrf.mxu0 }
 0x483   : > { %6254 = vst [vmem:[%s8814_s14 + $0x18] sm:$0xff] %v6143_v19   ;;  %v6138_v22 = vpack.c.bf16 %v4542_v37, %v4541_v10  ;;  %v4510_v29 = vadd.f32 %v6806_v56, %v4254_v38  ;;  %v4529_v1 = vadd.f32 %v8802_v2, %v4507_v51  ;;  %v4547_v53 = vmax.f32 %v4531_v23, 0.0 }
 0x484   : > { %v4471_v25 = vpop.f32.mrf.mxu0 }
 0x485   : > { %6253 = vst [vmem:[%s8814_s14 + $0x10] sm:$0xff] %v6138_v22   ;;  %v4532_v42 = vadd.f32 %v8802_v2, %v4510_v29  ;;  %v4508_v48 = vadd.f32 %v4471_v25, %v4246_v3  ;;  %v4545_v52 = vmax.f32 %v4529_v1, 0.0 }
 0x486   : > { %v6809_v47 = vpop.f32.mrf.mxu0  ;;  %v6833_v44 = vpop.f32.mrf.mxu1 }
 0x487   : > { %v4548_v33 = vmax.f32 %v4532_v42, 0.0  ;;  %v4530_v20 = vadd.f32 %v8802_v2, %v4508_v48  ;;  %v4513_v59 = vadd.f32 %v6809_v47, %v4267_v13 }
 0x488   : > { %v4484_v35 = vpop.f32.mrf.mxu0  ;;  %v4829_v17 = vpop.f32.mrf.mxu1 }
 0x489   : > { %v6153_v43 = vpack.c.bf16 %v4548_v33, %v4547_v53  ;;  %v4546_v4 = vmax.f32 %v4530_v20, 0.0  ;;  %v4511_v0 = vadd.f32 %v4484_v35, %v4259_v26  ;;  %v4535_v61 = vadd.f32 %v8802_v2, %v4513_v59 }
 0x48a   : > { %v6810_v5 = vpop.f32.mrf.mxu0  ;;  %v6834_v57 = vpop.f32.mrf.mxu1 }
 0x48b   : > { %6256 = vst [vmem:[%s8814_s14 + $0x28] sm:$0xff] %v6153_v43   ;;  %v6148_v24 = vpack.c.bf16 %v4546_v4, %v4545_v52  ;;  %v4514_v60 = vadd.f32 %v6810_v5, %v4270_v55  ;;  %v4533_v6 = vadd.f32 %v8802_v2, %v4511_v0  ;;  %v4551_v7 = vmax.f32 %v4535_v61, 0.0 }
 0x48c   : > { %v4487_v15 = vpop.f32.mrf.mxu0  ;;  %v4832_v16 = vpop.f32.mrf.mxu1 }
 0x48d   : > { %6255 = vst [vmem:[%s8814_s14 + $0x20] sm:$0xff] %v6148_v24   ;;  %v4536_v40 = vadd.f32 %v8802_v2, %v4514_v60  ;;  %v4512_v58 = vadd.f32 %v4487_v15, %v4262_v9  ;;  %v4549_v39 = vmax.f32 %v4533_v6, 0.0 }
 0x48f   : > { %v6861_v27 = vpop.f32.mrf.mxu0  ;;  %v4552_v46 = vmax.f32 %v4536_v40, 0.0  ;;  %v4534_v21 = vadd.f32 %v8802_v2, %v4512_v58 }
 0x490   : > { %v4973_v56 = vadd.f32 %v6861_v27, %v8818_v49 }
 0x491   : > { %v4964_v41 = vpop.f32.mrf.mxu0  ;;  %v6163_v50 = vpack.c.bf16 %v4552_v46, %v4551_v7  ;;  %v4550_v14 = vmax.f32 %v4534_v21, 0.0 }
 0x492   : > { %v4965_v22 = vadd.f32 %v4964_v41, %v8823_v8 }
 0x493   : > { %6258 = vst [vmem:[%s8814_s14 + $0x38] sm:$0xff] %v6163_v50   ;;  %v6158_v31 = vpack.c.bf16 %v4550_v14, %v4549_v39  ;;  %v6862_v62 = vpop.f32.mrf.mxu0 }
 0x494   : > { %v4976_v13 = vadd.f32 %v6862_v62, %v8830_v34 }
 0x495   : > { %6257 = vst [vmem:[%s8814_s14 + $0x30] sm:$0xff] %v6158_v31   ;;  %v4967_v12 = vpop.f32.mrf.mxu0 }
 0x496   : > { %v6837_v30 = vpop.f32.mrf.mxu1  ;;  %v4968_v48 = vadd.f32 %v4967_v12, %v4816_v45 }
 0x497   : > { %v6865_v11 = vpop.f32.mrf.mxu0 }
 0x498   : > { %v4845_v63 = vpop.f32.mrf.mxu1  ;;  %v4989_v20 = vadd.f32 %v6865_v11, %v6833_v44 }
 0x499   : > { %v4980_v32 = vpop.f32.mrf.mxu0 }
 0x49a   : > { %v6838_v18 = vpop.f32.mrf.mxu1  ;;  %v4981_v8 = vadd.f32 %v4980_v32, %v4829_v17 }
 0x49b   : > { %v6866_v28 = vpop.f32.mrf.mxu0 }
 0x49c   : > { %v8852_v54 = vpop.f32.mrf.mxu1  ;;  %v4992_v45 = vadd.f32 %v6866_v28, %v6834_v57 }
 0x49d   : > { %v4983_v36 = vpop.f32.mrf.mxu0 }
 0x49e   : > { %v4984_v15 = vadd.f32 %v4983_v36, %v4832_v16 }
 0x49f   : > { %v6869_v37 = vpop.f32.mrf.mxu0 }
 0x4a0   : > { %v5005_v7 = vadd.f32 %v6869_v37, %v6837_v30 }
 0x4a1   : > { %v4996_v29 = vpop.f32.mrf.mxu0 }
 0x4a2   : > { %v4997_v39 = vadd.f32 %v4996_v29, %v4845_v63 }
 0x4a3   : > { %v6870_v53 = vpop.f32.mrf.mxu0 }
 0x4a4   : > { %v5008_v16 = vadd.f32 %v6870_v53, %v6838_v18 }
 0x4a5   : > { %v8854_v38 = vpop.f32.mrf.mxu1  ;;  %v4999_v0 = vpop.f32.mrf.mxu0 }
 0x4a7   : > { %v8856_v10 = vpop.f32.mrf.mxu1  ;;  %v6873_v58 = vpop.f32.mrf.mxu0 }
 0x4a9   : > { %v8858_v19 = vpop.f32.mrf.mxu1  ;;  %v5012_v12 = vpop.f32.mrf.mxu0 }
 0x4ab   : > { %v8860_v51 = vpop.f32.mrf.mxu1 }
 0x4ad   : > { %v6893_v3 = vpop.f32.mrf.mxu1 }
 0x4ae   : > { %v5254_v23 = vadd.f32 %v6893_v3, %v4973_v56  ;;  %v5000_v56 = vadd.f32 %v4999_v0, %v8852_v54 }
 0x4af   : > { %v5189_v25 = vpop.f32.mrf.mxu1 }
 0x4b0   : > { %v5252_v1 = vadd.f32 %v5189_v25, %v4965_v22  ;;  %v5270_v26 = vadd.f32 %v8802_v2, %v5254_v23  ;;  %v6874_v23 = vpop.f32.mrf.mxu0  ;;  %v5021_v25 = vadd.f32 %v6873_v58, %v8854_v38 }
 0x4b1   : > { %v6894_v42 = vpop.f32.mrf.mxu1 }
 0x4b2   : > { %v5255_v47 = vadd.f32 %v6894_v42, %v4976_v13  ;;  %v5268_v59 = vadd.f32 %v8802_v2, %v5252_v1  ;;  %v5286_v52 = vmax.f32 %v5270_v26, 0.0  ;;  %v5013_v42 = vadd.f32 %v5012_v12, %v8856_v10 }
 0x4b3   : > { %v5192_v33 = vpop.f32.mrf.mxu1 }
 0x4b4   : > { %v5271_v49 = vadd.f32 %v8802_v2, %v5255_v47  ;;  %v5253_v55 = vadd.f32 %v5192_v33, %v4968_v48  ;;  %v5284_v9 = vmax.f32 %v5268_v59, 0.0  ;;  %v5024_v33 = vadd.f32 %v6874_v23, %v8858_v19 }
 0x4b5   : > { %v6897_v35 = vpop.f32.mrf.mxu1 }
 0x4b6   : > { %v5287_v43 = vmax.f32 %v5271_v49, 0.0  ;;  %v5269_v34 = vadd.f32 %v8802_v2, %v5253_v55  ;;  %v5258_v4 = vadd.f32 %v6897_v35, %v4989_v20  ;;  %v5015_v20 = vpop.f32.mrf.mxu0 }
 0x4b7   : > { %v5205_v5 = vpop.f32.mrf.mxu1  ;;  %v5016_v10 = vadd.f32 %v5015_v20, %v8860_v51 }
 0x4b8   : > { %v6173_v24 = vpack.c.bf16 %v5287_v43, %v5286_v52  ;;  %v5285_v44 = vmax.f32 %v5269_v34, 0.0  ;;  %v5256_v61 = vadd.f32 %v5205_v5, %v4981_v8  ;;  %v5274_v17 = vadd.f32 %v8802_v2, %v5258_v4 }
 0x4b9   : > { %v6898_v60 = vpop.f32.mrf.mxu1 }
 0x4ba   : > { %6260 = vst [vmem:[%s8814_s14 + $0x48] sm:$0xff] %v6173_v24   ;;  %v6168_v6 = vpack.c.bf16 %v5285_v44, %v5284_v9  ;;  %v5259_v40 = vadd.f32 %v6898_v60, %v4992_v45  ;;  %v5272_v46 = vadd.f32 %v8802_v2, %v5256_v61  ;;  %v5290_v57 = vmax.f32 %v5274_v17, 0.0 }
 0x4bb   : > { %v5208_v27 = vpop.f32.mrf.mxu1 }
 0x4bc   : > { %6259 = vst [vmem:[%s8814_s14 + $0x40] sm:$0xff] %v6168_v6   ;;  %v5275_v21 = vadd.f32 %v8802_v2, %v5259_v40  ;;  %v5257_v41 = vadd.f32 %v5208_v27, %v4984_v15  ;;  %v5288_v32 = vmax.f32 %v5272_v46, 0.0 }
 0x4bd   : > { %v6901_v50 = vpop.f32.mrf.mxu1 }
 0x4be   : > { %v5291_v14 = vmax.f32 %v5275_v21, 0.0  ;;  %v5273_v31 = vadd.f32 %v8802_v2, %v5257_v41  ;;  %v5262_v62 = vadd.f32 %v6901_v50, %v5005_v7 }
 0x4bf   : > { %v5221_v11 = vpop.f32.mrf.mxu1 }
 0x4c0   : > { %v6183_v30 = vpack.c.bf16 %v5291_v14, %v5290_v57  ;;  %v5289_v28 = vmax.f32 %v5273_v31, 0.0  ;;  %v5260_v36 = vadd.f32 %v5221_v11, %v4997_v39  ;;  %v5278_v63 = vadd.f32 %v8802_v2, %v5262_v62 }
 0x4c1   : > { %v6902_v37 = vpop.f32.mrf.mxu1 }
 0x4c2   : > { %6262 = vst [vmem:[%s8814_s14 + $0x58] sm:$0xff] %v6183_v30   ;;  %v6178_v3 = vpack.c.bf16 %v5289_v28, %v5288_v32  ;;  %v5263_v22 = vadd.f32 %v6902_v37, %v5008_v16  ;;  %v5276_v18 = vadd.f32 %v8802_v2, %v5260_v36  ;;  %v5294_v54 = vmax.f32 %v5278_v63, 0.0 }
 0x4c3   : > { %v5224_v29 = vpop.f32.mrf.mxu1 }
 0x4c4   : > { %6261 = vst [vmem:[%s8814_s14 + $0x50] sm:$0xff] %v6178_v3   ;;  %v5279_v13 = vadd.f32 %v8802_v2, %v5263_v22  ;;  %v5261_v1 = vadd.f32 %v5224_v29, %v5000_v56  ;;  %v5292_v59 = vmax.f32 %v5276_v18, 0.0 }
 0x4c5   : > { %v6905_v48 = vpop.f32.mrf.mxu1 }
 0x4c6   : > { %v5295_v26 = vmax.f32 %v5279_v13, 0.0  ;;  %v5277_v47 = vadd.f32 %v8802_v2, %v5261_v1  ;;  %v5266_v53 = vadd.f32 %v6905_v48, %v5021_v25 }
 0x4c7   : > { %v5237_v38 = vpop.f32.mrf.mxu1 }
 0x4c8   : > { %v6193_v49 = vpack.c.bf16 %v5295_v26, %v5294_v54  ;;  %v5293_v55 = vmax.f32 %v5277_v47, 0.0  ;;  %v5264_v8 = vadd.f32 %v5237_v38, %v5013_v42  ;;  %v5282_v43 = vadd.f32 %v8802_v2, %v5266_v53 }
 0x4c9   : > { %v6906_v35 = vpop.f32.mrf.mxu1 }
 0x4ca   : > { %6264 = vst [vmem:[%s8814_s14 + $0x68] sm:$0xff] %v6193_v49   ;;  %v6188_v52 = vpack.c.bf16 %v5293_v55, %v5292_v59  ;;  %v5267_v34 = vadd.f32 %v6906_v35, %v5024_v33  ;;  %v5280_v19 = vadd.f32 %v8802_v2, %v5264_v8  ;;  %v5298_v5 = vmax.f32 %v5282_v43, 0.0 }
 0x4cb   : > { %v5240_v4 = vpop.f32.mrf.mxu1 }
 0x4cc   : > { %6263 = vst [vmem:[%s8814_s14 + $0x60] sm:$0xff] %v6188_v52   ;;  %v5283_v45 = vadd.f32 %v8802_v2, %v5267_v34  ;;  %v5265_v0 = vadd.f32 %v5240_v4, %v5016_v10  ;;  %v5296_v24 = vmax.f32 %v5280_v19, 0.0 }
 0x4ce   : > { %v5299_v9 = vmax.f32 %v5283_v45, 0.0  ;;  %v5281_v51 = vadd.f32 %v8802_v2, %v5265_v0 }
 0x4d0   : > { %v6203_v44 = vpack.c.bf16 %v5299_v9, %v5298_v5  ;;  %v5297_v61 = vmax.f32 %v5281_v51, 0.0 }
 0x4d2   : > { %6266 = vst [vmem:[%s8814_s14 + $0x78] sm:$0xff] %v6203_v44   ;;  %v6198_v60 = vpack.c.bf16 %v5297_v61, %v5296_v24 }
 0x4d4   : > { %6265 = vst [vmem:[%s8814_s14 + $0x70] sm:$0xff] %v6198_v60  }
 0x4d5   : > { %7276 = shalt.err (!%p7273_p4)
}
 0x4d6   : > { %s7277_s10 = scalar_lea.hbm %s8897_s9, 2048  ;;  %s7281_s13 = scalar_lea.hbm %s8951_s7, 4096 }
 0x4d7   : > { %p7278_p5 = scmp.ne.s32.totalorder %s8897_s9, %s7277_s10  ;;  %p7282_p2 = scmp.lt.s32.totalorder %s8897_s9, %s8951_s7 }
 0x4d8   : > { %p7283_p6 = scmp.lt.s32.totalorder %s7281_s13, %s7277_s10 }
 0x4d9   : > { %p7279_p7 = pnand %p7278_p5, %p9087_p10 }
 0x4da   : > { %p7284_p12 = por %p7283_p6, %p7282_p2 }
 0x4db   : > { %p7280_p8 = pneg %p7279_p7 }
 0x4dd   : > { %p7285_p0 = pnand %p7284_p12, %p7280_p8 }
 0x4df   : > { %7288 = shalt.err (!%p7285_p0)
}
 0x4e0   : > { %s7355_s21 = smov 64   ;;  %s7356_s16 = smov 4  }
 0x4e1   : > { %6919 = dma.vmem_to_hbm [thread:$0]  (%p9087_p10), %s8899_s17, 2048, %s8897_s9, %s5381_s12, %s7355_s21, %s7355_s21, %s7356_s16  }
 0x4e2 PF: > { %s5409_s14 = sand.u32 1, %s7327_s24   ;;  %p9088_p3 = scmp.ne.s32.totalorder %s8981_s8, 0 }
 0x4e3   : > { %p9089_p11 = scmp.ge.s32.totalorder %s7339_s27, 2  ;;  %s5410_s15 = scalar_lea.sflag [#allocation7], %s5409_s14 }
 0x4e5   : > { %p6936_p9 = pnand %p9089_p11, %p9088_p3 }
 0x4e7   : > { %p6937_p13 = pneg %p6936_p9 }
 0x4e9   : > { %7322 = dma.done.wait (%p6937_p13), %s5410_s15, 2048  }
 0x4ea   : > { %7324 = vsyncadd (%p6937_p13), %s5410_s15, 4294965248  ;;  %s9090_s29 = sld [smem:[#allocation19_spill]]  ;;  %p24_p1 = scmp.ge.s32.totalorder %s7475_s23, 4  }
 0x4eb   : > { %s9091_s26 = sld [smem:[#allocation20_spill]]  ;;  %s9092_s24 = smov %s7331_s25 }
 0x4ec   : > { %s9094_s27 = smov %s7475_s23  ;;  %26 = sbr.rel (!%p24_p1) target bundleno = 12 (0xc), region = 118 }
 0x4f0   : > { %s9093_s25 = smov %s9090_s29 }
 0x4f1   :  { %5415 = vsyncpa [#allocation6], 1 }
 0x4f2   :  { %5417 = vsyncpa [#allocation6 + $0x1], 1 }
 0x4f3   :  { %5418 = vsyncpa [#allocation9], 1 }
 0x4f4   :  { %5420 = vsyncpa [#allocation9 + $0x1], 1 }
 0x4f5   :  { %5421 = vsyncpa [#allocation12], 1 }
 0x4f6   :  { %5422 = vsyncpa [#allocation7], 1 }
 0x4f7   :  { %5424 = vsyncpa [#allocation7 + $0x1], 1 }

</bundles_post_ra>
